<compile_context>
chip_gen: v5e
topology: v5e:2x2
jax: 0.10.0
libtpu: 0.0.40
codegen_flags: <defaults>
</compile_context>

<pallas_src>
import functools

import jax
import jax.numpy as jnp
from jax.experimental import pallas as pl
from jax.experimental.pallas import tpu as pltpu

FEAT = 2048      # torchvision resnet152 fc.in_features
EMB = 300        # Linear(2048, 300)
EMB_PAD = 384    # 3 * 128 -> lane-dense head output
PATCH = 4        # patch-embed stand-in for the frozen conv backbone
KIN = PATCH * PATCH * 3
KIN_PAD = 128    # contraction dim padded to one full lane tile
BN_EPS = 1e-5    # nn.BatchNorm1d default eps
TP_MAX = 512     # spatial (patch) tile: 2x(512x128 bf16 in) + (1,2048) f32 acc << VMEM on v5e/v6e/v7x


def _round_up(v, m):
    return ((v + m - 1) // m) * m


# ----------------------------- Pallas kernels ------------------------------

def _backbone_kernel(x_ref, w_ref, o_ref, *, inv_p):
    """Patch-embed matmul + ReLU with fused global average pooling.

    x_ref: (1, TP, KIN_PAD) bf16   one sample's tile of patches
    w_ref: (KIN_PAD, FEAT)  bf16   patch-embed weight (resident)
    o_ref: (1, 1, FEAT)     f32    pooled features, resident across the spatial axis
    """
    j = pl.program_id(1)

    @pl.when(j == 0)
    def _init():
        o_ref[...] = jnp.zeros_like(o_ref)

    y = jnp.dot(x_ref[0], w_ref[...], preferred_element_type=jnp.float32)  # (TP, FEAT)
    y = jnp.maximum(y, 0.0)                                                # ReLU
    o_ref[...] += jnp.sum(y, axis=0, keepdims=True)[None]                  # (1,1,FEAT)

    @pl.when(j == pl.num_programs(1) - 1)
    def _finalize():
        o_ref[...] = o_ref[...] * jnp.float32(inv_p)                       # mean over P


def _head_kernel(x_ref, w_ref, b_ref, g_ref, beta_ref, o_ref, *, n_real):
    """Fused Linear(2048->EMB_PAD) + BatchNorm1d (training-mode batch statistics).

    Batch is padded to 8 sublanes; padded rows are masked out of the BN stats so
    the statistics match the unpadded batch exactly.
    """
    z = jnp.dot(x_ref[...], w_ref[...], preferred_element_type=jnp.float32)
    z = z + b_ref[...]                                        # (N_pad, EMB_PAD)

    row = jax.lax.broadcasted_iota(jnp.int32, z.shape, 0)
    valid = (row < n_real).astype(jnp.float32)
    inv_n = jnp.float32(1.0 / n_real)

    mean = jnp.sum(z * valid, axis=0, keepdims=True) * inv_n          # per-feature mean
    centered = (z - mean) * valid
    var = jnp.sum(centered * centered, axis=0, keepdims=True) * inv_n  # biased variance
    inv_std = jax.lax.rsqrt(var + BN_EPS)

    o_ref[...] = g_ref[...] * (z - mean) * inv_std + beta_ref[...]


# ------------------------------ pallas_call glue ----------------------------

def backbone_pool(x, conv_w, *, p_real, tp):
    """x: (N, P_pad, KIN_PAD) bf16 -> pooled features (N, FEAT) f32."""
    n, p_pad, kin_pad = x.shape
    grid = (n, p_pad // tp)
    kernel = functools.partial(_backbone_kernel, inv_p=1.0 / p_real)
    pooled = pl.pallas_call(
        kernel,
        out_shape=jax.ShapeDtypeStruct((n, 1, FEAT), jnp.float32),
        grid=grid,
        in_specs=[pl.BlockSpec((1, tp, kin_pad), lambda i, j: (i, j, 0)),
                  pl.BlockSpec((kin_pad, FEAT), lambda i, j: (0, 0))],
        out_specs=pl.BlockSpec((1, 1, FEAT), lambda i, j: (i, 0, 0)),
        compiler_params=pltpu.CompilerParams(
            dimension_semantics=("parallel", "arbitrary")),
    )(x, conv_w)
    return pooled.reshape(n, FEAT)


def head(x, w, b, gamma, beta, *, n_real):
    """x: (N_pad, FEAT) f32 -> (N_pad, EMB_PAD) f32 (Linear + BatchNorm1d fused)."""
    n_pad, k = x.shape
    kernel = functools.partial(_head_kernel, n_real=n_real)
    return pl.pallas_call(
        kernel,
        out_shape=jax.ShapeDtypeStruct((n_pad, EMB_PAD), jnp.float32),
        grid=(1,),
        in_specs=[pl.BlockSpec((n_pad, k), lambda i: (0, 0)),
                  pl.BlockSpec((k, EMB_PAD), lambda i: (0, 0)),
                  pl.BlockSpec((1, EMB_PAD), lambda i: (0, 0)),
                  pl.BlockSpec((1, EMB_PAD), lambda i: (0, 0)),
                  pl.BlockSpec((1, EMB_PAD), lambda i: (0, 0))],
        out_specs=pl.BlockSpec((n_pad, EMB_PAD), lambda i: (0, 0)),
    )(x, w, b, gamma, beta)


# ------------------------------- model wrapper ------------------------------

def init_params(key):
    k0, k1, k2 = jax.random.split(key, 3)
    # backbone stand-in (frozen in the original module); padded rows are zero.
    conv_w = jax.random.normal(k0, (KIN, FEAT), jnp.float32) * 0.05
    conv_w = jnp.pad(conv_w, ((0, KIN_PAD - KIN), (0, 0))).astype(jnp.bfloat16)
    # Linear(2048, 300): stored transposed (in, out) and lane-padded to 384.
    fc_w = jax.random.normal(k1, (FEAT, EMB), jnp.float32) * (1.0 / FEAT ** 0.5)
    fc_w = jnp.pad(fc_w, ((0, 0), (0, EMB_PAD - EMB)))
    fc_b = jnp.pad(jax.random.normal(k2, (1, EMB), jnp.float32) * 0.01,
                   ((0, 0), (0, EMB_PAD - EMB)))
    # BatchNorm1d(300) affine params (default init gamma=1, beta=0); pads are zero.
    bn_g = jnp.pad(jnp.ones((1, EMB), jnp.float32), ((0, 0), (0, EMB_PAD - EMB)))
    bn_b = jnp.zeros((1, EMB_PAD), jnp.float32)
    return {"conv_w": conv_w, "fc_w": fc_w, "fc_b": fc_b, "bn_g": bn_g, "bn_b": bn_b}


def cnn_forward(params, samples_nchw):
    """samples_nchw: (N, 3, H, W) float32, PyTorch conv layout."""
    n, c, h, w = samples_nchw.shape
    assert c == 3 and h % PATCH == 0 and w % PATCH == 0

    x = jnp.transpose(samples_nchw, (0, 2, 3, 1))                   # -> NHWC
    hp, wp = h // PATCH, w // PATCH
    p = hp * wp
    x = x.reshape(n, hp, PATCH, wp, PATCH, c).transpose(0, 1, 3, 2, 4, 5)
    x = x.reshape(n, p, KIN)                                        # (N, P, 48)

    # pad the contraction dim to 128 lanes and the spatial dim to a tile multiple;
    # zero rows/cols contribute nothing to the matmul / pooled sum.
    tp = min(TP_MAX, _round_up(p, 8))
    p_pad = _round_up(p, tp)
    x = jnp.pad(x, ((0, 0), (0, p_pad - p), (0, KIN_PAD - KIN)))
    x = x.astype(jnp.bfloat16)                                      # MXU-native operands

    pooled = backbone_pool(x, params["conv_w"], p_real=p, tp=tp)    # (N, 2048) f32
    # == flatten of the (N, 2048, 1, 1) backbone output

    n_pad = _round_up(n, 8)                                         # full sublanes for the head
    pooled = jnp.pad(pooled, ((0, n_pad - n), (0, 0)))
    out = head(pooled, params["fc_w"], params["fc_b"],
               params["bn_g"], params["bn_b"], n_real=n)            # (N_pad, 384)
    return out[:n, :EMB]                                            # (N, 300)


if __name__ == "__main__":
    key = jax.random.PRNGKey(0)
    pkey, xkey = jax.random.split(key)
    params = init_params(pkey)

    # small, module-consistent input: batch=2, 3-channel image, 16x16 spatial
    x = jax.random.normal(xkey, (2, 3, 16, 16), jnp.float32)

    out = jax.jit(cnn_forward)(params, x)
    out = jax.block_until_ready(out)

    assert out.shape == (2, 300), out.shape
    assert bool(jnp.all(jnp.isfinite(out)))
    print("KERNEL_OK")
</pallas_src>

<mosaic_0001>
module attributes {stable_mosaic.version = 11 : i64} {
  func.func @_backbone_kernel(%arg0: i32, %arg1: i32, %arg2: memref<1x16x128xbf16, #tpu.memory_space<vmem>>, %arg3: memref<128x2048xbf16, #tpu.memory_space<vmem>>, %arg4: memref<1x1x2048xf32, #tpu.memory_space<vmem>>) attributes {dimension_semantics = [#tpu.dimension_semantics<parallel>, #tpu.dimension_semantics<arbitrary>], iteration_bounds = array<i64: 2, 1>, scalar_prefetch = 0 : i64, scratch_operands = 0 : i64, tpu.core_type = #tpu.core_type<tc>, window_params = [{transform_indices = @transform_0, window_bounds = array<i64: 1, 16, 128>}, {pipeline_mode = #tpu.pipeline_mode<synchronous>, transform_indices = @transform_1, window_bounds = array<i64: 128, 2048>}, {transform_indices = @transform_2, window_bounds = array<i64: 1, 1, 2048>}]} {
    %c0_i32 = arith.constant 0 : i32
    %0 = arith.cmpi eq, %arg1, %c0_i32 : i32
    %1 = arith.extui %0 : i1 to i32
    %c0_i32_0 = arith.constant 0 : i32
    %2 = arith.cmpi ne, %1, %c0_i32_0 : i32
    scf.if %2 {
      %cst_15 = arith.constant 0.000000e+00 : f32
      %18 = vector.broadcast %cst_15 : f32 to vector<1x1x2048xf32>
      %c0_16 = arith.constant 0 : index
      %c0_17 = arith.constant 0 : index
      %c0_18 = arith.constant 0 : index
      %19 = vector.load %arg4[%c0_16, %c0_17, %c0_18] : memref<1x1x2048xf32, #tpu.memory_space<vmem>>, vector<1x1x2048xf32>
      tpu.vector_store %arg4[%c0_16, %c0_17, %c0_18], %18 {strides = array<i32>} : memref<1x1x2048xf32, #tpu.memory_space<vmem>>, vector<1x1x2048xf32>,
    } else {
    }
    %c0 = arith.constant 0 : index
    %c0_1 = arith.constant 0 : index
    %c0_2 = arith.constant 0 : index
    %3 = vector.load %arg2[%c0, %c0_1, %c0_2] : memref<1x16x128xbf16, #tpu.memory_space<vmem>>, vector<1x16x128xbf16>
    %4 = vector.shape_cast %3 : vector<1x16x128xbf16> to vector<16x128xbf16>
    %c0_3 = arith.constant 0 : index
    %c0_4 = arith.constant 0 : index
    %5 = vector.load %arg3[%c0_3, %c0_4] : memref<128x2048xbf16, #tpu.memory_space<vmem>>, vector<128x2048xbf16>
    %cst = arith.constant dense<0.000000e+00> : vector<16x2048xf32>
    %6 = tpu.matmul %4, %5, %cst {dimension_numbers = #tpu.dot_dimension_numbers<[1], [0], [0], [1], [0, 0, 1, 1], [], []>} : vector<16x128xbf16>, vector<128x2048xbf16>, vector<16x2048xf32> -> vector<16x2048xf32>
    %cst_5 = arith.constant 0.000000e+00 : f32
    %7 = vector.broadcast %cst_5 : f32 to vector<16x2048xf32>
    %8 = arith.maximumf %6, %7 : vector<16x2048xf32>
    %c0_6 = arith.constant 0 : index
    %c0_7 = arith.constant 0 : index
    %c0_8 = arith.constant 0 : index
    %9 = vector.load %arg4[%c0_6, %c0_7, %c0_8] : memref<1x1x2048xf32, #tpu.memory_space<vmem>>, vector<1x1x2048xf32>
    %cst_9 = arith.constant dense<0.000000e+00> : vector<2048xf32>
    %10 = vector.multi_reduction <add>, %8, %cst_9 [0] : vector<16x2048xf32> to vector<2048xf32>
    %11 = vector.shape_cast %10 : vector<2048xf32> to vector<1x2048xf32>
    %12 = vector.shape_cast %11 : vector<1x2048xf32> to vector<1x1x2048xf32>
    %13 = arith.addf %9, %12 : vector<1x1x2048xf32>
    %c0_10 = arith.constant 0 : index
    %c0_11 = arith.constant 0 : index
    %c0_12 = arith.constant 0 : index
    %14 = vector.load %arg4[%c0_10, %c0_11, %c0_12] : memref<1x1x2048xf32, #tpu.memory_space<vmem>>, vector<1x1x2048xf32>
    tpu.vector_store %arg4[%c0_10, %c0_11, %c0_12], %13 {strides = array<i32>} : memref<1x1x2048xf32, #tpu.memory_space<vmem>>, vector<1x1x2048xf32>,
    %c0_i32_13 = arith.constant 0 : i32
    %15 = arith.cmpi eq, %arg1, %c0_i32_13 : i32
    %16 = arith.extui %15 : i1 to i32
    %c0_i32_14 = arith.constant 0 : i32
    %17 = arith.cmpi ne, %16, %c0_i32_14 : i32
    scf.if %17 {
      %c0_15 = arith.constant 0 : index
      %c0_16 = arith.constant 0 : index
      %c0_17 = arith.constant 0 : index
      %18 = vector.load %arg4[%c0_15, %c0_16, %c0_17] : memref<1x1x2048xf32, #tpu.memory_space<vmem>>, vector<1x1x2048xf32>
      %cst_18 = arith.constant 6.250000e-02 : f32
      %19 = vector.broadcast %cst_18 : f32 to vector<1x1x2048xf32>
      %20 = arith.mulf %18, %19 : vector<1x1x2048xf32>
      %c0_19 = arith.constant 0 : index
      %c0_20 = arith.constant 0 : index
      %c0_21 = arith.constant 0 : index
      %21 = vector.load %arg4[%c0_19, %c0_20, %c0_21] : memref<1x1x2048xf32, #tpu.memory_space<vmem>>, vector<1x1x2048xf32>
      tpu.vector_store %arg4[%c0_19, %c0_20, %c0_21], %20 {strides = array<i32>} : memref<1x1x2048xf32, #tpu.memory_space<vmem>>, vector<1x1x2048xf32>,
    } else {
    }
    return
  }
  func.func @transform_0(%arg0: i32, %arg1: i32) -> (i32, i32, i32) {
    %c0_i32 = arith.constant 0 : i32
    %c0_i32_0 = arith.constant 0 : i32
    return %arg0, %arg1, %c0_i32 : i32, i32, i32
  }
  func.func @transform_1(%arg0: i32, %arg1: i32) -> (i32, i32) {
    %c0_i32 = arith.constant 0 : i32
    %c0_i32_0 = arith.constant 0 : i32
    %c0_i32_1 = arith.constant 0 : i32
    return %c0_i32, %c0_i32_0 : i32, i32
  }
  func.func @transform_2(%arg0: i32, %arg1: i32) -> (i32, i32, i32) {
    %c0_i32 = arith.constant 0 : i32
    %c0_i32_0 = arith.constant 0 : i32
    %c0_i32_1 = arith.constant 0 : i32
    return %arg0, %c0_i32, %c0_i32_0 : i32, i32, i32
  }
}

module attributes {stable_mosaic.version = 11 : i64} {
  func.func @_head_kernel(%arg0: i32, %arg1: memref<8x2048xf32, #tpu.memory_space<vmem>>, %arg2: memref<2048x384xf32, #tpu.memory_space<vmem>>, %arg3: memref<1x384xf32, #tpu.memory_space<vmem>>, %arg4: memref<1x384xf32, #tpu.memory_space<vmem>>, %arg5: memref<1x384xf32, #tpu.memory_space<vmem>>, %arg6: memref<8x384xf32, #tpu.memory_space<vmem>>) attributes {dimension_semantics = [#tpu.dimension_semantics<arbitrary>], iteration_bounds = array<i64: 1>, scalar_prefetch = 0 : i64, scratch_operands = 0 : i64, tpu.core_type = #tpu.core_type<tc>, window_params = [{pipeline_mode = #tpu.pipeline_mode<synchronous>, transform_indices = @transform_0, window_bounds = array<i64: 8, 2048>}, {pipeline_mode = #tpu.pipeline_mode<synchronous>, transform_indices = @transform_1, window_bounds = array<i64: 2048, 384>}, {pipeline_mode = #tpu.pipeline_mode<synchronous>, transform_indices = @transform_2, window_bounds = array<i64: 1, 384>}, {pipeline_mode = #tpu.pipeline_mode<synchronous>, transform_indices = @transform_3, window_bounds = array<i64: 1, 384>}, {pipeline_mode = #tpu.pipeline_mode<synchronous>, transform_indices = @transform_4, window_bounds = array<i64: 1, 384>}, {pipeline_mode = #tpu.pipeline_mode<synchronous>, transform_indices = @transform_5, window_bounds = array<i64: 8, 384>}]} {
    %c0 = arith.constant 0 : index
    %c0_0 = arith.constant 0 : index
    %0 = vector.load %arg1[%c0, %c0_0] : memref<8x2048xf32, #tpu.memory_space<vmem>>, vector<8x2048xf32>
    %c0_1 = arith.constant 0 : index
    %c0_2 = arith.constant 0 : index
    %1 = vector.load %arg2[%c0_1, %c0_2] : memref<2048x384xf32, #tpu.memory_space<vmem>>, vector<2048x384xf32>
    %cst = arith.constant dense<0.000000e+00> : vector<8x384xf32>
    %2 = tpu.matmul %0, %1, %cst {dimension_numbers = #tpu.dot_dimension_numbers<[1], [0], [0], [1], [0, 0, 1, 1], [], []>} : vector<8x2048xf32>, vector<2048x384xf32>, vector<8x384xf32> -> vector<8x384xf32>
    %c0_3 = arith.constant 0 : index
    %c0_4 = arith.constant 0 : index
    %3 = vector.load %arg3[%c0_3, %c0_4] : memref<1x384xf32, #tpu.memory_space<vmem>>, vector<1x384xf32>
    %4 = vector.broadcast %3 : vector<1x384xf32> to vector<8x384xf32>
    %5 = arith.addf %2, %4 : vector<8x384xf32>
    %6 = tpu.iota {dimensions = array<i32: 0>} : vector<8x384xi32>
    %c2_i32 = arith.constant 2 : i32
    %7 = vector.broadcast %c2_i32 : i32 to vector<8x384xi32>
    %8 = arith.cmpi slt, %6, %7 : vector<8x384xi32>
    %9 = arith.extui %8 : vector<8x384xi1> to vector<8x384xi32>
    %10 = arith.sitofp %9 : vector<8x384xi32> to vector<8x384xf32>
    %11 = arith.mulf %5, %10 : vector<8x384xf32>
    %cst_5 = arith.constant dense<0.000000e+00> : vector<384xf32>
    %12 = vector.multi_reduction <add>, %11, %cst_5 [0] : vector<8x384xf32> to vector<384xf32>
    %13 = vector.shape_cast %12 : vector<384xf32> to vector<1x384xf32>
    %cst_6 = arith.constant 5.000000e-01 : f32
    %14 = vector.broadcast %cst_6 : f32 to vector<1x384xf32>
    %15 = arith.mulf %13, %14 : vector<1x384xf32>
    %16 = vector.broadcast %15 : vector<1x384xf32> to vector<8x384xf32>
    %17 = arith.subf %5, %16 : vector<8x384xf32>
    %18 = arith.mulf %17, %10 : vector<8x384xf32>
    %19 = arith.mulf %18, %18 : vector<8x384xf32>
    %cst_7 = arith.constant dense<0.000000e+00> : vector<384xf32>
    %20 = vector.multi_reduction <add>, %19, %cst_7 [0] : vector<8x384xf32> to vector<384xf32>
    %21 = vector.shape_cast %20 : vector<384xf32> to vector<1x384xf32>
    %cst_8 = arith.constant 5.000000e-01 : f32
    %22 = vector.broadcast %cst_8 : f32 to vector<1x384xf32>
    %23 = arith.mulf %21, %22 : vector<1x384xf32>
    %cst_9 = arith.constant 9.99999974E-6 : f32
    %24 = vector.broadcast %cst_9 : f32 to vector<1x384xf32>
    %25 = arith.addf %23, %24 : vector<1x384xf32>
    %26 = math.rsqrt %25 : vector<1x384xf32>
    %c0_10 = arith.constant 0 : index
    %c0_11 = arith.constant 0 : index
    %27 = vector.load %arg4[%c0_10, %c0_11] : memref<1x384xf32, #tpu.memory_space<vmem>>, vector<1x384xf32>
    %28 = vector.broadcast %15 : vector<1x384xf32> to vector<8x384xf32>
    %29 = arith.subf %5, %28 : vector<8x384xf32>
    %30 = vector.broadcast %27 : vector<1x384xf32> to vector<8x384xf32>
    %31 = arith.mulf %30, %29 : vector<8x384xf32>
    %32 = vector.broadcast %26 : vector<1x384xf32> to vector<8x384xf32>
    %33 = arith.mulf %31, %32 : vector<8x384xf32>
    %c0_12 = arith.constant 0 : index
    %c0_13 = arith.constant 0 : index
    %34 = vector.load %arg5[%c0_12, %c0_13] : memref<1x384xf32, #tpu.memory_space<vmem>>, vector<1x384xf32>
    %35 = vector.broadcast %34 : vector<1x384xf32> to vector<8x384xf32>
    %36 = arith.addf %33, %35 : vector<8x384xf32>
    %c0_14 = arith.constant 0 : index
    %c0_15 = arith.constant 0 : index
    %37 = vector.load %arg6[%c0_14, %c0_15] : memref<8x384xf32, #tpu.memory_space<vmem>>, vector<8x384xf32>
    tpu.vector_store %arg6[%c0_14, %c0_15], %36 {strides = array<i32>} : memref<8x384xf32, #tpu.memory_space<vmem>>, vector<8x384xf32>,
    return
  }
  func.func @transform_0(%arg0: i32) -> (i32, i32) {
    %c0_i32 = arith.constant 0 : i32
    %c0_i32_0 = arith.constant 0 : i32
    %c0_i32_1 = arith.constant 0 : i32
    return %c0_i32, %c0_i32_0 : i32, i32
  }
  func.func @transform_1(%arg0: i32) -> (i32, i32) {
    %c0_i32 = arith.constant 0 : i32
    %c0_i32_0 = arith.constant 0 : i32
    %c0_i32_1 = arith.constant 0 : i32
    return %c0_i32, %c0_i32_0 : i32, i32
  }
  func.func @transform_2(%arg0: i32) -> (i32, i32) {
    %c0_i32 = arith.constant 0 : i32
    %c0_i32_0 = arith.constant 0 : i32
    %c0_i32_1 = arith.constant 0 : i32
    return %c0_i32, %c0_i32_0 : i32, i32
  }
  func.func @transform_3(%arg0: i32) -> (i32, i32) {
    %c0_i32 = arith.constant 0 : i32
    %c0_i32_0 = arith.constant 0 : i32
    %c0_i32_1 = arith.constant 0 : i32
    return %c0_i32, %c0_i32_0 : i32, i32
  }
  func.func @transform_4(%arg0: i32) -> (i32, i32) {
    %c0_i32 = arith.constant 0 : i32
    %c0_i32_0 = arith.constant 0 : i32
    %c0_i32_1 = arith.constant 0 : i32
    return %c0_i32, %c0_i32_0 : i32, i32
  }
  func.func @transform_5(%arg0: i32) -> (i32, i32) {
    %c0_i32 = arith.constant 0 : i32
    %c0_i32_0 = arith.constant 0 : i32
    %c0_i32_1 = arith.constant 0 : i32
    return %c0_i32, %c0_i32_0 : i32, i32
  }
}

</mosaic_0001>

<bundles_post_ra>
// kernel: cnn_forward.2
= control target key start
LH: loop header
LB: loop body
LE: loop exit
PB: predicated region body
PF: predicated region fallthrough
CT: control target
= control target key end

     0   :  { %7 = vsyncpa [#allocation3], 0  ;;  %s2257_s9 = smov 0   ;;  %s2259_s10 = smov 0   ;;  %s2342_s0 = inlined_call_operand.vmem [shape: bf16[2,16,128], index: 0, kind: input, shape index: {}]   ;;  %s2343_s1 = inlined_call_operand.hbm [shape: bf16[128,2048], index: 1, kind: input, shape index: {}]   ;;  %s2344_s2 = inlined_call_operand.vmem [shape: f32[2,1,2048], index: 2, kind: output, shape index: {}]  }
   0x1   :  { %s2261_s11 = smov 0  }
   0x2 LB: > { %s1485_s12 = sadd.s32 4294967295, %s2237_s11   ;;  %s25_s13 = sadd.s32 1, %s2233_s10  ;;  %s2237_s11 = sphi %s2261_s11, %s13_s11   ;;  %s2233_s10 = sphi %s2259_s10, %s2346_s10   ;;  %s2229_s9 = sphi %s2257_s9, %s2345_s9  }
   0x3   : > { %p27_p0 = scmp.ge.s32.totalorder %s25_s13, 2  ;;  %p1487_p1 = scmp.ge.s32.totalorder %s2237_s11, 1 }
   0x4   : > { %p105_p2 = scmp.lt.s32.totalorder %s2237_s11, 3  ;;  %p2151_p4 = scmp.eq.s32.totalorder %s1485_s12, 0 }
   0x5   : > { %s2348_s13 = smov (%p27_p0, %s25_s13), 0  ;;  %s116_s16 = sshll.u32 %s2343_s1, 4  ;;  %s117_s16 = int_to_ptr.hbm [resolvable:$true] %s116_s16 }
   0x6   : > { %p106_p3 = pnand %p1487_p1, %p105_p2  ;;  %s2239_s17 = smov [#allocation2]  }
   0x7   : > { %s118_s18 = sshll.u32 %s2239_s17, 4  ;;  %s2240_s19 = smov 1024   ;;  %s119_s18 = int_to_ptr.vmem [resolvable:$true] %s118_s18 }
   0x8   : > { %p2147_p5 = pneg %p106_p3  ;;  %s2241_s20 = smov 64  }
   0x9   : > { %147 = sbr.rel (%p106_p3) target bundleno = 312 (0x138), region = 28 }
   0xa   : > { %p2148_p6 = pnand %p2151_p4, %p2147_p5 }
   0xc   : > { %2150 = dma.hbm_to_vmem [thread:$0]  (!%p2148_p6), %s117_s16, 16384, %s119_s18, [#allocation3], %s2240_s19, %s2240_s19, %s2241_s20  }
   0xe   : > { %2224 = dma.done.wait (%p2151_p4), [#allocation3], 16384  }
   0xf   : > { %2226 = vsyncadd (%p2151_p4), [#allocation3], 4294950912  ;;  %v1949_v0 = vld [vmem:[#allocation2 + $0x380] sm:$0xf]  ;;  %v2127_v2 = vld [vmem:[#allocation2 + $0x384] sm:$0xf] }
  0x10   : > { %v2135_v1 = vld [vmem:[#allocation2 + $0x3bc] sm:$0xf0]  ;;  %v1951_v4 = vld [vmem:[#allocation2 + $0x3c0] sm:$0xf0]  ;;  %v1957_v5 = vld [vmem:[#allocation2 + $0x388] sm:$0xf] }
  0x11   : > { %v1950_v3 = vor.u32 %v2135_v1, %v1949_v0  ;;  %v2136_v6 = vld [vmem:[#allocation2 + $0x3c4] sm:$0xf0]  ;;  %v1954_v7 = vor.u32 %v2127_v2, %v1951_v4  ;;  %v2128_v9 = vld [vmem:[#allocation2 + $0x38c] sm:$0xf]  ;;  %v1885_v11 = vld [vmem:[#allocation2 + $0x300] sm:$0xf] }
  0x12   : > { %v1958_v8 = vor.u32 %v2136_v6, %v1957_v5  ;;  %v1959_v10 = vld [vmem:[#allocation2 + $0x3c8] sm:$0xf0]  ;;  %v2119_v13 = vld [vmem:[#allocation2 + $0x33c] sm:$0xf0]  ;;  %v2111_v14 = vld [vmem:[#allocation2 + $0x304] sm:$0xf] }
  0x13   : > { %969 = vmatpush.bf16.msra.mxu0 %v1950_v3  ;;  %v1962_v12 = vor.u32 %v2128_v9, %v1959_v10  ;;  %v1887_v15 = vld [vmem:[#allocation2 + $0x340] sm:$0xf0]  ;;  %983 = vmatpush.bf16.msra.mxu1 %v1954_v7  ;;  %v1886_v16 = vor.u32 %v2119_v13, %v1885_v11  ;;  %v1893_v18 = vld [vmem:[#allocation2 + $0x308] sm:$0xf]  ;;  %v2112_v20 = vld [vmem:[#allocation2 + $0x30c] sm:$0xf] }
  0x14   : > { %997 = vmatpush.bf16.msra.mxu2 %v1958_v8  ;;  %v1890_v17 = vor.u32 %v2111_v14, %v1887_v15  ;;  %v2120_v19 = vld [vmem:[#allocation2 + $0x344] sm:$0xf0]  ;;  %v1895_v22 = vld [vmem:[#allocation2 + $0x348] sm:$0xf0]  ;;  %v1821_v23 = vld [vmem:[#allocation2 + $0x280] sm:$0xf] }
  0x15   : > { %1011 = vmatpush.bf16.msra.mxu3 %v1962_v12  ;;  %v1894_v21 = vor.u32 %v2120_v19, %v1893_v18  ;;  %v2103_v24 = vld [vmem:[#allocation2 + $0x2bc] sm:$0xf0]  ;;  %v1898_v25 = vor.u32 %v2112_v20, %v1895_v22  ;;  %v2095_v26 = vld [vmem:[#allocation2 + $0x284] sm:$0xf]  ;;  %v1829_v28 = vld [vmem:[#allocation2 + $0x288] sm:$0xf] }
  0x16   : > { %v1823_v27 = vld [vmem:[#allocation2 + $0x2c0] sm:$0xf0]  ;;  %v1822_v29 = vor.u32 %v2103_v24, %v1821_v23  ;;  %v2104_v30 = vld [vmem:[#allocation2 + $0x2c4] sm:$0xf0]  ;;  %v2096_v31 = vld [vmem:[#allocation2 + $0x28c] sm:$0xf] }
  0x17   : > { %970 = vmatpush.bf16.msra.mxu0 %v1886_v16  ;;  %v1831_v32 = vld [vmem:[#allocation2 + $0x2c8] sm:$0xf0]  ;;  %984 = vmatpush.bf16.msra.mxu1 %v1890_v17  ;;  %v1826_v33 = vor.u32 %v2095_v26, %v1823_v27  ;;  %v1830_v34 = vor.u32 %v2104_v30, %v1829_v28  ;;  %v1757_v35 = vld [vmem:[#allocation2 + $0x200] sm:$0xf]  ;;  %v2079_v37 = vld [vmem:[#allocation2 + $0x204] sm:$0xf] }
  0x18   : > { %998 = vmatpush.bf16.msra.mxu2 %v1894_v21  ;;  %v2087_v36 = vld [vmem:[#allocation2 + $0x23c] sm:$0xf0]  ;;  %v1834_v38 = vor.u32 %v2096_v31, %v1831_v32  ;;  %v1759_v39 = vld [vmem:[#allocation2 + $0x240] sm:$0xf0]  ;;  %v1765_v40 = vld [vmem:[#allocation2 + $0x208] sm:$0xf] }
  0x19   : > { %1012 = vmatpush.bf16.msra.mxu3 %v1898_v25  ;;  %v2088_v41 = vld [vmem:[#allocation2 + $0x244] sm:$0xf0]  ;;  %v2080_v42 = vld [vmem:[#allocation2 + $0x20c] sm:$0xf]  ;;  %v1758_v44 = vor.u32 %v2087_v36, %v1757_v35  ;;  %v1762_v45 = vor.u32 %v2079_v37, %v1759_v39  ;;  %v1693_v47 = vld [vmem:[#allocation2 + $0x180] sm:$0xf] }
  0x1a   : > { %v1767_v43 = vld [vmem:[#allocation2 + $0x248] sm:$0xf0]  ;;  %v1766_v46 = vor.u32 %v2088_v41, %v1765_v40  ;;  %v2071_v48 = vld [vmem:[#allocation2 + $0x1bc] sm:$0xf0]  ;;  %v2063_v49 = vld [vmem:[#allocation2 + $0x184] sm:$0xf] }
  0x1b   : > { %971 = vmatpush.bf16.msra.mxu0 %v1822_v29  ;;  %985 = vmatpush.bf16.msra.mxu1 %v1826_v33  ;;  %v1770_v50 = vor.u32 %v2080_v42, %v1767_v43  ;;  %v1695_v51 = vld [vmem:[#allocation2 + $0x1c0] sm:$0xf0]  ;;  %v1701_v52 = vld [vmem:[#allocation2 + $0x188] sm:$0xf]  ;;  %v2064_v54 = vld [vmem:[#allocation2 + $0x18c] sm:$0xf]  ;;  %v1694_v56 = vor.u32 %v2071_v48, %v1693_v47 }
  0x1c   : > { %999 = vmatpush.bf16.msra.mxu2 %v1830_v34  ;;  %v2072_v53 = vld [vmem:[#allocation2 + $0x1c4] sm:$0xf0]  ;;  %v1703_v55 = vld [vmem:[#allocation2 + $0x1c8] sm:$0xf0]  ;;  %p174_p7 = scmp.lt.s32.totalorder %s2229_s9, 1  ;;  %v1698_v57 = vor.u32 %v2063_v49, %v1695_v51  ;;  %vm1369_vm0 = vcmask 1040384  }
  0x1d   : > { %1013 = vmatpush.bf16.msra.mxu3 %v1834_v38  ;;  %v1702_v58 = vor.u32 %v2072_v53, %v1701_v52  ;;  %v1629_v59 = vld [vmem:[#allocation2 + $0x100] sm:$0xf]  ;;  %v2047_v61 = vld [vmem:[#allocation2 + $0x104] sm:$0xf]  ;;  %v1706_v62 = vor.u32 %v2064_v54, %v1703_v55  ;;  %v1637_v0 = vld [vmem:[#allocation2 + $0x108] sm:$0xf] }
  0x1e   : > { %v2055_v60 = vld [vmem:[#allocation2 + $0x13c] sm:$0xf0]  ;;  %v1631_v63 = vld [vmem:[#allocation2 + $0x140] sm:$0xf0]  ;;  %v2056_v1 = vld [vmem:[#allocation2 + $0x144] sm:$0xf0] }
  0x1f   : > { %972 = vmatpush.bf16.msra.mxu0 %v1758_v44  ;;  %986 = vmatpush.bf16.msra.mxu1 %v1762_v45  ;;  %v2048_v2 = vld [vmem:[#allocation2 + $0x10c] sm:$0xf]  ;;  %v1630_v4 = vor.u32 %v2055_v60, %v1629_v59  ;;  %s2350_s9 = smov (!%p174_p7, %s2229_s9), 1  ;;  %v1634_v5 = vor.u32 %v2047_v61, %v1631_v63  ;;  %v1638_v6 = vor.u32 %v2056_v1, %v1637_v0  ;;  %v1565_v7 = vld [vmem:[#allocation2 + $0x80] sm:$0xf]  ;;  %vm1371_vm1 = vcmask 1042434  }
  0x20   : > { %1000 = vmatpush.bf16.msra.mxu2 %v1766_v46  ;;  %v1639_v3 = vld [vmem:[#allocation2 + $0x148] sm:$0xf0]  ;;  %v2039_v8 = vld [vmem:[#allocation2 + $0xbc] sm:$0xf0]  ;;  %v2031_v9 = vld [vmem:[#allocation2 + $0x84] sm:$0xf] }
  0x21   : > { %1014 = vmatpush.bf16.msra.mxu3 %v1770_v50  ;;  %v1642_v10 = vor.u32 %v2048_v2, %v1639_v3  ;;  %v1567_v11 = vld [vmem:[#allocation2 + $0xc0] sm:$0xf0]  ;;  %v1573_v12 = vld [vmem:[#allocation2 + $0x88] sm:$0xf]  ;;  %v2032_v14 = vld [vmem:[#allocation2 + $0x8c] sm:$0xf]  ;;  %v1566_v16 = vor.u32 %v2039_v8, %v1565_v7 }
  0x22   : > { %v2040_v13 = vld [vmem:[#allocation2 + $0xc4] sm:$0xf0]  ;;  %v1575_v15 = vld [vmem:[#allocation2 + $0xc8] sm:$0xf0]  ;;  %v1501_v17 = vld [vmem:[#allocation2] sm:$0xf]  ;;  %v1570_v19 = vor.u32 %v2031_v9, %v1567_v11 }
  0x23   : > { %973 = vmatpush.bf16.msra.mxu0 %v1694_v56  ;;  %987 = vmatpush.bf16.msra.mxu1 %v1698_v57  ;;  %v2023_v18 = vld [vmem:[#allocation2 + $0x3c] sm:$0xf0]  ;;  %s2013_s21 = sshll.u32 %s2350_s9, 3  ;;  %v1574_v20 = vor.u32 %v2040_v13, %v1573_v12  ;;  %v2015_v21 = vld [vmem:[#allocation2 + $0x4] sm:$0xf]  ;;  %v1578_v24 = vor.u32 %v2032_v14, %v1575_v15  ;;  %vm1375_vm2 = vcmask 1044484  }
  0x24   : > { %1001 = vmatpush.bf16.msra.mxu2 %v1702_v58  ;;  %v1503_v22 = vld [vmem:[#allocation2 + $0x40] sm:$0xf0]  ;;  %v1509_v23 = vld [vmem:[#allocation2 + $0x8] sm:$0xf]  ;;  %v2016_v26 = vld [vmem:[#allocation2 + $0xc] sm:$0xf]  ;;  %v1502_v31 = vor.u32 %v2023_v18, %v1501_v17  ;;  %s181_s24 = scalar_lea.vmem %s2342_s0, %s2013_s21 }
  0x25   : > { %1015 = vmatpush.bf16.msra.mxu3 %v1706_v62  ;;  %v2024_v25 = vld [vmem:[#allocation2 + $0x44] sm:$0xf0]  ;;  %v1511_v27 = vld [vmem:[#allocation2 + $0x48] sm:$0xf0]  ;;  %v1965_v28 = vld [vmem:[#allocation2 + $0x390] sm:$0xf]  ;;  %v1506_v35 = vor.u32 %v2015_v21, %v1503_v22 }
  0x26   : > { %v2137_v29 = vld [vmem:[#allocation2 + $0x3cc] sm:$0xf0]  ;;  %v2129_v30 = vld [vmem:[#allocation2 + $0x394] sm:$0xf]  ;;  %v1973_v33 = vld [vmem:[#allocation2 + $0x398] sm:$0xf]  ;;  %v1510_v36 = vor.u32 %v2024_v25, %v1509_v23  ;;  %v1514_v39 = vor.u32 %v2016_v26, %v1511_v27 }
  0x27   : > { %974 = vmatpush.bf16.msra.mxu0 %v1630_v4  ;;  %988 = vmatpush.bf16.msra.mxu1 %v1634_v5  ;;  %v1967_v32 = vld [vmem:[#allocation2 + $0x3d0] sm:$0xf0]  ;;  %v2138_v34 = vld [vmem:[#allocation2 + $0x3d4] sm:$0xf0]  ;;  %v2130_v37 = vld [vmem:[#allocation2 + $0x39c] sm:$0xf]  ;;  %v1966_v40 = vor.u32 %v2137_v29, %v1965_v28 }
  0x28   : > { %1002 = vmatpush.bf16.msra.mxu2 %v1638_v6  ;;  %v1975_v38 = vld [vmem:[#allocation2 + $0x3d8] sm:$0xf0]  ;;  %v1970_v41 = vor.u32 %v2129_v30, %v1967_v32  ;;  %v1974_v42 = vor.u32 %v2138_v34, %v1973_v33  ;;  %v1901_v43 = vld [vmem:[#allocation2 + $0x310] sm:$0xf]  ;;  %v2113_v45 = vld [vmem:[#allocation2 + $0x314] sm:$0xf] }
  0x29   : > { %1016 = vmatpush.bf16.msra.mxu3 %v1642_v10  ;;  %v2121_v44 = vld [vmem:[#allocation2 + $0x34c] sm:$0xf0]  ;;  %v1978_v46 = vor.u32 %v2130_v37, %v1975_v38  ;;  %v1903_v47 = vld [vmem:[#allocation2 + $0x350] sm:$0xf0]  ;;  %v1909_v48 = vld [vmem:[#allocation2 + $0x318] sm:$0xf] }
  0x2a   : > { %v2122_v49 = vld [vmem:[#allocation2 + $0x354] sm:$0xf0]  ;;  %v2114_v50 = vld [vmem:[#allocation2 + $0x31c] sm:$0xf]  ;;  %v2293_v52 = vld [vmem:[%s181_s24] sm:$0xff]  ;;  %v1902_v53 = vor.u32 %v2121_v44, %v1901_v43  ;;  %v1906_v54 = vor.u32 %v2113_v45, %v1903_v47  ;;  %vm1373_vm3 = vcmask 1041408  }
  0x2b   : > { %975 = vmatpush.bf16.msra.mxu0 %v1566_v16  ;;  %989 = vmatpush.bf16.msra.mxu1 %v1570_v19  ;;  %v1911_v51 = vld [vmem:[#allocation2 + $0x358] sm:$0xf0]  ;;  %v1910_v55 = vor.u32 %v2122_v49, %v1909_v48  ;;  %v1837_v56 = vld [vmem:[#allocation2 + $0x290] sm:$0xf]  ;;  %v2097_v58 = vld [vmem:[#allocation2 + $0x294] sm:$0xf] }
  0x2c   : > { %1003 = vmatpush.bf16.msra.mxu2 %v1574_v20  ;;  %v2105_v57 = vld [vmem:[#allocation2 + $0x2cc] sm:$0xf0]  ;;  %v1914_v59 = vor.u32 %v2114_v50, %v1911_v51  ;;  %v1839_v60 = vld [vmem:[#allocation2 + $0x2d0] sm:$0xf0]  ;;  %v1845_v61 = vld [vmem:[#allocation2 + $0x298] sm:$0xf] }
  0x2d   : > { %1017 = vmatpush.bf16.msra.mxu3 %v1578_v24  ;;  %v2106_v62 = vld [vmem:[#allocation2 + $0x2d4] sm:$0xf0]  ;;  %v2098_v63 = vld [vmem:[#allocation2 + $0x29c] sm:$0xf]  ;;  %v1838_v1 = vor.u32 %v2105_v57, %v1837_v56  ;;  %v1842_v2 = vor.u32 %v2097_v58, %v1839_v60  ;;  %v1773_v4 = vld [vmem:[#allocation2 + $0x210] sm:$0xf] }
  0x2e   : > { %v1847_v0 = vld [vmem:[#allocation2 + $0x2d8] sm:$0xf0]  ;;  %v1846_v3 = vor.u32 %v2106_v62, %v1845_v61  ;;  %v2089_v5 = vld [vmem:[#allocation2 + $0x24c] sm:$0xf0]  ;;  %v2081_v6 = vld [vmem:[#allocation2 + $0x214] sm:$0xf] }
  0x2f   : > { %976 = vmatpush.bf16.msra.mxu0 %v1502_v31  ;;  %990 = vmatpush.bf16.msra.mxu1 %v1506_v35  ;;  %v1850_v7 = vor.u32 %v2098_v63, %v1847_v0  ;;  %v1775_v8 = vld [vmem:[#allocation2 + $0x250] sm:$0xf0]  ;;  %v1781_v9 = vld [vmem:[#allocation2 + $0x218] sm:$0xf]  ;;  %v2082_v11 = vld [vmem:[#allocation2 + $0x21c] sm:$0xf]  ;;  %v1774_v13 = vor.u32 %v2089_v5, %v1773_v4 }
  0x30   : > { %1004 = vmatpush.bf16.msra.mxu2 %v1510_v36  ;;  %v2090_v10 = vld [vmem:[#allocation2 + $0x254] sm:$0xf0]  ;;  %v1783_v12 = vld [vmem:[#allocation2 + $0x258] sm:$0xf0]  ;;  %v1778_v14 = vor.u32 %v2081_v6, %v1775_v8  ;;  %v1709_v16 = vld [vmem:[#allocation2 + $0x190] sm:$0xf] }
  0x31   : > { %1018 = vmatpush.bf16.msra.mxu3 %v1514_v39  ;;  %v1782_v15 = vor.u32 %v2090_v10, %v1781_v9  ;;  %v2073_v17 = vld [vmem:[#allocation2 + $0x1cc] sm:$0xf0]  ;;  %v2065_v18 = vld [vmem:[#allocation2 + $0x194] sm:$0xf]  ;;  %v1786_v19 = vor.u32 %v2082_v11, %v1783_v12  ;;  %v1717_v21 = vld [vmem:[#allocation2 + $0x198] sm:$0xf] }
  0x32   : > { %991 = vmatmul.bf16.vlgmr.msra.gmra.mxu1 %v2293_v52  ;;  %977 = vmatmul.bf16.vlgmr.msra.gmra.mxu0 %v2293_v52  ;;  %v1711_v20 = vld [vmem:[#allocation2 + $0x1d0] sm:$0xf0]  ;;  %v2074_v22 = vld [vmem:[#allocation2 + $0x1d4] sm:$0xf0]  ;;  %v2066_v23 = vld [vmem:[#allocation2 + $0x19c] sm:$0xf]  ;;  %v1710_v25 = vor.u32 %v2073_v17, %v1709_v16 }
  0x33   : > { %1025 = vmatpush.bf16.msrb.mxu0 %v1966_v40  ;;  %1039 = vmatpush.bf16.msrb.mxu1 %v1970_v41  ;;  %v1719_v24 = vld [vmem:[#allocation2 + $0x1d8] sm:$0xf0]  ;;  %v1714_v26 = vor.u32 %v2065_v18, %v1711_v20  ;;  %v1718_v27 = vor.u32 %v2074_v22, %v1717_v21  ;;  %v1645_v28 = vld [vmem:[#allocation2 + $0x110] sm:$0xf]  ;;  %v2049_v30 = vld [vmem:[#allocation2 + $0x114] sm:$0xf] }
  0x34   : > { %1053 = vmatpush.bf16.msrb.mxu2 %v1974_v42  ;;  %1019 = vmatmul.bf16.vlgmr.msra.gmra.mxu3 %v2293_v52  ;;  %v2057_v29 = vld [vmem:[#allocation2 + $0x14c] sm:$0xf0]  ;;  %v1722_v31 = vor.u32 %v2066_v23, %v1719_v24  ;;  %v1647_v32 = vld [vmem:[#allocation2 + $0x150] sm:$0xf0]  ;;  %v1653_v33 = vld [vmem:[#allocation2 + $0x118] sm:$0xf] }
  0x35   : > { %1067 = vmatpush.bf16.msrb.mxu3 %v1978_v46  ;;  %1005 = vmatmul.bf16.vlgmr.msra.gmra.mxu2 %v2293_v52  ;;  %v2058_v34 = vld [vmem:[#allocation2 + $0x154] sm:$0xf0]  ;;  %v2050_v35 = vld [vmem:[#allocation2 + $0x11c] sm:$0xf]  ;;  %v1646_v37 = vor.u32 %v2057_v29, %v1645_v28  ;;  %v1650_v38 = vor.u32 %v2049_v30, %v1647_v32  ;;  %v1581_v40 = vld [vmem:[#allocation2 + $0x90] sm:$0xf] }
  0x36   : > { %v1655_v36 = vld [vmem:[#allocation2 + $0x158] sm:$0xf0]  ;;  %v1654_v39 = vor.u32 %v2058_v34, %v1653_v33  ;;  %v2041_v41 = vld [vmem:[#allocation2 + $0xcc] sm:$0xf0]  ;;  %v2033_v42 = vld [vmem:[#allocation2 + $0x94] sm:$0xf] }
  0x37   : > { %1026 = vmatpush.bf16.msrb.mxu0 %v1902_v53  ;;  %1040 = vmatpush.bf16.msrb.mxu1 %v1906_v54  ;;  %v1658_v43 = vor.u32 %v2050_v35, %v1655_v36  ;;  %v1583_v44 = vld [vmem:[#allocation2 + $0xd0] sm:$0xf0]  ;;  %v1589_v45 = vld [vmem:[#allocation2 + $0x98] sm:$0xf]  ;;  %v2034_v47 = vld [vmem:[#allocation2 + $0x9c] sm:$0xf]  ;;  %v1582_v49 = vor.u32 %v2041_v41, %v1581_v40 }
  0x38   : > { %1054 = vmatpush.bf16.msrb.mxu2 %v1910_v55  ;;  %v2042_v46 = vld [vmem:[#allocation2 + $0xd4] sm:$0xf0]  ;;  %v1591_v48 = vld [vmem:[#allocation2 + $0xd8] sm:$0xf0]  ;;  %v1517_v50 = vld [vmem:[#allocation2 + $0x10] sm:$0xf]  ;;  %v1586_v53 = vor.u32 %v2033_v42, %v1583_v44 }
  0x39   : > { %1068 = vmatpush.bf16.msrb.mxu3 %v1914_v59  ;;  %v2025_v51 = vld [vmem:[#allocation2 + $0x4c] sm:$0xf0]  ;;  %v1590_v54 = vor.u32 %v2042_v46, %v1589_v45  ;;  %v2017_v55 = vld [vmem:[#allocation2 + $0x14] sm:$0xf]  ;;  %v1525_v57 = vld [vmem:[#allocation2 + $0x18] sm:$0xf]  ;;  %v1594_v58 = vor.u32 %v2034_v47, %v1591_v48 }
  0x3a   : > { %v1519_v56 = vld [vmem:[#allocation2 + $0x50] sm:$0xf0]  ;;  %v2026_v59 = vld [vmem:[#allocation2 + $0x54] sm:$0xf0]  ;;  %v2018_v60 = vld [vmem:[#allocation2 + $0x1c] sm:$0xf] }
  0x3b   : > { %1027 = vmatpush.bf16.msrb.mxu0 %v1838_v1  ;;  %1041 = vmatpush.bf16.msrb.mxu1 %v1842_v2  ;;  %v1527_v61 = vld [vmem:[#allocation2 + $0x58] sm:$0xf0]  ;;  %v1981_v62 = vld [vmem:[#allocation2 + $0x3a0] sm:$0xf]  ;;  %v2131_v0 = vld [vmem:[#allocation2 + $0x3a4] sm:$0xf]  ;;  %v1518_v1 = vor.u32 %v2025_v51, %v1517_v50  ;;  %v1522_v5 = vor.u32 %v2017_v55, %v1519_v56  ;;  %v1526_v6 = vor.u32 %v2026_v59, %v1525_v57 }
  0x3c   : > { %1055 = vmatpush.bf16.msrb.mxu2 %v1846_v3  ;;  %v2139_v63 = vld [vmem:[#allocation2 + $0x3dc] sm:$0xf0]  ;;  %v1983_v2 = vld [vmem:[#allocation2 + $0x3e0] sm:$0xf0]  ;;  %v1989_v3 = vld [vmem:[#allocation2 + $0x3a8] sm:$0xf]  ;;  %v1530_v9 = vor.u32 %v2018_v60, %v1527_v61 }
  0x3d   : > { %1069 = vmatpush.bf16.msrb.mxu3 %v1850_v7  ;;  %v2140_v4 = vld [vmem:[#allocation2 + $0x3e4] sm:$0xf0]  ;;  %v2132_v7 = vld [vmem:[#allocation2 + $0x3ac] sm:$0xf]  ;;  %v1982_v10 = vor.u32 %v2139_v63, %v1981_v62  ;;  %v1986_v11 = vor.u32 %v2131_v0, %v1983_v2  ;;  %v1919_v17 = vld [vmem:[#allocation2 + $0x360] sm:$0xf0] }
  0x3e   : > { %v1991_v8 = vld [vmem:[#allocation2 + $0x3e8] sm:$0xf0]  ;;  %v1990_v12 = vor.u32 %v2140_v4, %v1989_v3  ;;  %v1925_v18 = vld [vmem:[#allocation2 + $0x328] sm:$0xf]  ;;  %v1855_v29 = vld [vmem:[#allocation2 + $0x2e0] sm:$0xf0] }
  0x3f   : > { %1028 = vmatpush.bf16.msrb.mxu0 %v1774_v13  ;;  %1042 = vmatpush.bf16.msrb.mxu1 %v1778_v14  ;;  %v1917_v13 = vld [vmem:[#allocation2 + $0x320] sm:$0xf]  ;;  %v1994_v16 = vor.u32 %v2132_v7, %v1991_v8  ;;  %v2116_v20 = vld [vmem:[#allocation2 + $0x32c] sm:$0xf]  ;;  %v1861_v30 = vld [vmem:[#allocation2 + $0x2a8] sm:$0xf] }
  0x40   : > { %1056 = vmatpush.bf16.msrb.mxu2 %v1782_v15  ;;  %v2123_v14 = vld [vmem:[#allocation2 + $0x35c] sm:$0xf0]  ;;  %v2115_v15 = vld [vmem:[#allocation2 + $0x324] sm:$0xf]  ;;  %v1927_v21 = vld [vmem:[#allocation2 + $0x368] sm:$0xf0] }
  0x41   : > { %1070 = vmatpush.bf16.msrb.mxu3 %v1786_v19  ;;  %v2124_v19 = vld [vmem:[#allocation2 + $0x364] sm:$0xf0]  ;;  %v1918_v22 = vor.u32 %v2123_v14, %v1917_v13  ;;  %v1922_v23 = vor.u32 %v2115_v15, %v1919_v17  ;;  %v1930_v28 = vor.u32 %v2116_v20, %v1927_v21  ;;  %v2100_v32 = vld [vmem:[#allocation2 + $0x2ac] sm:$0xf]  ;;  %v1791_v41 = vld [vmem:[#allocation2 + $0x260] sm:$0xf0] }
  0x42   : > { %v1926_v24 = vor.u32 %v2124_v19, %v1925_v18  ;;  %v1863_v33 = vld [vmem:[#allocation2 + $0x2e8] sm:$0xf0]  ;;  %v1797_v42 = vld [vmem:[#allocation2 + $0x228] sm:$0xf]  ;;  %v2075_v50 = vld [vmem:[#allocation2 + $0x1dc] sm:$0xf0] }
  0x43   : > { %1029 = vmatpush.bf16.msrb.mxu0 %v1710_v25  ;;  %1043 = vmatpush.bf16.msrb.mxu1 %v1714_v26  ;;  %v1853_v25 = vld [vmem:[#allocation2 + $0x2a0] sm:$0xf]  ;;  %v1866_v40 = vor.u32 %v2100_v32, %v1863_v33  ;;  %v2084_v44 = vld [vmem:[#allocation2 + $0x22c] sm:$0xf]  ;;  %v2067_v51 = vld [vmem:[#allocation2 + $0x1a4] sm:$0xf] }
  0x44   : > { %1057 = vmatpush.bf16.msrb.mxu2 %v1718_v27  ;;  %v2107_v26 = vld [vmem:[#allocation2 + $0x2dc] sm:$0xf0]  ;;  %v2099_v27 = vld [vmem:[#allocation2 + $0x2a4] sm:$0xf]  ;;  %v1799_v45 = vld [vmem:[#allocation2 + $0x268] sm:$0xf0] }
  0x45   : > { %1071 = vmatpush.bf16.msrb.mxu3 %v1722_v31  ;;  %v2108_v31 = vld [vmem:[#allocation2 + $0x2e4] sm:$0xf0]  ;;  %v1854_v34 = vor.u32 %v2107_v26, %v1853_v25  ;;  %v1858_v35 = vor.u32 %v2099_v27, %v1855_v29  ;;  %v2068_v57 = vld [vmem:[#allocation2 + $0x1ac] sm:$0xf]  ;;  %v1661_v62 = vld [vmem:[#allocation2 + $0x120] sm:$0xf] }
  0x46   : > { %v1862_v36 = vor.u32 %v2108_v31, %v1861_v30  ;;  %v1733_v55 = vld [vmem:[#allocation2 + $0x1a8] sm:$0xf]  ;;  %v2059_v63 = vld [vmem:[#allocation2 + $0x15c] sm:$0xf0]  ;;  %v2051_v0 = vld [vmem:[#allocation2 + $0x124] sm:$0xf] }
  0x47   : > { %1030 = vmatpush.bf16.msrb.mxu0 %v1646_v37  ;;  %1044 = vmatpush.bf16.msrb.mxu1 %v1650_v38  ;;  %v1789_v37 = vld [vmem:[#allocation2 + $0x220] sm:$0xf]  ;;  %v2076_v56 = vld [vmem:[#allocation2 + $0x1e4] sm:$0xf0]  ;;  %v1663_v2 = vld [vmem:[#allocation2 + $0x160] sm:$0xf0]  ;;  %v1662_v7 = vor.u32 %v2059_v63, %v1661_v62 }
  0x48   : > { %1058 = vmatpush.bf16.msrb.mxu2 %v1654_v39  ;;  %v2091_v38 = vld [vmem:[#allocation2 + $0x25c] sm:$0xf0]  ;;  %v2083_v39 = vld [vmem:[#allocation2 + $0x224] sm:$0xf]  ;;  %v1734_v61 = vor.u32 %v2076_v56, %v1733_v55  ;;  %v1669_v3 = vld [vmem:[#allocation2 + $0x128] sm:$0xf]  ;;  %v1666_v8 = vor.u32 %v2051_v0, %v1663_v2 }
  0x49   : > { %1072 = vmatpush.bf16.msrb.mxu3 %v1658_v43  ;;  %v2092_v43 = vld [vmem:[#allocation2 + $0x264] sm:$0xf0]  ;;  %v1790_v46 = vor.u32 %v2091_v38, %v1789_v37  ;;  %v1794_v47 = vor.u32 %v2083_v39, %v1791_v41  ;;  %v1599_v14 = vld [vmem:[#allocation2 + $0xe0] sm:$0xf0]  ;;  %v2036_v17 = vld [vmem:[#allocation2 + $0xac] sm:$0xf] }
  0x4a   : > { %v1798_v48 = vor.u32 %v2092_v43, %v1797_v42  ;;  %v2060_v4 = vld [vmem:[#allocation2 + $0x164] sm:$0xf0]  ;;  %v1607_v18 = vld [vmem:[#allocation2 + $0xe8] sm:$0xf0]  ;;  %v1533_v20 = vld [vmem:[#allocation2 + $0x20] sm:$0xf] }
  0x4b   : > { %1031 = vmatpush.bf16.msrb.mxu0 %v1582_v49  ;;  %1045 = vmatpush.bf16.msrb.mxu1 %v1586_v53  ;;  %v1725_v49 = vld [vmem:[#allocation2 + $0x1a0] sm:$0xf]  ;;  %v1802_v53 = vor.u32 %v2084_v44, %v1799_v45  ;;  %v1605_v15 = vld [vmem:[#allocation2 + $0xa8] sm:$0xf]  ;;  %v1535_v25 = vld [vmem:[#allocation2 + $0x60] sm:$0xf0]  ;;  %v1610_v27 = vor.u32 %v2036_v17, %v1607_v18 }
  0x4c   : > { %1059 = vmatpush.bf16.msrb.mxu2 %v1590_v54  ;;  %v1727_v54 = vld [vmem:[#allocation2 + $0x1e0] sm:$0xf0]  ;;  %v1726_v59 = vor.u32 %v2075_v50, %v1725_v49  ;;  %v2027_v21 = vld [vmem:[#allocation2 + $0x5c] sm:$0xf0]  ;;  %v1541_v26 = vld [vmem:[#allocation2 + $0x28] sm:$0xf] }
  0x4d   : > { %1073 = vmatpush.bf16.msrb.mxu3 %v1594_v58  ;;  %v1735_v58 = vld [vmem:[#allocation2 + $0x1e8] sm:$0xf0]  ;;  %v1730_v60 = vor.u32 %v2067_v51, %v1727_v54  ;;  %v1997_v31 = vld [vmem:[#allocation2 + $0x3b0] sm:$0xf]  ;;  %v2133_v33 = vld [vmem:[#allocation2 + $0x3b4] sm:$0xf] }
  0x4e   : > { %v2020_v29 = vld [vmem:[#allocation2 + $0x2c] sm:$0xf]  ;;  %v2141_v32 = vld [vmem:[#allocation2 + $0x3ec] sm:$0xf0]  ;;  %v2142_v37 = vld [vmem:[#allocation2 + $0x3f4] sm:$0xf0] }
  0x4f   : > { %1032 = vmatpush.bf16.msrb.mxu0 %v1518_v1  ;;  %1046 = vmatpush.bf16.msrb.mxu1 %v1522_v5  ;;  %v1738_v1 = vor.u32 %v2068_v57, %v1735_v58  ;;  %v2052_v5 = vld [vmem:[#allocation2 + $0x12c] sm:$0xf]  ;;  %v2007_v41 = vld [vmem:[#allocation2 + $0x3f8] sm:$0xf0]  ;;  %v1998_v43 = vor.u32 %v2141_v32, %v1997_v31  ;;  %v1935_v50 = vld [vmem:[#allocation2 + $0x370] sm:$0xf0] }
  0x50   : > { %1060 = vmatpush.bf16.msrb.mxu2 %v1526_v6  ;;  %v1671_v6 = vld [vmem:[#allocation2 + $0x168] sm:$0xf0]  ;;  %v1941_v51 = vld [vmem:[#allocation2 + $0x338] sm:$0xf]  ;;  %v2118_v54 = vld [vmem:[#allocation2 + $0x33c] sm:$0xf] }
  0x51   : > { %1074 = vmatpush.bf16.msrb.mxu3 %v1530_v9  ;;  %v1670_v9 = vor.u32 %v2060_v4, %v1669_v3  ;;  %v1674_v13 = vor.u32 %v2052_v5, %v1671_v6  ;;  %v1543_v30 = vld [vmem:[#allocation2 + $0x68] sm:$0xf0]  ;;  %v1943_v55 = vld [vmem:[#allocation2 + $0x378] sm:$0xf0]  ;;  %v1871_v63 = vld [vmem:[#allocation2 + $0x2f0] sm:$0xf0] }
  0x52   : > { %1033 = vmatmul.bf16.vlgmr.msrb.gmra.mxu0 %v2293_v52  ;;  %1047 = vmatmul.bf16.vlgmr.msrb.gmra.mxu1 %v2293_v52  ;;  %v1546_v42 = vor.u32 %v2020_v29, %v1543_v30  ;;  %v1946_v62 = vor.u32 %v2118_v54, %v1943_v55  ;;  %v1877_v0 = vld [vmem:[#allocation2 + $0x2b8] sm:$0xf]  ;;  %v2102_v2 = vld [vmem:[#allocation2 + $0x2bc] sm:$0xf]  ;;  %v1677_v31 = vld [vmem:[#allocation2 + $0x130] sm:$0xf] }
  0x53   : > { %1081 = vmatpush.bf16.msra.mxu0 %v1982_v10  ;;  %1095 = vmatpush.bf16.msra.mxu1 %v1986_v11  ;;  %v1597_v10 = vld [vmem:[#allocation2 + $0xa0] sm:$0xf]  ;;  %v1879_v3 = vld [vmem:[#allocation2 + $0x2f8] sm:$0xf0]  ;;  %v2061_v32 = vld [vmem:[#allocation2 + $0x16c] sm:$0xf0] }
  0x54   : > { %1109 = vmatpush.bf16.msra.mxu2 %v1990_v12  ;;  %1075 = vmatmul.bf16.vlgmr.msrb.gmra.mxu3 %v2293_v52  ;;  %v2043_v11 = vld [vmem:[#allocation2 + $0xdc] sm:$0xf0]  ;;  %v2035_v12 = vld [vmem:[#allocation2 + $0xa4] sm:$0xf]  ;;  %vm1377_vm4 = vcmask 1046534   ;;  %vm1379_vm5 = vcmask 1045508  }
  0x55   : > { %1123 = vmatpush.bf16.msra.mxu3 %v1994_v16  ;;  %1061 = vmatmul.bf16.vlgmr.msrb.gmra.mxu2 %v2293_v52  ;;  %v2044_v16 = vld [vmem:[#allocation2 + $0xe4] sm:$0xf0]  ;;  %v1598_v19 = vor.u32 %v2043_v11, %v1597_v10  ;;  %v1882_v10 = vor.u32 %v2102_v2, %v1879_v3  ;;  %v1807_v11 = vld [vmem:[#allocation2 + $0x270] sm:$0xf0]  ;;  %vm1381_vm6 = vcmask 1043456   ;;  %s1494_s25 = sshll.u32 %s2350_s9, 4 }
  0x56   : > { %s2322_s28 = scalar_lea.vmem %s2344_s2, %s1494_s25 }
  0x57   : > { %1082 = vmatpush.bf16.msra.mxu0 %v1918_v22  ;;  %1096 = vmatpush.bf16.msra.mxu1 %v1922_v23  ;;  %v1602_v22 = vor.u32 %v2035_v12, %v1599_v14  ;;  %v1606_v23 = vor.u32 %v2044_v16, %v1605_v15  ;;  %v1813_v12 = vld [vmem:[#allocation2 + $0x238] sm:$0xf]  ;;  %v2086_v14 = vld [vmem:[#allocation2 + $0x23c] sm:$0xf] }
  0x58   : > { %1110 = vmatpush.bf16.msra.mxu2 %v1926_v24  ;;  %v2019_v24 = vld [vmem:[#allocation2 + $0x24] sm:$0xf]  ;;  %v1815_v15 = vld [vmem:[#allocation2 + $0x278] sm:$0xf0] }
  0x59   : > { %1124 = vmatpush.bf16.msra.mxu3 %v1930_v28  ;;  %v2028_v28 = vld [vmem:[#allocation2 + $0x64] sm:$0xf0]  ;;  %v1538_v38 = vor.u32 %v2019_v24, %v1535_v25  ;;  %v1749_v24 = vld [vmem:[#allocation2 + $0x1b8] sm:$0xf] }
  0x5a   : > { %v1542_v39 = vor.u32 %v2028_v28, %v1541_v26  ;;  %v2078_v25 = vld [vmem:[#allocation2 + $0x1f4] sm:$0xf0]  ;;  %v2070_v26 = vld [vmem:[#allocation2 + $0x1bc] sm:$0xf] }
  0x5b   : > { %1083 = vmatpush.bf16.msra.mxu0 %v1854_v34  ;;  %1097 = vmatpush.bf16.msra.mxu1 %v1858_v35  ;;  %v1534_v34 = vor.u32 %v2027_v21, %v1533_v20  ;;  %v1999_v35 = vld [vmem:[#allocation2 + $0x3f0] sm:$0xf0]  ;;  %v2077_v20 = vld [vmem:[#allocation2 + $0x1ec] sm:$0xf0]  ;;  %v1750_v30 = vor.u32 %v2078_v25, %v1749_v24 }
  0x5c   : > { %1111 = vmatpush.bf16.msra.mxu2 %v1862_v36  ;;  %v2005_v36 = vld [vmem:[#allocation2 + $0x3b8] sm:$0xf]  ;;  %v2002_v44 = vor.u32 %v2133_v33, %v1999_v35  ;;  %v2069_v21 = vld [vmem:[#allocation2 + $0x1b4] sm:$0xf] }
  0x5d   : > { %1125 = vmatpush.bf16.msra.mxu3 %v1866_v40  ;;  %v2134_v40 = vld [vmem:[#allocation2 + $0x3bc] sm:$0xf]  ;;  %v2006_v45 = vor.u32 %v2142_v37, %v2005_v36  ;;  %v2053_v33 = vld [vmem:[#allocation2 + $0x134] sm:$0xf]  ;;  %v1685_v36 = vld [vmem:[#allocation2 + $0x138] sm:$0xf] }
  0x5e   : > { %v2010_v49 = vor.u32 %v2134_v40, %v2007_v41  ;;  %v1679_v35 = vld [vmem:[#allocation2 + $0x170] sm:$0xf0]  ;;  %v2062_v37 = vld [vmem:[#allocation2 + $0x174] sm:$0xf0]  ;;  %v1678_v40 = vor.u32 %v2061_v32, %v1677_v31 }
  0x5f   : > { %1084 = vmatpush.bf16.msra.mxu0 %v1790_v46  ;;  %1098 = vmatpush.bf16.msra.mxu1 %v1794_v47  ;;  %v1933_v46 = vld [vmem:[#allocation2 + $0x330] sm:$0xf]  ;;  %v1682_v41 = vor.u32 %v2053_v33, %v1679_v35 }
  0x60   : > { %1112 = vmatpush.bf16.msra.mxu2 %v1798_v48  ;;  %v2125_v47 = vld [vmem:[#allocation2 + $0x36c] sm:$0xf0]  ;;  %v2117_v48 = vld [vmem:[#allocation2 + $0x334] sm:$0xf] }
  0x61   : > { %1126 = vmatpush.bf16.msra.mxu3 %v1802_v53  ;;  %v2126_v53 = vld [vmem:[#allocation2 + $0x374] sm:$0xf0]  ;;  %v1934_v56 = vor.u32 %v2125_v47, %v1933_v46  ;;  %v1938_v57 = vor.u32 %v2117_v48, %v1935_v50  ;;  %v1615_v47 = vld [vmem:[#allocation2 + $0xf0] sm:$0xf0]  ;;  %v2038_v50 = vld [vmem:[#allocation2 + $0xbc] sm:$0xf] }
  0x62   : > { %v1942_v58 = vor.u32 %v2126_v53, %v1941_v51  ;;  %v1621_v48 = vld [vmem:[#allocation2 + $0xb8] sm:$0xf]  ;;  %v1623_v51 = vld [vmem:[#allocation2 + $0xf8] sm:$0xf0] }
  0x63   : > { %1085 = vmatpush.bf16.msra.mxu0 %v1726_v59  ;;  %1099 = vmatpush.bf16.msra.mxu1 %v1730_v60  ;;  %v1869_v59 = vld [vmem:[#allocation2 + $0x2b0] sm:$0xf] }
  0x64   : > { %1113 = vmatpush.bf16.msra.mxu2 %v1734_v61  ;;  %v2109_v60 = vld [vmem:[#allocation2 + $0x2ec] sm:$0xf0]  ;;  %v2101_v61 = vld [vmem:[#allocation2 + $0x2b4] sm:$0xf] }
  0x65   : > { %1127 = vmatpush.bf16.msra.mxu3 %v1738_v1  ;;  %v2110_v1 = vld [vmem:[#allocation2 + $0x2f4] sm:$0xf0]  ;;  %v1870_v4 = vor.u32 %v2109_v60, %v1869_v59  ;;  %v1874_v5 = vor.u32 %v2101_v61, %v1871_v63  ;;  %v1626_v59 = vor.u32 %v2038_v50, %v1623_v51  ;;  %v1551_v60 = vld [vmem:[#allocation2 + $0x70] sm:$0xf0]  ;;  %v2022_v63 = vld [vmem:[#allocation2 + $0x3c] sm:$0xf] }
  0x66   : > { %v1878_v6 = vor.u32 %v2110_v1, %v1877_v0  ;;  %v1557_v61 = vld [vmem:[#allocation2 + $0x38] sm:$0xf]  ;;  %v1559_v0 = vld [vmem:[#allocation2 + $0x78] sm:$0xf0] }
  0x67   : > { %1086 = vmatpush.bf16.msra.mxu0 %v1662_v7  ;;  %1100 = vmatpush.bf16.msra.mxu1 %v1666_v8  ;;  %v1805_v7 = vld [vmem:[#allocation2 + $0x230] sm:$0xf] }
  0x68   : > { %1114 = vmatpush.bf16.msra.mxu2 %v1670_v9  ;;  %v2093_v8 = vld [vmem:[#allocation2 + $0x26c] sm:$0xf0]  ;;  %v2085_v9 = vld [vmem:[#allocation2 + $0x234] sm:$0xf] }
  0x69   : > { %1128 = vmatpush.bf16.msra.mxu3 %v1674_v13  ;;  %v2094_v13 = vld [vmem:[#allocation2 + $0x274] sm:$0xf0]  ;;  %v1806_v16 = vor.u32 %v2093_v8, %v1805_v7  ;;  %v1810_v17 = vor.u32 %v2085_v9, %v1807_v11 }
  0x6a   : > { %v1814_v18 = vor.u32 %v2094_v13, %v1813_v12 }
  0x6b   : > { %1087 = vmatpush.bf16.msra.mxu0 %v1598_v19  ;;  %1101 = vmatpush.bf16.msra.mxu1 %v1602_v22  ;;  %v1741_v19 = vld [vmem:[#allocation2 + $0x1b0] sm:$0xf]  ;;  %v1818_v22 = vor.u32 %v2086_v14, %v1815_v15 }
  0x6c   : > { %1115 = vmatpush.bf16.msra.mxu2 %v1606_v23  ;;  %v1743_v23 = vld [vmem:[#allocation2 + $0x1f0] sm:$0xf0]  ;;  %v1742_v28 = vor.u32 %v2077_v20, %v1741_v19 }
  0x6d   : > { %1129 = vmatpush.bf16.msra.mxu3 %v1610_v27  ;;  %v1751_v27 = vld [vmem:[#allocation2 + $0x1f8] sm:$0xf0]  ;;  %v1746_v29 = vor.u32 %v2069_v21, %v1743_v23 }
  0x6f   : > { %1088 = vmatpush.bf16.msra.mxu0 %v1534_v34  ;;  %1102 = vmatpush.bf16.msra.mxu1 %v1538_v38  ;;  %v1754_v34 = vor.u32 %v2070_v26, %v1751_v27  ;;  %v2054_v38 = vld [vmem:[#allocation2 + $0x13c] sm:$0xf] }
  0x70   : > { %1116 = vmatpush.bf16.msra.mxu2 %v1542_v39  ;;  %v1687_v39 = vld [vmem:[#allocation2 + $0x178] sm:$0xf0] }
  0x71   : > { %1130 = vmatpush.bf16.msra.mxu3 %v1546_v42  ;;  %v1686_v42 = vor.u32 %v2062_v37, %v1685_v36  ;;  %v1690_v46 = vor.u32 %v2054_v38, %v1687_v39 }
  0x72   : > { %1103 = vmatmul.bf16.vlgmr.msra.gmra.mxu1 %v2293_v52  ;;  %1089 = vmatmul.bf16.vlgmr.msra.gmra.mxu0 %v2293_v52 }
  0x73   : > { %1137 = vmatpush.bf16.msrb.mxu0 %v1998_v43  ;;  %1151 = vmatpush.bf16.msrb.mxu1 %v2002_v44  ;;  %v1613_v43 = vld [vmem:[#allocation2 + $0xb0] sm:$0xf] }
  0x74   : > { %1165 = vmatpush.bf16.msrb.mxu2 %v2006_v45  ;;  %1131 = vmatmul.bf16.vlgmr.msra.gmra.mxu3 %v2293_v52  ;;  %v2045_v44 = vld [vmem:[#allocation2 + $0xec] sm:$0xf0]  ;;  %v2037_v45 = vld [vmem:[#allocation2 + $0xb4] sm:$0xf] }
  0x75   : > { %1179 = vmatpush.bf16.msrb.mxu3 %v2010_v49  ;;  %1117 = vmatmul.bf16.vlgmr.msra.gmra.mxu2 %v2293_v52  ;;  %v2046_v49 = vld [vmem:[#allocation2 + $0xf4] sm:$0xf0]  ;;  %v1614_v53 = vor.u32 %v2045_v44, %v1613_v43  ;;  %v1618_v54 = vor.u32 %v2037_v45, %v1615_v47 }
  0x76   : > { %v1622_v55 = vor.u32 %v2046_v49, %v1621_v48 }
  0x77   : > { %1138 = vmatpush.bf16.msrb.mxu0 %v1934_v56  ;;  %1152 = vmatpush.bf16.msrb.mxu1 %v1938_v57  ;;  %v1549_v56 = vld [vmem:[#allocation2 + $0x30] sm:$0xf] }
  0x78   : > { %1166 = vmatpush.bf16.msrb.mxu2 %v1942_v58  ;;  %v2029_v57 = vld [vmem:[#allocation2 + $0x6c] sm:$0xf0]  ;;  %v2021_v58 = vld [vmem:[#allocation2 + $0x34] sm:$0xf] }
  0x79   : > { %1180 = vmatpush.bf16.msrb.mxu3 %v1946_v62  ;;  %v2030_v62 = vld [vmem:[#allocation2 + $0x74] sm:$0xf0]  ;;  %v1550_v1 = vor.u32 %v2029_v57, %v1549_v56  ;;  %v1554_v2 = vor.u32 %v2021_v58, %v1551_v60 }
  0x7a   : > { %v1558_v3 = vor.u32 %v2030_v62, %v1557_v61 }
  0x7b   : > { %1139 = vmatpush.bf16.msrb.mxu0 %v1870_v4  ;;  %1153 = vmatpush.bf16.msrb.mxu1 %v1874_v5  ;;  %v1562_v4 = vor.u32 %v2022_v63, %v1559_v0 }
  0x7c   : > { %1167 = vmatpush.bf16.msrb.mxu2 %v1878_v6 }
  0x7d   : > { %1181 = vmatpush.bf16.msrb.mxu3 %v1882_v10 }
  0x7f   : > { %1140 = vmatpush.bf16.msrb.mxu0 %v1806_v16  ;;  %1154 = vmatpush.bf16.msrb.mxu1 %v1810_v17 }
  0x80   : > { %1168 = vmatpush.bf16.msrb.mxu2 %v1814_v18 }
  0x81   : > { %1182 = vmatpush.bf16.msrb.mxu3 %v1818_v22 }
  0x83   : > { %1141 = vmatpush.bf16.msrb.mxu0 %v1742_v28  ;;  %1155 = vmatpush.bf16.msrb.mxu1 %v1746_v29 }
  0x84   : > { %1169 = vmatpush.bf16.msrb.mxu2 %v1750_v30 }
  0x85   : > { %1183 = vmatpush.bf16.msrb.mxu3 %v1754_v34 }
  0x87   : > { %1142 = vmatpush.bf16.msrb.mxu0 %v1678_v40  ;;  %1156 = vmatpush.bf16.msrb.mxu1 %v1682_v41 }
  0x88   : > { %1170 = vmatpush.bf16.msrb.mxu2 %v1686_v42 }
  0x89   : > { %1184 = vmatpush.bf16.msrb.mxu3 %v1690_v46 }
  0x8b   : > { %1143 = vmatpush.bf16.msrb.mxu0 %v1614_v53  ;;  %1157 = vmatpush.bf16.msrb.mxu1 %v1618_v54 }
  0x8c   : > { %1171 = vmatpush.bf16.msrb.mxu2 %v1622_v55 }
  0x8d   : > { %1185 = vmatpush.bf16.msrb.mxu3 %v1626_v59 }
  0x8f   : > { %1144 = vmatpush.bf16.msrb.mxu0 %v1550_v1  ;;  %1158 = vmatpush.bf16.msrb.mxu1 %v1554_v2 }
  0x90   : > { %1172 = vmatpush.bf16.msrb.mxu2 %v1558_v3 }
  0x91   : > { %1186 = vmatpush.bf16.msrb.mxu3 %v1562_v4 }
  0x92   : > { %1145 = vmatmul.bf16.vlgmr.msrb.gmra.mxu0 %v2293_v52  ;;  %1159 = vmatmul.bf16.vlgmr.msrb.gmra.mxu1 %v2293_v52 }
  0x93   : > { %1173 = vmatmul.bf16.vlgmr.msrb.gmra.mxu2 %v2293_v52 }
  0x94   : > { %1187 = vmatmul.bf16.vlgmr.msrb.gmra.mxu3 %v2293_v52 }
  0xaf   : > { %v992_v5 = vpop.f32.mrf.mxu1  ;;  %v978_v6 = vpop.f32.mrf.mxu0 }
  0xb0   : > { %v1194_v13 = vmax.f32 %v992_v5, 0.0  ;;  %v1193_v20 = vmax.f32 %v978_v6, 0.0 }
  0xb7   : > { %v1020_v8 = vpop.f32.mrf.mxu3  ;;  %v994_v9 = vpop.f32.mrf.mxu1 }
  0xb8   : > { %v1006_v7 = vpop.f32.mrf.mxu2  ;;  %v980_v10 = vpop.f32.mrf.mxu0  ;;  %v1210_v14 = vmax.f32 %v994_v9, 0.0  ;;  %v1196_v17 = vmax.f32 %v1020_v8, 0.0 }
  0xb9   : > { %v1195_v15 = vmax.f32 %v1006_v7, 0.0  ;;  %v1209_v22 = vmax.f32 %v980_v10, 0.0 }
  0xba   : > { %v1234_v19 = vadd.f32 %v1210_v14, %v1194_v13 }
  0xbb   : > { %v1227_v27 = vadd.f32 %v1209_v22, %v1193_v20 }
  0xbc   : > { %v1235_v24 = vrot.slane %v1234_v19, 4 }
  0xbd   : > { %v1228_v32 = vrot.slane %v1227_v27, 4 }
  0xbe   : > { %v1236_v29 = vadd.f32 %v1235_v24, %v1234_v19 }
  0xbf   : > { %v1022_v12 = vpop.f32.mrf.mxu3  ;;  %v1229_v42 = vadd.f32 %v1228_v32, %v1227_v27 }
  0xc0   : > { %v1008_v11 = vpop.f32.mrf.mxu2  ;;  %v1212_v18 = vmax.f32 %v1022_v12, 0.0  ;;  %v1237_v38 = vrot.slane %v1236_v29, 2 }
  0xc1   : > { %v1211_v16 = vmax.f32 %v1008_v11, 0.0  ;;  %v1230_v54 = vrot.slane %v1229_v42, 2 }
  0xc2   : > { %v1248_v23 = vadd.f32 %v1212_v18, %v1196_v17  ;;  %v1238_v48 = vadd.f32 %v1237_v38, %v1236_v29 }
  0xc3   : > { %v1241_v21 = vadd.f32 %v1211_v16, %v1195_v15  ;;  %v1231_v3 = vadd.f32 %v1230_v54, %v1229_v42 }
  0xc4   : > { %v1249_v28 = vrot.slane %v1248_v23, 4  ;;  %v1239_v63 = vrot.slane %v1238_v48, 1 }
  0xc5   : > { %v1242_v26 = vrot.slane %v1241_v21, 4  ;;  %v1232_v15 = vrot.slane %v1231_v3, 1 }
  0xc6   : > { %v1250_v34 = vadd.f32 %v1249_v28, %v1248_v23  ;;  %v1240_v11 = vadd.f32 %v1239_v63, %v1238_v48 }
  0xc7   : > { %v1243_v31 = vadd.f32 %v1242_v26, %v1241_v21 }
  0xc8   : > { %v1251_v44 = vrot.slane %v1250_v34, 2 }
  0xc9   : > { %v1244_v41 = vrot.slane %v1243_v31, 2 }
  0xca   : > { %v1252_v58 = vadd.f32 %v1251_v44, %v1250_v34 }
  0xcb   : > { %v1245_v53 = vadd.f32 %v1244_v41, %v1243_v31 }
  0xcc   : > { %v1253_v6 = vrot.slane %v1252_v58, 1 }
  0xcd   : > { %v1246_v2 = vrot.slane %v1245_v53, 1 }
  0xce   : > { %v1254_v18 = vadd.f32 %v1253_v6, %v1252_v58 }
  0xcf   : > { %v1034_v52 = vpop.f32.mrf.mxu0  ;;  %v1048_v25 = vpop.f32.mrf.mxu1  ;;  %v1247_v14 = vadd.f32 %v1246_v2, %v1245_v53 }
  0xd0   : > { %v1197_v35 = vmax.f32 %v1034_v52, 0.0  ;;  %v1198_v36 = vmax.f32 %v1048_v25, 0.0  ;;  %v1355_v52 = vrot.slane %v1240_v11, 7  ;;  %v1233_v25 = vadd.f32 %v1232_v15, %v1231_v3 }
  0xd1   : > { %v1356_v24 = vrot.slane %v1247_v14, 6  ;;  %v1357_v27 = vrot.slane %v1254_v18, 5 }
  0xd7   : > { %v1076_v33 = vpop.f32.mrf.mxu3  ;;  %v1036_v37 = vpop.f32.mrf.mxu0 }
  0xd8   : > { %v1062_v30 = vpop.f32.mrf.mxu2  ;;  %v1213_v39 = vmax.f32 %v1036_v37, 0.0  ;;  %v1050_v40 = vpop.f32.mrf.mxu1  ;;  %v1200_v49 = vmax.f32 %v1076_v33, 0.0  ;;  %v1370_v33 = vsel %vm1369_vm0, %v1233_v25, %v1355_v52 }
  0xd9   : > { %v1214_v43 = vmax.f32 %v1050_v40, 0.0  ;;  %v1199_v46 = vmax.f32 %v1062_v30, 0.0 }
  0xda   : > { %v1255_v45 = vadd.f32 %v1213_v39, %v1197_v35  ;;  %v1372_v35 = vsel %vm1371_vm1, %v1356_v24, %v1357_v27 }
  0xdb   : > { %v1262_v47 = vadd.f32 %v1214_v43, %v1198_v36  ;;  %v1374_v39 = vsel %vm1373_vm3, %v1370_v33, %v1372_v35 }
  0xdc   : > { %v1256_v50 = vrot.slane %v1255_v45, 4 }
  0xdd   : > { %v1263_v55 = vrot.slane %v1262_v47, 4 }
  0xde   : > { %v1257_v59 = vadd.f32 %v1256_v50, %v1255_v45 }
  0xdf   : > { %v1078_v57 = vpop.f32.mrf.mxu3  ;;  %v1264_v61 = vadd.f32 %v1263_v55, %v1262_v47 }
  0xe0   : > { %v1064_v51 = vpop.f32.mrf.mxu2  ;;  %v1216_v60 = vmax.f32 %v1078_v57, 0.0  ;;  %v1258_v0 = vrot.slane %v1257_v59, 2 }
  0xe1   : > { %v1215_v56 = vmax.f32 %v1064_v51, 0.0  ;;  %v1265_v4 = vrot.slane %v1264_v61, 2 }
  0xe2   : > { %v1276_v1 = vadd.f32 %v1216_v60, %v1200_v49  ;;  %v1259_v7 = vadd.f32 %v1258_v0, %v1257_v59 }
  0xe3   : > { %v1269_v62 = vadd.f32 %v1215_v56, %v1199_v46  ;;  %v1266_v9 = vadd.f32 %v1265_v4, %v1264_v61 }
  0xe4   : > { %v1277_v8 = vrot.slane %v1276_v1, 4  ;;  %v1260_v12 = vrot.slane %v1259_v7, 1 }
  0xe5   : > { %v1270_v5 = vrot.slane %v1269_v62, 4  ;;  %v1267_v16 = vrot.slane %v1266_v9, 1 }
  0xe6   : > { %v1278_v13 = vadd.f32 %v1277_v8, %v1276_v1  ;;  %v1261_v19 = vadd.f32 %v1260_v12, %v1259_v7 }
  0xe7   : > { %v1271_v10 = vadd.f32 %v1270_v5, %v1269_v62  ;;  %v1268_v21 = vadd.f32 %v1267_v16, %v1266_v9 }
  0xe8   : > { %v1279_v20 = vrot.slane %v1278_v13, 2  ;;  %v1358_v28 = vrot.slane %v1261_v19, 4 }
  0xe9   : > { %v1272_v17 = vrot.slane %v1271_v10, 2  ;;  %v1359_v29 = vrot.slane %v1268_v21, 3 }
  0xea   : > { %v1280_v23 = vadd.f32 %v1279_v20, %v1278_v13 }
  0xeb   : > { %v1273_v22 = vadd.f32 %v1272_v17, %v1271_v10  ;;  %v1376_v36 = vsel %vm1375_vm2, %v1358_v28, %v1359_v29 }
  0xec   : > { %v1281_v30 = vrot.slane %v1280_v23, 1 }
  0xed   : > { %v1274_v26 = vrot.slane %v1273_v22, 1 }
  0xee   : > { %v1282_v32 = vadd.f32 %v1281_v30, %v1280_v23 }
  0xef   : > { %v1275_v31 = vadd.f32 %v1274_v26, %v1273_v22  ;;  %v1090_v43 = vpop.f32.mrf.mxu0  ;;  %v1104_v44 = vpop.f32.mrf.mxu1 }
  0xf0   : > { %v1361_v37 = vrot.slane %v1282_v32, 1  ;;  %v1202_v56 = vmax.f32 %v1104_v44, 0.0  ;;  %v1201_v63 = vmax.f32 %v1090_v43, 0.0 }
  0xf1   : > { %v1360_v34 = vrot.slane %v1275_v31, 2 }
  0xf3   : > { %v1378_v38 = vsel %vm1377_vm4, %v1360_v34, %v1361_v37 }
  0xf4   : > { %v1380_v40 = vsel %vm1379_vm5, %v1376_v36, %v1378_v38 }
  0xf5   : > { %v1382_v41 = vsel %vm1381_vm6, %v1374_v39, %v1380_v40 }
  0xf6   : > { %v1401_v42 = vmul.f32 0.0625, %v1382_v41 }
  0xf7   : > { %v1132_v46 = vpop.f32.mrf.mxu3  ;;  %v1092_v47 = vpop.f32.mrf.mxu0 }
  0xf8   : > { %1403 = vst [vmem:[%s2322_s28] sm:$0xff] %v1401_v42  ;;  %v1118_v45 = vpop.f32.mrf.mxu2  ;;  %v1106_v48 = vpop.f32.mrf.mxu1  ;;  %v1204_v54 = vmax.f32 %v1132_v46, 0.0  ;;  %v1217_v0 = vmax.f32 %v1092_v47, 0.0 }
  0xf9   : > { %v1203_v51 = vmax.f32 %v1118_v45, 0.0  ;;  %v1218_v57 = vmax.f32 %v1106_v48, 0.0 }
  0xfa   : > { %v1283_v4 = vadd.f32 %v1217_v0, %v1201_v63 }
  0xfb   : > { %v1290_v62 = vadd.f32 %v1218_v57, %v1202_v56 }
  0xfc   : > { %v1284_v16 = vrot.slane %v1283_v4, 4 }
  0xfd   : > { %v1291_v3 = vrot.slane %v1290_v62, 4 }
  0xfe   : > { %v1285_v52 = vadd.f32 %v1284_v16, %v1283_v4 }
  0xff   : > { %v1134_v50 = vpop.f32.mrf.mxu3  ;;  %v1292_v13 = vadd.f32 %v1291_v3, %v1290_v62 }
 0x100   : > { %v1120_v49 = vpop.f32.mrf.mxu2  ;;  %v1220_v55 = vmax.f32 %v1134_v50, 0.0  ;;  %v1286_v38 = vrot.slane %v1285_v52, 2 }
 0x101   : > { %v1219_v53 = vmax.f32 %v1120_v49, 0.0  ;;  %v1293_v22 = vrot.slane %v1292_v13, 2 }
 0x102   : > { %v1304_v60 = vadd.f32 %v1220_v55, %v1204_v54  ;;  %v1287_v48 = vadd.f32 %v1286_v38, %v1285_v52 }
 0x103   : > { %v1297_v58 = vadd.f32 %v1219_v53, %v1203_v51  ;;  %v1294_v35 = vadd.f32 %v1293_v22, %v1292_v13 }
 0x104   : > { %v1305_v2 = vrot.slane %v1304_v60, 4 }
 0x105   : > { %v1298_v1 = vrot.slane %v1297_v58, 4  ;;  %v1295_v46 = vrot.slane %v1294_v35, 1 }
 0x106   : > { %v1306_v9 = vadd.f32 %v1305_v2, %v1304_v60 }
 0x107   : > { %v1299_v6 = vadd.f32 %v1298_v1, %v1297_v58  ;;  %v1296_v57 = vadd.f32 %v1295_v46, %v1294_v35 }
 0x108   : > { %v1307_v20 = vrot.slane %v1306_v9, 2 }
 0x109   : > { %v1300_v18 = vrot.slane %v1299_v6, 2  ;;  %v1362_v3 = vrot.slane %v1296_v57, 7 }
 0x10a   : > { %v1308_v31 = vadd.f32 %v1307_v20, %v1306_v9 }
 0x10b   : > { %v1301_v26 = vadd.f32 %v1300_v18, %v1299_v6 }
 0x10c   : > { %v1309_v44 = vrot.slane %v1308_v31, 1 }
 0x10d   : > { %v1302_v43 = vrot.slane %v1301_v26, 1 }
 0x10e   : > { %v1310_v55 = vadd.f32 %v1309_v44, %v1308_v31 }
 0x10f   : > { %v1146_v59 = vpop.f32.mrf.mxu0  ;;  %v1160_v61 = vpop.f32.mrf.mxu1  ;;  %v1303_v54 = vadd.f32 %v1302_v43, %v1301_v26 }
 0x110   : > { %v1205_v10 = vmax.f32 %v1146_v59, 0.0  ;;  %v1206_v14 = vmax.f32 %v1160_v61, 0.0  ;;  %v1288_v59 = vrot.slane %v1287_v48, 1  ;;  %v1364_v1 = vrot.slane %v1310_v55, 5 }
 0x111   : > { %v1363_v0 = vrot.slane %v1303_v54, 6 }
 0x116   : > { %v1174_v5 = vpop.f32.mrf.mxu2 }
 0x117   : > { %v1188_v7 = vpop.f32.mrf.mxu3  ;;  %v1148_v8 = vpop.f32.mrf.mxu0  ;;  %v1207_v27 = vmax.f32 %v1174_v5, 0.0  ;;  %v1289_v5 = vadd.f32 %v1288_v59, %v1287_v48 }
 0x118   : > { %v1221_v11 = vmax.f32 %v1148_v8, 0.0  ;;  %v1162_v12 = vpop.f32.mrf.mxu1  ;;  %v1208_v32 = vmax.f32 %v1188_v7, 0.0 }
 0x119   : > { %v1222_v15 = vmax.f32 %v1162_v12, 0.0  ;;  %v1383_v12 = vsel %vm1369_vm0, %v1289_v5, %v1362_v3 }
 0x11a   : > { %v1311_v17 = vadd.f32 %v1221_v11, %v1205_v10  ;;  %v1384_v10 = vsel %vm1371_vm1, %v1363_v0, %v1364_v1 }
 0x11b   : > { %v1318_v19 = vadd.f32 %v1222_v15, %v1206_v14  ;;  %v1385_v15 = vsel %vm1373_vm3, %v1383_v12, %v1384_v10 }
 0x11c   : > { %v1312_v21 = vrot.slane %v1311_v17, 4 }
 0x11d   : > { %v1319_v23 = vrot.slane %v1318_v19, 4 }
 0x11e   : > { %v1313_v24 = vadd.f32 %v1312_v21, %v1311_v17  ;;  %v1176_v25 = vpop.f32.mrf.mxu2 }
 0x11f   : > { %v1320_v28 = vadd.f32 %v1319_v23, %v1318_v19  ;;  %v1223_v29 = vmax.f32 %v1176_v25, 0.0  ;;  %v1190_v30 = vpop.f32.mrf.mxu3 }
 0x120   : > { %v1314_v33 = vrot.slane %v1313_v24, 2  ;;  %v1224_v34 = vmax.f32 %v1190_v30, 0.0 }
 0x121   : > { %v1321_v36 = vrot.slane %v1320_v28, 2  ;;  %v1325_v37 = vadd.f32 %v1223_v29, %v1207_v27 }
 0x122   : > { %v1315_v39 = vadd.f32 %v1314_v33, %v1313_v24  ;;  %v1332_v40 = vadd.f32 %v1224_v34, %v1208_v32 }
 0x123   : > { %v1322_v41 = vadd.f32 %v1321_v36, %v1320_v28  ;;  %v1326_v42 = vrot.slane %v1325_v37, 4 }
 0x124   : > { %v1333_v45 = vrot.slane %v1332_v40, 4  ;;  %v1316_v49 = vrot.slane %v1315_v39, 1 }
 0x125   : > { %v1327_v47 = vadd.f32 %v1326_v42, %v1325_v37  ;;  %v1323_v50 = vrot.slane %v1322_v41, 1 }
 0x126   : > { %v1334_v51 = vadd.f32 %v1333_v45, %v1332_v40  ;;  %v1317_v60 = vadd.f32 %v1316_v49, %v1315_v39 }
 0x127   : > { %v1328_v53 = vrot.slane %v1327_v47, 2  ;;  %v1324_v61 = vadd.f32 %v1323_v50, %v1322_v41 }
 0x128   : > { %v1335_v56 = vrot.slane %v1334_v51, 2  ;;  %v1365_v6 = vrot.slane %v1317_v60, 4 }
 0x129   : > { %v1329_v58 = vadd.f32 %v1328_v53, %v1327_v47  ;;  %v1366_v7 = vrot.slane %v1324_v61, 3 }
 0x12a   : > { %v1336_v62 = vadd.f32 %v1335_v56, %v1334_v51 }
 0x12b   : > { %v1330_v63 = vrot.slane %v1329_v58, 1  ;;  %v1386_v13 = vsel %vm1375_vm2, %v1365_v6, %v1366_v7 }
 0x12c   : > { %v1337_v2 = vrot.slane %v1336_v62, 1 }
 0x12d   : > { %v1331_v4 = vadd.f32 %v1330_v63, %v1329_v58 }
 0x12e   : > { %v1338_v8 = vadd.f32 %v1337_v2, %v1336_v62 }
 0x12f   : > { %v1367_v9 = vrot.slane %v1331_v4, 2 }
 0x130   : > { %v1368_v11 = vrot.slane %v1338_v8, 1 }
 0x132   : > { %v1387_v14 = vsel %vm1377_vm4, %v1367_v9, %v1368_v11 }
 0x133   : > { %v1388_v16 = vsel %vm1379_vm5, %v1386_v13, %v1387_v14 }
 0x134   : > { %v1389_v17 = vsel %vm1381_vm6, %v1385_v15, %v1388_v16 }
 0x135   : > { %v1402_v18 = vmul.f32 0.0625, %v1389_v17 }
 0x137   : > { %1404 = vst [vmem:[%s2322_s28 + $0x8] sm:$0xff] %v1402_v18 }
 0x138 PF: > { %s13_s11 = sadd.s32 1, %s2237_s11   ;;  %s2345_s9 = smov %s2233_s10 }
 0x139   : > { %p10_p8 = scmp.ge.s32.totalorder %s13_s11, 4   ;;  %s2346_s10 = smov %s2348_s13 }
 0x13b   :  { %12 = sbr.rel (!%p10_p8) target bundleno = 2 (0x2), region = 71 }
 0x140   :  { %1424 = vsyncpa [#allocation3], 1 }
 0x141   :  { %1426 = vsyncpa [#allocation3 + $0x1], 1 }

// kernel: cnn_forward.3
= control target key start
LH: loop header
LB: loop body
LE: loop exit
PB: predicated region body
PF: predicated region fallthrough
CT: control target
= control target key end

     0   :  { %10 = vsyncpa [#allocation3], 0  ;;  %s2351_s0 = inlined_call_operand.vmem [shape: f32[8,2048], index: 0, kind: input, shape index: {}]   ;;  %s2352_s1 = inlined_call_operand.hbm [shape: f32[2048,384], index: 1, kind: input, shape index: {}]   ;;  %s2353_s2 = inlined_call_operand.hbm [shape: f32[1,384], index: 2, kind: input, shape index: {}]   ;;  %s2354_s3 = inlined_call_operand.hbm [shape: f32[1,384], index: 3, kind: input, shape index: {}]   ;;  %s2355_s4 = inlined_call_operand.hbm [shape: f32[1,384], index: 4, kind: input, shape index: {}]   ;;  %s2356_s5 = inlined_call_operand.vmem [shape: f32[8,384], index: 5, kind: output, shape index: {}]  }
   0x1   :  { %11 = vsyncpa [#allocation5], 0  ;;  %s33_s20 = sshll.u32 %s2353_s2, 4  ;;  %s34_s20 = int_to_ptr.hbm [resolvable:$true] %s33_s20 }
   0x2   :  { %12 = vsyncpa [#allocation8], 0  ;;  %s2105_s21 = smov [#allocation4]   ;;  %s19_s25 = sshll.u32 %s2352_s1, 4  ;;  %s20_s25 = int_to_ptr.hbm [resolvable:$true] %s19_s25 }
   0x3   :  { %s35_s22 = sshll.u32 %s2105_s21, 4  ;;  %s2106_s26 = smov [#allocation2]   ;;  %s36_s22 = int_to_ptr.vmem [resolvable:$true] %s35_s22 }
   0x4   :  { %38 = dma.hbm_to_vmem [thread:$0]  %s34_s20, 48, %s36_s22, [#allocation5]  }
   0x5   :  { %s21_s27 = sshll.u32 %s2106_s26, 4  ;;  %s2107_s28 = smov 384   ;;  %s22_s27 = int_to_ptr.vmem [resolvable:$true] %s21_s27 }
   0x6   :  { %s2108_s29 = smov 24   ;;  %s44_s2 = sshll.u32 %s2354_s3, 4  ;;  %s45_s2 = int_to_ptr.hbm [resolvable:$true] %s44_s2 }
   0x7   :  { %27 = dma.hbm_to_vmem [thread:$0]  %s20_s25, 98304, %s22_s27, [#allocation3], %s2107_s28, %s2107_s28, %s2108_s29  }
   0x8   :  { %s2109_s7 = smov [#allocation6]   ;;  %s55_s1 = sshll.u32 %s2355_s4, 4  ;;  %s56_s1 = int_to_ptr.hbm [resolvable:$true] %s55_s1 }
   0x9   :  { %s46_s8 = sshll.u32 %s2109_s7, 4  ;;  %s2110_s11 = smov [#allocation7]   ;;  %s47_s8 = int_to_ptr.vmem [resolvable:$true] %s46_s8 }
   0xa   :  { %49 = dma.hbm_to_vmem [thread:$0]  %s45_s2, 48, %s47_s8, [#allocation5]  }
   0xb   :  { %s57_s12 = sshll.u32 %s2110_s11, 4  ;;  %s58_s12 = int_to_ptr.vmem [resolvable:$true] %s57_s12 }
   0xc   :  { %60 = dma.hbm_to_vmem [thread:$0]  %s56_s1, 48, %s58_s12, [#allocation8]  }
   0xd   :  { %2099 = dma.done.wait [#allocation3], 98304  }
   0xe   :  { %2100 = vsyncadd [#allocation3], 4294868992 }
   0xf   :  { %2101 = dma.done.wait [#allocation5], 96  }
  0x10   :  { %2102 = vsyncadd [#allocation5], 4294967200 }
  0x11   :  { %2103 = dma.done.wait [#allocation8], 48  }
  0x12   :  { %2104 = vsyncadd [#allocation8], 4294967248  ;;  %v138_v0 = vld [vmem:[#allocation2 + $0x168] sm:$0xff]  ;;  %v135_v2 = vld [vmem:[#allocation2 + $0x150] sm:$0xff] }
  0x13   :  { %v234_v1 = vld [vmem:[#allocation2 + $0x468] sm:$0xff]  ;;  %869 = vmatpush.msra.mxu0 %v138_v0  ;;  %v231_v4 = vld [vmem:[#allocation2 + $0x450] sm:$0xff]  ;;  %v132_v6 = vld [vmem:[#allocation2 + $0x138] sm:$0xff] }
  0x14   :  { %909 = vmatpush.msra.mxu2 %v234_v1  ;;  %v186_v3 = vld [vmem:[#allocation2 + $0x2e8] sm:$0xff]  ;;  %v183_v7 = vld [vmem:[#allocation2 + $0x2d0] sm:$0xff]  ;;  %v228_v8 = vld [vmem:[#allocation2 + $0x438] sm:$0xff] }
  0x15   :  { %v282_v5 = vld [vmem:[#allocation2 + $0x5e8] sm:$0xff]  ;;  %889 = vmatpush.msra.mxu1 %v186_v3  ;;  %870 = vmatpush.msra.mxu0 %v135_v2  ;;  %v279_v9 = vld [vmem:[#allocation2 + $0x5d0] sm:$0xff]  ;;  %v180_v10 = vld [vmem:[#allocation2 + $0x2b8] sm:$0xff] }
  0x16   :  { %929 = vmatpush.msra.mxu3 %v282_v5  ;;  %910 = vmatpush.msra.mxu2 %v231_v4  ;;  %v129_v11 = vld [vmem:[#allocation2 + $0x120] sm:$0xff]  ;;  %v276_v13 = vld [vmem:[#allocation2 + $0x5b8] sm:$0xff]  ;;  %v126_v16 = vld [vmem:[#allocation2 + $0x108] sm:$0xff] }
  0x17   :  { %890 = vmatpush.msra.mxu1 %v183_v7  ;;  %v225_v12 = vld [vmem:[#allocation2 + $0x420] sm:$0xff]  ;;  %871 = vmatpush.msra.mxu0 %v132_v6  ;;  %v222_v17 = vld [vmem:[#allocation2 + $0x408] sm:$0xff]  ;;  %v123_v20 = vld [vmem:[#allocation2 + $0xf0] sm:$0xff] }
  0x18   :  { %930 = vmatpush.msra.mxu3 %v279_v9  ;;  %911 = vmatpush.msra.mxu2 %v228_v8  ;;  %v177_v14 = vld [vmem:[#allocation2 + $0x2a0] sm:$0xff]  ;;  %v174_v18 = vld [vmem:[#allocation2 + $0x288] sm:$0xff]  ;;  %v219_v21 = vld [vmem:[#allocation2 + $0x3f0] sm:$0xff] }
  0x19   :  { %v273_v15 = vld [vmem:[#allocation2 + $0x5a0] sm:$0xff]  ;;  %891 = vmatpush.msra.mxu1 %v180_v10  ;;  %872 = vmatpush.msra.mxu0 %v129_v11  ;;  %v270_v19 = vld [vmem:[#allocation2 + $0x588] sm:$0xff]  ;;  %v171_v22 = vld [vmem:[#allocation2 + $0x270] sm:$0xff] }
  0x1a   :  { %931 = vmatpush.msra.mxu3 %v276_v13  ;;  %912 = vmatpush.msra.mxu2 %v225_v12  ;;  %v267_v23 = vld [vmem:[#allocation2 + $0x570] sm:$0xff]  ;;  %v120_v24 = vld [vmem:[#allocation2 + $0xd8] sm:$0xff]  ;;  %v117_v28 = vld [vmem:[#allocation2 + $0xc0] sm:$0xff] }
  0x1b   :  { %892 = vmatpush.msra.mxu1 %v177_v14  ;;  %873 = vmatpush.msra.mxu0 %v126_v16  ;;  %v216_v25 = vld [vmem:[#allocation2 + $0x3d8] sm:$0xff]  ;;  %v213_v29 = vld [vmem:[#allocation2 + $0x3c0] sm:$0xff]  ;;  %v114_v32 = vld [vmem:[#allocation2 + $0xa8] sm:$0xff] }
  0x1c   :  { %932 = vmatpush.msra.mxu3 %v273_v15  ;;  %913 = vmatpush.msra.mxu2 %v222_v17  ;;  %v168_v26 = vld [vmem:[#allocation2 + $0x258] sm:$0xff]  ;;  %v165_v30 = vld [vmem:[#allocation2 + $0x240] sm:$0xff]  ;;  %v210_v33 = vld [vmem:[#allocation2 + $0x3a8] sm:$0xff] }
  0x1d   :  { %893 = vmatpush.msra.mxu1 %v174_v18  ;;  %874 = vmatpush.msra.mxu0 %v123_v20  ;;  %v264_v27 = vld [vmem:[#allocation2 + $0x558] sm:$0xff]  ;;  %v261_v31 = vld [vmem:[#allocation2 + $0x540] sm:$0xff]  ;;  %v162_v34 = vld [vmem:[#allocation2 + $0x228] sm:$0xff] }
  0x1e   :  { %933 = vmatpush.msra.mxu3 %v270_v19  ;;  %914 = vmatpush.msra.mxu2 %v219_v21  ;;  %v258_v35 = vld [vmem:[#allocation2 + $0x528] sm:$0xff]  ;;  %v111_v36 = vld [vmem:[#allocation2 + $0x90] sm:$0xff]  ;;  %v108_v40 = vld [vmem:[#allocation2 + $0x78] sm:$0xff] }
  0x1f   :  { %894 = vmatpush.msra.mxu1 %v171_v22  ;;  %875 = vmatpush.msra.mxu0 %v120_v24  ;;  %v207_v37 = vld [vmem:[#allocation2 + $0x390] sm:$0xff]  ;;  %v204_v41 = vld [vmem:[#allocation2 + $0x378] sm:$0xff]  ;;  %v105_v44 = vld [vmem:[#allocation2 + $0x60] sm:$0xff] }
  0x20   :  { %934 = vmatpush.msra.mxu3 %v267_v23  ;;  %915 = vmatpush.msra.mxu2 %v216_v25  ;;  %v159_v38 = vld [vmem:[#allocation2 + $0x210] sm:$0xff]  ;;  %v156_v42 = vld [vmem:[#allocation2 + $0x1f8] sm:$0xff]  ;;  %v201_v45 = vld [vmem:[#allocation2 + $0x360] sm:$0xff] }
  0x21   :  { %895 = vmatpush.msra.mxu1 %v168_v26  ;;  %876 = vmatpush.msra.mxu0 %v117_v28  ;;  %v255_v39 = vld [vmem:[#allocation2 + $0x510] sm:$0xff]  ;;  %v252_v43 = vld [vmem:[#allocation2 + $0x4f8] sm:$0xff]  ;;  %v153_v46 = vld [vmem:[#allocation2 + $0x1e0] sm:$0xff] }
  0x22   :  { %935 = vmatpush.msra.mxu3 %v264_v27  ;;  %916 = vmatpush.msra.mxu2 %v213_v29  ;;  %v249_v47 = vld [vmem:[#allocation2 + $0x4e0] sm:$0xff]  ;;  %v102_v48 = vld [vmem:[#allocation2 + $0x48] sm:$0xff]  ;;  %v99_v52 = vld [vmem:[#allocation2 + $0x30] sm:$0xff] }
  0x23   :  { %896 = vmatpush.msra.mxu1 %v165_v30  ;;  %877 = vmatpush.msra.mxu0 %v114_v32  ;;  %v198_v49 = vld [vmem:[#allocation2 + $0x348] sm:$0xff]  ;;  %v195_v53 = vld [vmem:[#allocation2 + $0x330] sm:$0xff]  ;;  %v96_v56 = vld [vmem:[#allocation2 + $0x18] sm:$0xff] }
  0x24   :  { %936 = vmatpush.msra.mxu3 %v261_v31  ;;  %917 = vmatpush.msra.mxu2 %v210_v33  ;;  %v150_v50 = vld [vmem:[#allocation2 + $0x1c8] sm:$0xff]  ;;  %v147_v54 = vld [vmem:[#allocation2 + $0x1b0] sm:$0xff]  ;;  %v192_v57 = vld [vmem:[#allocation2 + $0x318] sm:$0xff] }
  0x25   :  { %897 = vmatpush.msra.mxu1 %v162_v34  ;;  %878 = vmatpush.msra.mxu0 %v111_v36  ;;  %v246_v51 = vld [vmem:[#allocation2 + $0x4c8] sm:$0xff]  ;;  %v243_v55 = vld [vmem:[#allocation2 + $0x4b0] sm:$0xff]  ;;  %v144_v58 = vld [vmem:[#allocation2 + $0x198] sm:$0xff] }
  0x26   :  { %937 = vmatpush.msra.mxu3 %v258_v35  ;;  %918 = vmatpush.msra.mxu2 %v207_v37  ;;  %v240_v59 = vld [vmem:[#allocation2 + $0x498] sm:$0xff]  ;;  %v93_v60 = vld [vmem:[#allocation2] sm:$0xff]  ;;  %v330_v62 = vld [vmem:[#allocation2 + $0x768] sm:$0xff] }
  0x27   :  { %898 = vmatpush.msra.mxu1 %v159_v38  ;;  %879 = vmatpush.msra.mxu0 %v108_v40  ;;  %v189_v61 = vld [vmem:[#allocation2 + $0x300] sm:$0xff]  ;;  %v426_v63 = vld [vmem:[#allocation2 + $0xa68] sm:$0xff]  ;;  %v327_v2 = vld [vmem:[#allocation2 + $0x750] sm:$0xff] }
  0x28   :  { %938 = vmatpush.msra.mxu3 %v255_v39  ;;  %919 = vmatpush.msra.mxu2 %v204_v41  ;;  %v141_v0 = vld [vmem:[#allocation2 + $0x180] sm:$0xff]  ;;  %v378_v3 = vld [vmem:[#allocation2 + $0x8e8] sm:$0xff]  ;;  %v423_v4 = vld [vmem:[#allocation2 + $0xa50] sm:$0xff] }
  0x29   :  { %899 = vmatpush.msra.mxu1 %v156_v42  ;;  %880 = vmatpush.msra.mxu0 %v105_v44  ;;  %v237_v1 = vld [vmem:[#allocation2 + $0x480] sm:$0xff]  ;;  %v474_v5 = vld [vmem:[#allocation2 + $0xbe8] sm:$0xff]  ;;  %v324_v6 = vld [vmem:[#allocation2 + $0x738] sm:$0xff] }
  0x2a   :  { %939 = vmatpush.msra.mxu3 %v252_v43  ;;  %920 = vmatpush.msra.mxu2 %v201_v45  ;;  %v375_v7 = vld [vmem:[#allocation2 + $0x8d0] sm:$0xff]  ;;  %v420_v8 = vld [vmem:[#allocation2 + $0xa38] sm:$0xff]  ;;  %v321_v10 = vld [vmem:[#allocation2 + $0x720] sm:$0xff] }
  0x2b   :  { %900 = vmatpush.msra.mxu1 %v153_v46  ;;  %881 = vmatpush.msra.mxu0 %v102_v48  ;;  %v471_v9 = vld [vmem:[#allocation2 + $0xbd0] sm:$0xff]  ;;  %v372_v11 = vld [vmem:[#allocation2 + $0x8b8] sm:$0xff]  ;;  %v417_v12 = vld [vmem:[#allocation2 + $0xa20] sm:$0xff] }
  0x2c   :  { %940 = vmatpush.msra.mxu3 %v249_v47  ;;  %921 = vmatpush.msra.mxu2 %v198_v49  ;;  %v468_v13 = vld [vmem:[#allocation2 + $0xbb8] sm:$0xff]  ;;  %v318_v14 = vld [vmem:[#allocation2 + $0x708] sm:$0xff]  ;;  %v369_v15 = vld [vmem:[#allocation2 + $0x8a0] sm:$0xff] }
  0x2d   :  { %901 = vmatpush.msra.mxu1 %v150_v50  ;;  %882 = vmatpush.msra.mxu0 %v99_v52  ;;  %v414_v16 = vld [vmem:[#allocation2 + $0xa08] sm:$0xff]  ;;  %v465_v17 = vld [vmem:[#allocation2 + $0xba0] sm:$0xff]  ;;  %v315_v18 = vld [vmem:[#allocation2 + $0x6f0] sm:$0xff] }
  0x2e   :  { %941 = vmatpush.msra.mxu3 %v246_v51  ;;  %922 = vmatpush.msra.mxu2 %v195_v53  ;;  %v366_v19 = vld [vmem:[#allocation2 + $0x888] sm:$0xff]  ;;  %v411_v20 = vld [vmem:[#allocation2 + $0x9f0] sm:$0xff]  ;;  %v312_v22 = vld [vmem:[#allocation2 + $0x6d8] sm:$0xff] }
  0x2f   :  { %902 = vmatpush.msra.mxu1 %v147_v54  ;;  %883 = vmatpush.msra.mxu0 %v96_v56  ;;  %v462_v21 = vld [vmem:[#allocation2 + $0xb88] sm:$0xff]  ;;  %v363_v23 = vld [vmem:[#allocation2 + $0x870] sm:$0xff]  ;;  %v408_v24 = vld [vmem:[#allocation2 + $0x9d8] sm:$0xff] }
  0x30   :  { %942 = vmatpush.msra.mxu3 %v243_v55  ;;  %923 = vmatpush.msra.mxu2 %v192_v57  ;;  %v459_v25 = vld [vmem:[#allocation2 + $0xb70] sm:$0xff]  ;;  %v309_v26 = vld [vmem:[#allocation2 + $0x6c0] sm:$0xff]  ;;  %v360_v27 = vld [vmem:[#allocation2 + $0x858] sm:$0xff] }
  0x31   :  { %903 = vmatpush.msra.mxu1 %v144_v58  ;;  %884 = vmatpush.msra.mxu0 %v93_v60  ;;  %v405_v28 = vld [vmem:[#allocation2 + $0x9c0] sm:$0xff]  ;;  %v456_v29 = vld [vmem:[#allocation2 + $0xb58] sm:$0xff]  ;;  %v306_v30 = vld [vmem:[#allocation2 + $0x6a8] sm:$0xff] }
  0x32   :  { %943 = vmatpush.msra.mxu3 %v240_v59  ;;  %924 = vmatpush.msra.mxu2 %v189_v61  ;;  %v357_v31 = vld [vmem:[#allocation2 + $0x840] sm:$0xff]  ;;  %v402_v32 = vld [vmem:[#allocation2 + $0x9a8] sm:$0xff]  ;;  %v303_v34 = vld [vmem:[#allocation2 + $0x690] sm:$0xff] }
  0x33   :  { %949 = vmatpush.msrb.mxu0 %v330_v62  ;;  %904 = vmatpush.msra.mxu1 %v141_v0  ;;  %v453_v33 = vld [vmem:[#allocation2 + $0xb40] sm:$0xff]  ;;  %v354_v35 = vld [vmem:[#allocation2 + $0x828] sm:$0xff]  ;;  %v399_v36 = vld [vmem:[#allocation2 + $0x990] sm:$0xff] }
  0x34   :  { %989 = vmatpush.msrb.mxu2 %v426_v63  ;;  %944 = vmatpush.msra.mxu3 %v237_v1  ;;  %v450_v37 = vld [vmem:[#allocation2 + $0xb28] sm:$0xff]  ;;  %v300_v38 = vld [vmem:[#allocation2 + $0x678] sm:$0xff]  ;;  %v351_v39 = vld [vmem:[#allocation2 + $0x810] sm:$0xff] }
  0x35   :  { %950 = vmatpush.msrb.mxu0 %v327_v2  ;;  %969 = vmatpush.msrb.mxu1 %v378_v3  ;;  %v396_v40 = vld [vmem:[#allocation2 + $0x978] sm:$0xff]  ;;  %v447_v41 = vld [vmem:[#allocation2 + $0xb10] sm:$0xff]  ;;  %v297_v42 = vld [vmem:[#allocation2 + $0x660] sm:$0xff] }
  0x36   :  { %990 = vmatpush.msrb.mxu2 %v423_v4  ;;  %1009 = vmatpush.msrb.mxu3 %v474_v5  ;;  %v348_v43 = vld [vmem:[#allocation2 + $0x7f8] sm:$0xff]  ;;  %v393_v44 = vld [vmem:[#allocation2 + $0x960] sm:$0xff]  ;;  %v294_v46 = vld [vmem:[#allocation2 + $0x648] sm:$0xff] }
  0x37   :  { %951 = vmatpush.msrb.mxu0 %v324_v6  ;;  %970 = vmatpush.msrb.mxu1 %v375_v7  ;;  %v444_v45 = vld [vmem:[#allocation2 + $0xaf8] sm:$0xff]  ;;  %v345_v47 = vld [vmem:[#allocation2 + $0x7e0] sm:$0xff]  ;;  %v390_v48 = vld [vmem:[#allocation2 + $0x948] sm:$0xff] }
  0x38   :  { %991 = vmatpush.msrb.mxu2 %v420_v8  ;;  %1010 = vmatpush.msrb.mxu3 %v471_v9  ;;  %v441_v49 = vld [vmem:[#allocation2 + $0xae0] sm:$0xff]  ;;  %v291_v50 = vld [vmem:[#allocation2 + $0x630] sm:$0xff]  ;;  %v342_v51 = vld [vmem:[#allocation2 + $0x7c8] sm:$0xff] }
  0x39   :  { %952 = vmatpush.msrb.mxu0 %v321_v10  ;;  %971 = vmatpush.msrb.mxu1 %v372_v11  ;;  %v387_v52 = vld [vmem:[#allocation2 + $0x930] sm:$0xff]  ;;  %v438_v53 = vld [vmem:[#allocation2 + $0xac8] sm:$0xff]  ;;  %v288_v54 = vld [vmem:[#allocation2 + $0x618] sm:$0xff] }
  0x3a   :  { %992 = vmatpush.msrb.mxu2 %v417_v12  ;;  %1011 = vmatpush.msrb.mxu3 %v468_v13  ;;  %v339_v55 = vld [vmem:[#allocation2 + $0x7b0] sm:$0xff]  ;;  %v384_v56 = vld [vmem:[#allocation2 + $0x918] sm:$0xff]  ;;  %v285_v58 = vld [vmem:[#allocation2 + $0x600] sm:$0xff] }
  0x3b   :  { %953 = vmatpush.msrb.mxu0 %v318_v14  ;;  %972 = vmatpush.msrb.mxu1 %v369_v15  ;;  %v435_v57 = vld [vmem:[#allocation2 + $0xab0] sm:$0xff]  ;;  %v336_v59 = vld [vmem:[#allocation2 + $0x798] sm:$0xff]  ;;  %v381_v60 = vld [vmem:[#allocation2 + $0x900] sm:$0xff] }
  0x3c   :  { %993 = vmatpush.msrb.mxu2 %v414_v16  ;;  %1012 = vmatpush.msrb.mxu3 %v465_v17  ;;  %v432_v61 = vld [vmem:[#allocation2 + $0xa98] sm:$0xff]  ;;  %v77_v62 = vld [vmem:[%s2351_s0] sm:$0xff]  ;;  %v79_v63 = vld [vmem:[%s2351_s0 + $0x10] sm:$0xff] }
  0x3d   :  { %954 = vmatpush.msrb.mxu0 %v315_v18  ;;  %973 = vmatpush.msrb.mxu1 %v366_v19  ;;  %v522_v0 = vld [vmem:[#allocation2 + $0xd68] sm:$0xff]  ;;  %v333_v2 = vld [vmem:[#allocation2 + $0x780] sm:$0xff]  ;;  %v80_v5 = vld [vmem:[%s2351_s0 + $0x18] sm:$0xff] }
  0x3e   :  { %994 = vmatpush.msrb.mxu2 %v411_v20  ;;  %1013 = vmatpush.msrb.mxu3 %v462_v21  ;;  %v618_v1 = vld [vmem:[#allocation2 + $0x1068] sm:$0xff]  ;;  %v429_v3 = vld [vmem:[#allocation2 + $0xa80] sm:$0xff]  ;;  %v519_v6 = vld [vmem:[#allocation2 + $0xd50] sm:$0xff] }
  0x3f   :  { %955 = vmatpush.msrb.mxu0 %v312_v22  ;;  %974 = vmatpush.msrb.mxu1 %v363_v23  ;;  %v78_v4 = vld [vmem:[%s2351_s0 + $0x8] sm:$0xff]  ;;  %v615_v8 = vld [vmem:[#allocation2 + $0x1050] sm:$0xff]  ;;  %v516_v10 = vld [vmem:[#allocation2 + $0xd38] sm:$0xff] }
  0x40   :  { %995 = vmatpush.msrb.mxu2 %v408_v24  ;;  %1014 = vmatpush.msrb.mxu3 %v459_v25  ;;  %v570_v7 = vld [vmem:[#allocation2 + $0xee8] sm:$0xff]  ;;  %v567_v11 = vld [vmem:[#allocation2 + $0xed0] sm:$0xff]  ;;  %v612_v12 = vld [vmem:[#allocation2 + $0x1038] sm:$0xff] }
  0x41   :  { %956 = vmatpush.msrb.mxu0 %v309_v26  ;;  %975 = vmatpush.msrb.mxu1 %v360_v27  ;;  %v666_v9 = vld [vmem:[#allocation2 + $0x11e8] sm:$0xff]  ;;  %v663_v13 = vld [vmem:[#allocation2 + $0x11d0] sm:$0xff]  ;;  %v513_v14 = vld [vmem:[#allocation2 + $0xd20] sm:$0xff] }
  0x42   :  { %996 = vmatpush.msrb.mxu2 %v405_v28  ;;  %1015 = vmatpush.msrb.mxu3 %v456_v29  ;;  %v564_v15 = vld [vmem:[#allocation2 + $0xeb8] sm:$0xff]  ;;  %v609_v16 = vld [vmem:[#allocation2 + $0x1020] sm:$0xff]  ;;  %v83_v18 = vld [vmem:[%s2351_s0 + $0x30] sm:$0xff] }
  0x43   :  { %957 = vmatpush.msrb.mxu0 %v306_v30  ;;  %976 = vmatpush.msrb.mxu1 %v357_v31  ;;  %v660_v17 = vld [vmem:[#allocation2 + $0x11b8] sm:$0xff]  ;;  %v510_v19 = vld [vmem:[#allocation2 + $0xd08] sm:$0xff]  ;;  %v561_v20 = vld [vmem:[#allocation2 + $0xea0] sm:$0xff] }
  0x44   :  { %997 = vmatpush.msrb.mxu2 %v402_v32  ;;  %1016 = vmatpush.msrb.mxu3 %v453_v33  ;;  %v606_v21 = vld [vmem:[#allocation2 + $0x1008] sm:$0xff]  ;;  %v657_v22 = vld [vmem:[#allocation2 + $0x11a0] sm:$0xff]  ;;  %v84_v24 = vld [vmem:[%s2351_s0 + $0x38] sm:$0xff] }
  0x45   :  { %958 = vmatpush.msrb.mxu0 %v303_v34  ;;  %977 = vmatpush.msrb.mxu1 %v354_v35  ;;  %v81_v23 = vld [vmem:[%s2351_s0 + $0x20] sm:$0xff]  ;;  %v507_v25 = vld [vmem:[#allocation2 + $0xcf0] sm:$0xff]  ;;  %v558_v26 = vld [vmem:[#allocation2 + $0xe88] sm:$0xff] }
  0x46   :  { %998 = vmatpush.msrb.mxu2 %v399_v36  ;;  %1017 = vmatpush.msrb.mxu3 %v450_v37  ;;  %v603_v27 = vld [vmem:[#allocation2 + $0xff0] sm:$0xff]  ;;  %v654_v28 = vld [vmem:[#allocation2 + $0x1188] sm:$0xff]  ;;  %v504_v30 = vld [vmem:[#allocation2 + $0xcd8] sm:$0xff] }
  0x47   :  { %959 = vmatpush.msrb.mxu0 %v300_v38  ;;  %978 = vmatpush.msrb.mxu1 %v351_v39  ;;  %v82_v29 = vld [vmem:[%s2351_s0 + $0x28] sm:$0xff]  ;;  %v555_v31 = vld [vmem:[#allocation2 + $0xe70] sm:$0xff]  ;;  %v600_v32 = vld [vmem:[#allocation2 + $0xfd8] sm:$0xff] }
  0x48   :  { %999 = vmatpush.msrb.mxu2 %v396_v40  ;;  %1018 = vmatpush.msrb.mxu3 %v447_v41  ;;  %v651_v33 = vld [vmem:[#allocation2 + $0x1170] sm:$0xff]  ;;  %v501_v34 = vld [vmem:[#allocation2 + $0xcc0] sm:$0xff]  ;;  %v552_v35 = vld [vmem:[#allocation2 + $0xe58] sm:$0xff] }
  0x49   :  { %960 = vmatpush.msrb.mxu0 %v297_v42  ;;  %979 = vmatpush.msrb.mxu1 %v348_v43  ;;  %v597_v36 = vld [vmem:[#allocation2 + $0xfc0] sm:$0xff]  ;;  %v648_v37 = vld [vmem:[#allocation2 + $0x1158] sm:$0xff]  ;;  %v498_v38 = vld [vmem:[#allocation2 + $0xca8] sm:$0xff] }
  0x4a   :  { %1000 = vmatpush.msrb.mxu2 %v393_v44  ;;  %1019 = vmatpush.msrb.mxu3 %v444_v45  ;;  %v549_v39 = vld [vmem:[#allocation2 + $0xe40] sm:$0xff]  ;;  %v594_v40 = vld [vmem:[#allocation2 + $0xfa8] sm:$0xff]  ;;  %v495_v42 = vld [vmem:[#allocation2 + $0xc90] sm:$0xff] }
  0x4b   :  { %961 = vmatpush.msrb.mxu0 %v294_v46  ;;  %980 = vmatpush.msrb.mxu1 %v345_v47  ;;  %v645_v41 = vld [vmem:[#allocation2 + $0x1140] sm:$0xff]  ;;  %v546_v43 = vld [vmem:[#allocation2 + $0xe28] sm:$0xff]  ;;  %v591_v44 = vld [vmem:[#allocation2 + $0xf90] sm:$0xff] }
  0x4c   :  { %1001 = vmatpush.msrb.mxu2 %v390_v48  ;;  %1020 = vmatpush.msrb.mxu3 %v441_v49  ;;  %v642_v45 = vld [vmem:[#allocation2 + $0x1128] sm:$0xff]  ;;  %v492_v46 = vld [vmem:[#allocation2 + $0xc78] sm:$0xff]  ;;  %v543_v47 = vld [vmem:[#allocation2 + $0xe10] sm:$0xff] }
  0x4d   :  { %962 = vmatpush.msrb.mxu0 %v291_v50  ;;  %981 = vmatpush.msrb.mxu1 %v342_v51  ;;  %v588_v48 = vld [vmem:[#allocation2 + $0xf78] sm:$0xff]  ;;  %v639_v49 = vld [vmem:[#allocation2 + $0x1110] sm:$0xff]  ;;  %v489_v50 = vld [vmem:[#allocation2 + $0xc60] sm:$0xff] }
  0x4e   :  { %1002 = vmatpush.msrb.mxu2 %v387_v52  ;;  %1021 = vmatpush.msrb.mxu3 %v438_v53  ;;  %v540_v51 = vld [vmem:[#allocation2 + $0xdf8] sm:$0xff]  ;;  %v585_v52 = vld [vmem:[#allocation2 + $0xf60] sm:$0xff] }
  0x4f   :  { %963 = vmatpush.msrb.mxu0 %v288_v54  ;;  %982 = vmatpush.msrb.mxu1 %v339_v55  ;;  %v636_v53 = vld [vmem:[#allocation2 + $0x10f8] sm:$0xff]  ;;  %v486_v54 = vld [vmem:[#allocation2 + $0xc48] sm:$0xff]  ;;  %v537_v55 = vld [vmem:[#allocation2 + $0xde0] sm:$0xff] }
  0x50   :  { %1003 = vmatpush.msrb.mxu2 %v384_v56  ;;  %1022 = vmatpush.msrb.mxu3 %v435_v57  ;;  %v582_v56 = vld [vmem:[#allocation2 + $0xf48] sm:$0xff]  ;;  %v633_v57 = vld [vmem:[#allocation2 + $0x10e0] sm:$0xff] }
  0x51   :  { %964 = vmatpush.msrb.mxu0 %v285_v58  ;;  %983 = vmatpush.msrb.mxu1 %v336_v59  ;;  %v483_v58 = vld [vmem:[#allocation2 + $0xc30] sm:$0xff]  ;;  %v534_v59 = vld [vmem:[#allocation2 + $0xdc8] sm:$0xff] }
  0x52   :  { %1004 = vmatpush.msrb.mxu2 %v381_v60  ;;  %1023 = vmatpush.msrb.mxu3 %v432_v61  ;;  %v579_v60 = vld [vmem:[#allocation2 + $0xf30] sm:$0xff]  ;;  %v630_v61 = vld [vmem:[#allocation2 + $0x10c8] sm:$0xff] }
  0x53   :  { %885 = vmatmul.f32.vlgmr.msra.gmra.mxu0 %v77_v62  ;;  %925 = vmatmul.f32.vlgmr.msra.gmra.mxu2 %v79_v63  ;;  %v480_v62 = vld [vmem:[#allocation2 + $0xc18] sm:$0xff]  ;;  %v531_v63 = vld [vmem:[#allocation2 + $0xdb0] sm:$0xff] }
  0x54   :  { %1029 = vmatpush.msra.mxu0 %v522_v0  ;;  %1069 = vmatpush.msra.mxu2 %v618_v1  ;;  %v576_v0 = vld [vmem:[#allocation2 + $0xf18] sm:$0xff]  ;;  %v627_v1 = vld [vmem:[#allocation2 + $0x10b0] sm:$0xff] }
  0x55   :  { %984 = vmatpush.msrb.mxu1 %v333_v2  ;;  %1024 = vmatpush.msrb.mxu3 %v429_v3  ;;  %v477_v2 = vld [vmem:[#allocation2 + $0xc00] sm:$0xff]  ;;  %v528_v3 = vld [vmem:[#allocation2 + $0xd98] sm:$0xff] }
  0x56   :  { %905 = vmatmul.f32.vlgmr.msra.gmra.mxu1 %v78_v4  ;;  %945 = vmatmul.f32.vlgmr.msra.gmra.mxu3 %v80_v5  ;;  %v573_v4 = vld [vmem:[#allocation2 + $0xf00] sm:$0xff]  ;;  %v624_v5 = vld [vmem:[#allocation2 + $0x1098] sm:$0xff] }
  0x57   :  { %1030 = vmatpush.msra.mxu0 %v519_v6  ;;  %1049 = vmatpush.msra.mxu1 %v570_v7  ;;  %v85_v6 = vld [vmem:[%s2351_s0 + $0x40] sm:$0xff]  ;;  %v87_v7 = vld [vmem:[%s2351_s0 + $0x50] sm:$0xff] }
  0x58   :  { %1070 = vmatpush.msra.mxu2 %v615_v8  ;;  %1089 = vmatpush.msra.mxu3 %v666_v9  ;;  %v714_v8 = vld [vmem:[#allocation2 + $0x1368] sm:$0xff] }
  0x59   :  { %1031 = vmatpush.msra.mxu0 %v516_v10  ;;  %1050 = vmatpush.msra.mxu1 %v567_v11  ;;  %v810_v9 = vld [vmem:[#allocation2 + $0x1668] sm:$0xff]  ;;  %v525_v10 = vld [vmem:[#allocation2 + $0xd80] sm:$0xff] }
  0x5a   :  { %1071 = vmatpush.msra.mxu2 %v612_v12  ;;  %1090 = vmatpush.msra.mxu3 %v663_v13  ;;  %v621_v11 = vld [vmem:[#allocation2 + $0x1080] sm:$0xff]  ;;  %v86_v12 = vld [vmem:[%s2351_s0 + $0x48] sm:$0xff]  ;;  %v88_v13 = vld [vmem:[%s2351_s0 + $0x58] sm:$0xff] }
  0x5b   :  { %1032 = vmatpush.msra.mxu0 %v513_v14  ;;  %1051 = vmatpush.msra.mxu1 %v564_v15  ;;  %v711_v14 = vld [vmem:[#allocation2 + $0x1350] sm:$0xff]  ;;  %v762_v15 = vld [vmem:[#allocation2 + $0x14e8] sm:$0xff] }
  0x5c   :  { %1072 = vmatpush.msra.mxu2 %v609_v16  ;;  %1091 = vmatpush.msra.mxu3 %v660_v17  ;;  %v807_v16 = vld [vmem:[#allocation2 + $0x1650] sm:$0xff]  ;;  %v858_v17 = vld [vmem:[#allocation2 + $0x17e8] sm:$0xff] }
  0x5d   :  { %1005 = vmatmul.f32.vlgmr.msrb.gmra.mxu2 %v83_v18  ;;  %1033 = vmatpush.msra.mxu0 %v510_v19  ;;  %v708_v18 = vld [vmem:[#allocation2 + $0x1338] sm:$0xff]  ;;  %v759_v19 = vld [vmem:[#allocation2 + $0x14d0] sm:$0xff] }
  0x5e   :  { %1052 = vmatpush.msra.mxu1 %v561_v20  ;;  %1073 = vmatpush.msra.mxu2 %v606_v21  ;;  %v804_v20 = vld [vmem:[#allocation2 + $0x1638] sm:$0xff]  ;;  %v855_v21 = vld [vmem:[#allocation2 + $0x17d0] sm:$0xff] }
  0x5f   :  { %1092 = vmatpush.msra.mxu3 %v657_v22  ;;  %965 = vmatmul.f32.vlgmr.msrb.gmra.mxu0 %v81_v23  ;;  %v705_v22 = vld [vmem:[#allocation2 + $0x1320] sm:$0xff]  ;;  %v756_v23 = vld [vmem:[#allocation2 + $0x14b8] sm:$0xff] }
  0x60   :  { %1025 = vmatmul.f32.vlgmr.msrb.gmra.mxu3 %v84_v24  ;;  %1034 = vmatpush.msra.mxu0 %v507_v25  ;;  %v801_v24 = vld [vmem:[#allocation2 + $0x1620] sm:$0xff]  ;;  %v852_v25 = vld [vmem:[#allocation2 + $0x17b8] sm:$0xff] }
  0x61   :  { %1053 = vmatpush.msra.mxu1 %v558_v26  ;;  %1074 = vmatpush.msra.mxu2 %v603_v27  ;;  %v702_v26 = vld [vmem:[#allocation2 + $0x1308] sm:$0xff]  ;;  %v753_v27 = vld [vmem:[#allocation2 + $0x14a0] sm:$0xff] }
  0x62   :  { %1093 = vmatpush.msra.mxu3 %v654_v28  ;;  %985 = vmatmul.f32.vlgmr.msrb.gmra.mxu1 %v82_v29  ;;  %v798_v28 = vld [vmem:[#allocation2 + $0x1608] sm:$0xff]  ;;  %v849_v29 = vld [vmem:[#allocation2 + $0x17a0] sm:$0xff] }
  0x63   :  { %1035 = vmatpush.msra.mxu0 %v504_v30  ;;  %1054 = vmatpush.msra.mxu1 %v555_v31  ;;  %v699_v30 = vld [vmem:[#allocation2 + $0x12f0] sm:$0xff]  ;;  %v750_v31 = vld [vmem:[#allocation2 + $0x1488] sm:$0xff] }
  0x64   :  { %1075 = vmatpush.msra.mxu2 %v600_v32  ;;  %1094 = vmatpush.msra.mxu3 %v651_v33  ;;  %v795_v32 = vld [vmem:[#allocation2 + $0x15f0] sm:$0xff]  ;;  %v846_v33 = vld [vmem:[#allocation2 + $0x1788] sm:$0xff] }
  0x65   :  { %1036 = vmatpush.msra.mxu0 %v501_v34  ;;  %1055 = vmatpush.msra.mxu1 %v552_v35  ;;  %v696_v34 = vld [vmem:[#allocation2 + $0x12d8] sm:$0xff]  ;;  %v747_v35 = vld [vmem:[#allocation2 + $0x1470] sm:$0xff] }
  0x66   :  { %1076 = vmatpush.msra.mxu2 %v597_v36  ;;  %1095 = vmatpush.msra.mxu3 %v648_v37  ;;  %v792_v36 = vld [vmem:[#allocation2 + $0x15d8] sm:$0xff]  ;;  %v843_v37 = vld [vmem:[#allocation2 + $0x1770] sm:$0xff] }
  0x67   :  { %1037 = vmatpush.msra.mxu0 %v498_v38  ;;  %1056 = vmatpush.msra.mxu1 %v549_v39  ;;  %v693_v38 = vld [vmem:[#allocation2 + $0x12c0] sm:$0xff]  ;;  %v744_v39 = vld [vmem:[#allocation2 + $0x1458] sm:$0xff] }
  0x68   :  { %1077 = vmatpush.msra.mxu2 %v594_v40  ;;  %1096 = vmatpush.msra.mxu3 %v645_v41  ;;  %v789_v40 = vld [vmem:[#allocation2 + $0x15c0] sm:$0xff]  ;;  %v840_v41 = vld [vmem:[#allocation2 + $0x1758] sm:$0xff] }
  0x69   :  { %1038 = vmatpush.msra.mxu0 %v495_v42  ;;  %1057 = vmatpush.msra.mxu1 %v546_v43  ;;  %v690_v42 = vld [vmem:[#allocation2 + $0x12a8] sm:$0xff]  ;;  %v741_v43 = vld [vmem:[#allocation2 + $0x1440] sm:$0xff] }
  0x6a   :  { %1078 = vmatpush.msra.mxu2 %v591_v44  ;;  %1097 = vmatpush.msra.mxu3 %v642_v45  ;;  %v786_v44 = vld [vmem:[#allocation2 + $0x15a8] sm:$0xff]  ;;  %v837_v45 = vld [vmem:[#allocation2 + $0x1740] sm:$0xff] }
  0x6b   :  { %1039 = vmatpush.msra.mxu0 %v492_v46  ;;  %1058 = vmatpush.msra.mxu1 %v543_v47  ;;  %v687_v46 = vld [vmem:[#allocation2 + $0x1290] sm:$0xff]  ;;  %v738_v47 = vld [vmem:[#allocation2 + $0x1428] sm:$0xff] }
  0x6c   :  { %1079 = vmatpush.msra.mxu2 %v588_v48  ;;  %1098 = vmatpush.msra.mxu3 %v639_v49  ;;  %v783_v48 = vld [vmem:[#allocation2 + $0x1590] sm:$0xff]  ;;  %v834_v49 = vld [vmem:[#allocation2 + $0x1728] sm:$0xff] }
  0x6d   :  { %1040 = vmatpush.msra.mxu0 %v489_v50  ;;  %1059 = vmatpush.msra.mxu1 %v540_v51  ;;  %v684_v50 = vld [vmem:[#allocation2 + $0x1278] sm:$0xff]  ;;  %v735_v51 = vld [vmem:[#allocation2 + $0x1410] sm:$0xff] }
  0x6e   :  { %1080 = vmatpush.msra.mxu2 %v585_v52  ;;  %1099 = vmatpush.msra.mxu3 %v636_v53  ;;  %v780_v52 = vld [vmem:[#allocation2 + $0x1578] sm:$0xff]  ;;  %v831_v53 = vld [vmem:[#allocation2 + $0x1710] sm:$0xff] }
  0x6f   :  { %1041 = vmatpush.msra.mxu0 %v486_v54  ;;  %1060 = vmatpush.msra.mxu1 %v537_v55  ;;  %v681_v54 = vld [vmem:[#allocation2 + $0x1260] sm:$0xff]  ;;  %v732_v55 = vld [vmem:[#allocation2 + $0x13f8] sm:$0xff] }
  0x70   :  { %1081 = vmatpush.msra.mxu2 %v582_v56  ;;  %1100 = vmatpush.msra.mxu3 %v633_v57  ;;  %v777_v56 = vld [vmem:[#allocation2 + $0x1560] sm:$0xff]  ;;  %v828_v57 = vld [vmem:[#allocation2 + $0x16f8] sm:$0xff] }
  0x71   :  { %1042 = vmatpush.msra.mxu0 %v483_v58  ;;  %1061 = vmatpush.msra.mxu1 %v534_v59  ;;  %v678_v58 = vld [vmem:[#allocation2 + $0x1248] sm:$0xff]  ;;  %v729_v59 = vld [vmem:[#allocation2 + $0x13e0] sm:$0xff] }
  0x72   :  { %1082 = vmatpush.msra.mxu2 %v579_v60  ;;  %1101 = vmatpush.msra.mxu3 %v630_v61  ;;  %v774_v60 = vld [vmem:[#allocation2 + $0x1548] sm:$0xff]  ;;  %v825_v61 = vld [vmem:[#allocation2 + $0x16e0] sm:$0xff] }
  0x73   :  { %1043 = vmatpush.msra.mxu0 %v480_v62  ;;  %1062 = vmatpush.msra.mxu1 %v531_v63  ;;  %v675_v62 = vld [vmem:[#allocation2 + $0x1230] sm:$0xff]  ;;  %v726_v63 = vld [vmem:[#allocation2 + $0x13c8] sm:$0xff] }
  0x74   :  { %1083 = vmatpush.msra.mxu2 %v576_v0  ;;  %1102 = vmatpush.msra.mxu3 %v627_v1  ;;  %v771_v0 = vld [vmem:[#allocation2 + $0x1530] sm:$0xff]  ;;  %v822_v1 = vld [vmem:[#allocation2 + $0x16c8] sm:$0xff] }
  0x75   :  { %1044 = vmatpush.msra.mxu0 %v477_v2  ;;  %1063 = vmatpush.msra.mxu1 %v528_v3  ;;  %v672_v2 = vld [vmem:[#allocation2 + $0x1218] sm:$0xff]  ;;  %v723_v3 = vld [vmem:[#allocation2 + $0x13b0] sm:$0xff] }
  0x76   :  { %1084 = vmatpush.msra.mxu2 %v573_v4  ;;  %1103 = vmatpush.msra.mxu3 %v624_v5  ;;  %v768_v4 = vld [vmem:[#allocation2 + $0x1518] sm:$0xff]  ;;  %v819_v5 = vld [vmem:[#allocation2 + $0x16b0] sm:$0xff] }
  0x77   :  { %1045 = vmatmul.f32.vlgmr.msra.gmra.mxu0 %v85_v6  ;;  %1085 = vmatmul.f32.vlgmr.msra.gmra.mxu2 %v87_v7  ;;  %v669_v6 = vld [vmem:[#allocation2 + $0x1200] sm:$0xff]  ;;  %v720_v7 = vld [vmem:[#allocation2 + $0x1398] sm:$0xff] }
  0x78   :  { %1109 = vmatpush.msrb.mxu0 %v714_v8  ;;  %1149 = vmatpush.msrb.mxu2 %v810_v9  ;;  %v765_v8 = vld [vmem:[#allocation2 + $0x1500] sm:$0xff]  ;;  %v816_v9 = vld [vmem:[#allocation2 + $0x1698] sm:$0xff] }
  0x79   :  { %1064 = vmatpush.msra.mxu1 %v525_v10  ;;  %1104 = vmatpush.msra.mxu3 %v621_v11  ;;  %v89_v10 = vld [vmem:[%s2351_s0 + $0x60] sm:$0xff]  ;;  %v91_v11 = vld [vmem:[%s2351_s0 + $0x70] sm:$0xff] }
  0x7a   :  { %1065 = vmatmul.f32.vlgmr.msra.gmra.mxu1 %v86_v12  ;;  %1105 = vmatmul.f32.vlgmr.msra.gmra.mxu3 %v88_v13  ;;  %v139_v12 = vld [vmem:[#allocation2 + $0x170] sm:$0xff] }
  0x7b   :  { %1110 = vmatpush.msrb.mxu0 %v711_v14  ;;  %1129 = vmatpush.msrb.mxu1 %v762_v15  ;;  %v235_v13 = vld [vmem:[#allocation2 + $0x470] sm:$0xff]  ;;  %v717_v14 = vld [vmem:[#allocation2 + $0x1380] sm:$0xff] }
  0x7c   :  { %1150 = vmatpush.msrb.mxu2 %v807_v16  ;;  %1169 = vmatpush.msrb.mxu3 %v858_v17  ;;  %v813_v15 = vld [vmem:[#allocation2 + $0x1680] sm:$0xff]  ;;  %v90_v16 = vld [vmem:[%s2351_s0 + $0x68] sm:$0xff]  ;;  %v92_v17 = vld [vmem:[%s2351_s0 + $0x78] sm:$0xff] }
  0x7d   :  { %1111 = vmatpush.msrb.mxu0 %v708_v18  ;;  %1130 = vmatpush.msrb.mxu1 %v759_v19  ;;  %v136_v18 = vld [vmem:[#allocation2 + $0x158] sm:$0xff]  ;;  %v187_v19 = vld [vmem:[#allocation2 + $0x2f0] sm:$0xff] }
  0x7e   :  { %1151 = vmatpush.msrb.mxu2 %v804_v20  ;;  %1170 = vmatpush.msrb.mxu3 %v855_v21  ;;  %v232_v20 = vld [vmem:[#allocation2 + $0x458] sm:$0xff]  ;;  %v283_v21 = vld [vmem:[#allocation2 + $0x5f0] sm:$0xff] }
  0x7f   :  { %1112 = vmatpush.msrb.mxu0 %v705_v22  ;;  %1131 = vmatpush.msrb.mxu1 %v756_v23  ;;  %v133_v22 = vld [vmem:[#allocation2 + $0x140] sm:$0xff]  ;;  %v184_v23 = vld [vmem:[#allocation2 + $0x2d8] sm:$0xff] }
  0x80   :  { %1152 = vmatpush.msrb.mxu2 %v801_v24  ;;  %1171 = vmatpush.msrb.mxu3 %v852_v25  ;;  %v229_v24 = vld [vmem:[#allocation2 + $0x440] sm:$0xff]  ;;  %v280_v25 = vld [vmem:[#allocation2 + $0x5d8] sm:$0xff] }
  0x81   :  { %1113 = vmatpush.msrb.mxu0 %v702_v26  ;;  %1132 = vmatpush.msrb.mxu1 %v753_v27  ;;  %v130_v26 = vld [vmem:[#allocation2 + $0x128] sm:$0xff]  ;;  %v181_v27 = vld [vmem:[#allocation2 + $0x2c0] sm:$0xff] }
  0x82   :  { %1153 = vmatpush.msrb.mxu2 %v798_v28  ;;  %1172 = vmatpush.msrb.mxu3 %v849_v29  ;;  %v226_v28 = vld [vmem:[#allocation2 + $0x428] sm:$0xff]  ;;  %v277_v29 = vld [vmem:[#allocation2 + $0x5c0] sm:$0xff] }
  0x83   :  { %1114 = vmatpush.msrb.mxu0 %v699_v30  ;;  %1133 = vmatpush.msrb.mxu1 %v750_v31  ;;  %v127_v30 = vld [vmem:[#allocation2 + $0x110] sm:$0xff]  ;;  %v178_v31 = vld [vmem:[#allocation2 + $0x2a8] sm:$0xff] }
  0x84   :  { %1154 = vmatpush.msrb.mxu2 %v795_v32  ;;  %1173 = vmatpush.msrb.mxu3 %v846_v33  ;;  %v223_v32 = vld [vmem:[#allocation2 + $0x410] sm:$0xff]  ;;  %v274_v33 = vld [vmem:[#allocation2 + $0x5a8] sm:$0xff] }
  0x85   :  { %1115 = vmatpush.msrb.mxu0 %v696_v34  ;;  %1134 = vmatpush.msrb.mxu1 %v747_v35  ;;  %v124_v34 = vld [vmem:[#allocation2 + $0xf8] sm:$0xff]  ;;  %v175_v35 = vld [vmem:[#allocation2 + $0x290] sm:$0xff] }
  0x86   :  { %1155 = vmatpush.msrb.mxu2 %v792_v36  ;;  %1174 = vmatpush.msrb.mxu3 %v843_v37  ;;  %v220_v36 = vld [vmem:[#allocation2 + $0x3f8] sm:$0xff]  ;;  %v271_v37 = vld [vmem:[#allocation2 + $0x590] sm:$0xff] }
  0x87   :  { %1116 = vmatpush.msrb.mxu0 %v693_v38  ;;  %1135 = vmatpush.msrb.mxu1 %v744_v39  ;;  %v121_v38 = vld [vmem:[#allocation2 + $0xe0] sm:$0xff]  ;;  %v172_v39 = vld [vmem:[#allocation2 + $0x278] sm:$0xff] }
  0x88   :  { %1156 = vmatpush.msrb.mxu2 %v789_v40  ;;  %1175 = vmatpush.msrb.mxu3 %v840_v41  ;;  %v217_v40 = vld [vmem:[#allocation2 + $0x3e0] sm:$0xff]  ;;  %v268_v41 = vld [vmem:[#allocation2 + $0x578] sm:$0xff] }
  0x89   :  { %1117 = vmatpush.msrb.mxu0 %v690_v42  ;;  %1136 = vmatpush.msrb.mxu1 %v741_v43  ;;  %v118_v42 = vld [vmem:[#allocation2 + $0xc8] sm:$0xff]  ;;  %v169_v43 = vld [vmem:[#allocation2 + $0x260] sm:$0xff] }
  0x8a   :  { %1157 = vmatpush.msrb.mxu2 %v786_v44  ;;  %1176 = vmatpush.msrb.mxu3 %v837_v45  ;;  %v214_v44 = vld [vmem:[#allocation2 + $0x3c8] sm:$0xff]  ;;  %v265_v45 = vld [vmem:[#allocation2 + $0x560] sm:$0xff] }
  0x8b   :  { %1118 = vmatpush.msrb.mxu0 %v687_v46  ;;  %1137 = vmatpush.msrb.mxu1 %v738_v47  ;;  %v115_v46 = vld [vmem:[#allocation2 + $0xb0] sm:$0xff]  ;;  %v166_v47 = vld [vmem:[#allocation2 + $0x248] sm:$0xff] }
  0x8c   :  { %1158 = vmatpush.msrb.mxu2 %v783_v48  ;;  %1177 = vmatpush.msrb.mxu3 %v834_v49  ;;  %v211_v48 = vld [vmem:[#allocation2 + $0x3b0] sm:$0xff]  ;;  %v262_v49 = vld [vmem:[#allocation2 + $0x548] sm:$0xff] }
  0x8d   :  { %1119 = vmatpush.msrb.mxu0 %v684_v50  ;;  %1138 = vmatpush.msrb.mxu1 %v735_v51  ;;  %v112_v50 = vld [vmem:[#allocation2 + $0x98] sm:$0xff]  ;;  %v163_v51 = vld [vmem:[#allocation2 + $0x230] sm:$0xff] }
  0x8e   :  { %1159 = vmatpush.msrb.mxu2 %v780_v52  ;;  %1178 = vmatpush.msrb.mxu3 %v831_v53  ;;  %v208_v52 = vld [vmem:[#allocation2 + $0x398] sm:$0xff]  ;;  %v259_v53 = vld [vmem:[#allocation2 + $0x530] sm:$0xff] }
  0x8f   :  { %1120 = vmatpush.msrb.mxu0 %v681_v54  ;;  %1139 = vmatpush.msrb.mxu1 %v732_v55  ;;  %v109_v54 = vld [vmem:[#allocation2 + $0x80] sm:$0xff]  ;;  %v160_v55 = vld [vmem:[#allocation2 + $0x218] sm:$0xff] }
  0x90   :  { %1160 = vmatpush.msrb.mxu2 %v777_v56  ;;  %1179 = vmatpush.msrb.mxu3 %v828_v57  ;;  %v205_v56 = vld [vmem:[#allocation2 + $0x380] sm:$0xff]  ;;  %v256_v57 = vld [vmem:[#allocation2 + $0x518] sm:$0xff] }
  0x91   :  { %1121 = vmatpush.msrb.mxu0 %v678_v58  ;;  %1140 = vmatpush.msrb.mxu1 %v729_v59  ;;  %v106_v58 = vld [vmem:[#allocation2 + $0x68] sm:$0xff]  ;;  %v157_v59 = vld [vmem:[#allocation2 + $0x200] sm:$0xff] }
  0x92   :  { %1161 = vmatpush.msrb.mxu2 %v774_v60  ;;  %1180 = vmatpush.msrb.mxu3 %v825_v61  ;;  %v202_v60 = vld [vmem:[#allocation2 + $0x368] sm:$0xff]  ;;  %v253_v61 = vld [vmem:[#allocation2 + $0x500] sm:$0xff] }
  0x93   :  { %1122 = vmatpush.msrb.mxu0 %v675_v62  ;;  %1141 = vmatpush.msrb.mxu1 %v726_v63  ;;  %v103_v62 = vld [vmem:[#allocation2 + $0x50] sm:$0xff]  ;;  %v154_v63 = vld [vmem:[#allocation2 + $0x1e8] sm:$0xff] }
  0x94   :  { %1162 = vmatpush.msrb.mxu2 %v771_v0  ;;  %1181 = vmatpush.msrb.mxu3 %v822_v1  ;;  %v199_v0 = vld [vmem:[#allocation2 + $0x350] sm:$0xff]  ;;  %v250_v1 = vld [vmem:[#allocation2 + $0x4e8] sm:$0xff] }
  0x95   :  { %1123 = vmatpush.msrb.mxu0 %v672_v2  ;;  %1142 = vmatpush.msrb.mxu1 %v723_v3  ;;  %v100_v2 = vld [vmem:[#allocation2 + $0x38] sm:$0xff]  ;;  %v151_v3 = vld [vmem:[#allocation2 + $0x1d0] sm:$0xff] }
  0x96   :  { %1163 = vmatpush.msrb.mxu2 %v768_v4  ;;  %1182 = vmatpush.msrb.mxu3 %v819_v5  ;;  %v196_v4 = vld [vmem:[#allocation2 + $0x338] sm:$0xff]  ;;  %v247_v5 = vld [vmem:[#allocation2 + $0x4d0] sm:$0xff] }
  0x97   :  { %1124 = vmatpush.msrb.mxu0 %v669_v6  ;;  %1143 = vmatpush.msrb.mxu1 %v720_v7  ;;  %v97_v6 = vld [vmem:[#allocation2 + $0x20] sm:$0xff]  ;;  %v148_v7 = vld [vmem:[#allocation2 + $0x1b8] sm:$0xff] }
  0x98   :  { %1164 = vmatpush.msrb.mxu2 %v765_v8  ;;  %1183 = vmatpush.msrb.mxu3 %v816_v9  ;;  %v193_v8 = vld [vmem:[#allocation2 + $0x320] sm:$0xff]  ;;  %v244_v9 = vld [vmem:[#allocation2 + $0x4b8] sm:$0xff] }
  0x99   :  { %1125 = vmatmul.f32.vlgmr.msrb.gmra.mxu0 %v89_v10  ;;  %1165 = vmatmul.f32.vlgmr.msrb.gmra.mxu2 %v91_v11  ;;  %v94_v10 = vld [vmem:[#allocation2 + $0x8] sm:$0xff]  ;;  %v145_v11 = vld [vmem:[#allocation2 + $0x1a0] sm:$0xff] }
  0x9a   :  { %1189 = vmatpush.msra.mxu0 %v139_v12  ;;  %1229 = vmatpush.msra.mxu2 %v235_v13  ;;  %v190_v12 = vld [vmem:[#allocation2 + $0x308] sm:$0xff]  ;;  %v241_v13 = vld [vmem:[#allocation2 + $0x4a0] sm:$0xff] }
  0x9b   :  { %1144 = vmatpush.msrb.mxu1 %v717_v14  ;;  %1184 = vmatpush.msrb.mxu3 %v813_v15  ;;  %v331_v14 = vld [vmem:[#allocation2 + $0x770] sm:$0xff] }
  0x9c   :  { %1145 = vmatmul.f32.vlgmr.msrb.gmra.mxu1 %v90_v16  ;;  %1185 = vmatmul.f32.vlgmr.msrb.gmra.mxu3 %v92_v17  ;;  %v427_v15 = vld [vmem:[#allocation2 + $0xa70] sm:$0xff]  ;;  %v142_v16 = vld [vmem:[#allocation2 + $0x188] sm:$0xff] }
  0x9d   :  { %1190 = vmatpush.msra.mxu0 %v136_v18  ;;  %1209 = vmatpush.msra.mxu1 %v187_v19  ;;  %v238_v17 = vld [vmem:[#allocation2 + $0x488] sm:$0xff]  ;;  %v328_v18 = vld [vmem:[#allocation2 + $0x758] sm:$0xff]  ;;  %v379_v19 = vld [vmem:[#allocation2 + $0x8f0] sm:$0xff] }
  0x9e   :  { %1230 = vmatpush.msra.mxu2 %v232_v20  ;;  %1249 = vmatpush.msra.mxu3 %v283_v21  ;;  %v424_v20 = vld [vmem:[#allocation2 + $0xa58] sm:$0xff]  ;;  %v475_v21 = vld [vmem:[#allocation2 + $0xbf0] sm:$0xff] }
  0x9f   :  { %1191 = vmatpush.msra.mxu0 %v133_v22  ;;  %1210 = vmatpush.msra.mxu1 %v184_v23  ;;  %v325_v22 = vld [vmem:[#allocation2 + $0x740] sm:$0xff]  ;;  %v376_v23 = vld [vmem:[#allocation2 + $0x8d8] sm:$0xff] }
  0xa0   :  { %1231 = vmatpush.msra.mxu2 %v229_v24  ;;  %1250 = vmatpush.msra.mxu3 %v280_v25  ;;  %v421_v24 = vld [vmem:[#allocation2 + $0xa40] sm:$0xff]  ;;  %v472_v25 = vld [vmem:[#allocation2 + $0xbd8] sm:$0xff] }
  0xa1   :  { %1192 = vmatpush.msra.mxu0 %v130_v26  ;;  %1211 = vmatpush.msra.mxu1 %v181_v27  ;;  %v322_v26 = vld [vmem:[#allocation2 + $0x728] sm:$0xff]  ;;  %v373_v27 = vld [vmem:[#allocation2 + $0x8c0] sm:$0xff] }
  0xa2   :  { %1232 = vmatpush.msra.mxu2 %v226_v28  ;;  %1251 = vmatpush.msra.mxu3 %v277_v29  ;;  %v418_v28 = vld [vmem:[#allocation2 + $0xa28] sm:$0xff]  ;;  %v469_v29 = vld [vmem:[#allocation2 + $0xbc0] sm:$0xff] }
  0xa3   :  { %1193 = vmatpush.msra.mxu0 %v127_v30  ;;  %1212 = vmatpush.msra.mxu1 %v178_v31  ;;  %v319_v30 = vld [vmem:[#allocation2 + $0x710] sm:$0xff]  ;;  %v370_v31 = vld [vmem:[#allocation2 + $0x8a8] sm:$0xff] }
  0xa4   :  { %1233 = vmatpush.msra.mxu2 %v223_v32  ;;  %1252 = vmatpush.msra.mxu3 %v274_v33  ;;  %v415_v32 = vld [vmem:[#allocation2 + $0xa10] sm:$0xff]  ;;  %v466_v33 = vld [vmem:[#allocation2 + $0xba8] sm:$0xff] }
  0xa5   :  { %1194 = vmatpush.msra.mxu0 %v124_v34  ;;  %1213 = vmatpush.msra.mxu1 %v175_v35  ;;  %v316_v34 = vld [vmem:[#allocation2 + $0x6f8] sm:$0xff]  ;;  %v367_v35 = vld [vmem:[#allocation2 + $0x890] sm:$0xff] }
  0xa6   :  { %1234 = vmatpush.msra.mxu2 %v220_v36  ;;  %1253 = vmatpush.msra.mxu3 %v271_v37  ;;  %v412_v36 = vld [vmem:[#allocation2 + $0x9f8] sm:$0xff]  ;;  %v463_v37 = vld [vmem:[#allocation2 + $0xb90] sm:$0xff] }
  0xa7   :  { %1195 = vmatpush.msra.mxu0 %v121_v38  ;;  %1214 = vmatpush.msra.mxu1 %v172_v39  ;;  %v313_v38 = vld [vmem:[#allocation2 + $0x6e0] sm:$0xff]  ;;  %v364_v39 = vld [vmem:[#allocation2 + $0x878] sm:$0xff] }
  0xa8   :  { %1235 = vmatpush.msra.mxu2 %v217_v40  ;;  %1254 = vmatpush.msra.mxu3 %v268_v41  ;;  %v409_v40 = vld [vmem:[#allocation2 + $0x9e0] sm:$0xff]  ;;  %v460_v41 = vld [vmem:[#allocation2 + $0xb78] sm:$0xff] }
  0xa9   :  { %1196 = vmatpush.msra.mxu0 %v118_v42  ;;  %1215 = vmatpush.msra.mxu1 %v169_v43  ;;  %v310_v42 = vld [vmem:[#allocation2 + $0x6c8] sm:$0xff]  ;;  %v361_v43 = vld [vmem:[#allocation2 + $0x860] sm:$0xff] }
  0xaa   :  { %1236 = vmatpush.msra.mxu2 %v214_v44  ;;  %1255 = vmatpush.msra.mxu3 %v265_v45  ;;  %v406_v44 = vld [vmem:[#allocation2 + $0x9c8] sm:$0xff]  ;;  %v457_v45 = vld [vmem:[#allocation2 + $0xb60] sm:$0xff] }
  0xab   :  { %1197 = vmatpush.msra.mxu0 %v115_v46  ;;  %1216 = vmatpush.msra.mxu1 %v166_v47  ;;  %v307_v46 = vld [vmem:[#allocation2 + $0x6b0] sm:$0xff]  ;;  %v358_v47 = vld [vmem:[#allocation2 + $0x848] sm:$0xff] }
  0xac   :  { %1237 = vmatpush.msra.mxu2 %v211_v48  ;;  %1256 = vmatpush.msra.mxu3 %v262_v49  ;;  %v403_v48 = vld [vmem:[#allocation2 + $0x9b0] sm:$0xff]  ;;  %v454_v49 = vld [vmem:[#allocation2 + $0xb48] sm:$0xff] }
  0xad   :  { %1198 = vmatpush.msra.mxu0 %v112_v50  ;;  %1217 = vmatpush.msra.mxu1 %v163_v51  ;;  %v304_v50 = vld [vmem:[#allocation2 + $0x698] sm:$0xff]  ;;  %v355_v51 = vld [vmem:[#allocation2 + $0x830] sm:$0xff] }
  0xae   :  { %1238 = vmatpush.msra.mxu2 %v208_v52  ;;  %1257 = vmatpush.msra.mxu3 %v259_v53  ;;  %v400_v52 = vld [vmem:[#allocation2 + $0x998] sm:$0xff]  ;;  %v451_v53 = vld [vmem:[#allocation2 + $0xb30] sm:$0xff] }
  0xaf   :  { %1199 = vmatpush.msra.mxu0 %v109_v54  ;;  %1218 = vmatpush.msra.mxu1 %v160_v55  ;;  %v301_v54 = vld [vmem:[#allocation2 + $0x680] sm:$0xff]  ;;  %v352_v55 = vld [vmem:[#allocation2 + $0x818] sm:$0xff] }
  0xb0   :  { %1239 = vmatpush.msra.mxu2 %v205_v56  ;;  %1258 = vmatpush.msra.mxu3 %v256_v57  ;;  %v397_v56 = vld [vmem:[#allocation2 + $0x980] sm:$0xff]  ;;  %v448_v57 = vld [vmem:[#allocation2 + $0xb18] sm:$0xff] }
  0xb1   :  { %1200 = vmatpush.msra.mxu0 %v106_v58  ;;  %1219 = vmatpush.msra.mxu1 %v157_v59  ;;  %v298_v58 = vld [vmem:[#allocation2 + $0x668] sm:$0xff]  ;;  %v349_v59 = vld [vmem:[#allocation2 + $0x800] sm:$0xff] }
  0xb2   :  { %1240 = vmatpush.msra.mxu2 %v202_v60  ;;  %1259 = vmatpush.msra.mxu3 %v253_v61  ;;  %v394_v60 = vld [vmem:[#allocation2 + $0x968] sm:$0xff]  ;;  %v445_v61 = vld [vmem:[#allocation2 + $0xb00] sm:$0xff] }
  0xb3   :  { %1201 = vmatpush.msra.mxu0 %v103_v62  ;;  %1220 = vmatpush.msra.mxu1 %v154_v63  ;;  %v295_v62 = vld [vmem:[#allocation2 + $0x650] sm:$0xff]  ;;  %v346_v63 = vld [vmem:[#allocation2 + $0x7e8] sm:$0xff] }
  0xb4   :  { %1241 = vmatpush.msra.mxu2 %v199_v0  ;;  %1260 = vmatpush.msra.mxu3 %v250_v1  ;;  %v391_v0 = vld [vmem:[#allocation2 + $0x950] sm:$0xff]  ;;  %v442_v1 = vld [vmem:[#allocation2 + $0xae8] sm:$0xff] }
  0xb5   :  { %1202 = vmatpush.msra.mxu0 %v100_v2  ;;  %1221 = vmatpush.msra.mxu1 %v151_v3  ;;  %v292_v2 = vld [vmem:[#allocation2 + $0x638] sm:$0xff]  ;;  %v343_v3 = vld [vmem:[#allocation2 + $0x7d0] sm:$0xff] }
  0xb6   :  { %1242 = vmatpush.msra.mxu2 %v196_v4  ;;  %1261 = vmatpush.msra.mxu3 %v247_v5  ;;  %v388_v4 = vld [vmem:[#allocation2 + $0x938] sm:$0xff]  ;;  %v439_v5 = vld [vmem:[#allocation2 + $0xad0] sm:$0xff] }
  0xb7   :  { %1203 = vmatpush.msra.mxu0 %v97_v6  ;;  %1222 = vmatpush.msra.mxu1 %v148_v7  ;;  %v289_v6 = vld [vmem:[#allocation2 + $0x620] sm:$0xff]  ;;  %v340_v7 = vld [vmem:[#allocation2 + $0x7b8] sm:$0xff] }
  0xb8   :  { %1243 = vmatpush.msra.mxu2 %v193_v8  ;;  %1262 = vmatpush.msra.mxu3 %v244_v9  ;;  %v385_v8 = vld [vmem:[#allocation2 + $0x920] sm:$0xff]  ;;  %v436_v9 = vld [vmem:[#allocation2 + $0xab8] sm:$0xff] }
  0xb9   :  { %1204 = vmatpush.msra.mxu0 %v94_v10  ;;  %1223 = vmatpush.msra.mxu1 %v145_v11  ;;  %v286_v10 = vld [vmem:[#allocation2 + $0x608] sm:$0xff]  ;;  %v337_v11 = vld [vmem:[#allocation2 + $0x7a0] sm:$0xff] }
  0xba   :  { %1244 = vmatpush.msra.mxu2 %v190_v12  ;;  %1263 = vmatpush.msra.mxu3 %v241_v13  ;;  %v382_v12 = vld [vmem:[#allocation2 + $0x908] sm:$0xff]  ;;  %v433_v13 = vld [vmem:[#allocation2 + $0xaa0] sm:$0xff] }
  0xbb   :  { %1269 = vmatpush.msrb.mxu0 %v331_v14  ;;  %1224 = vmatpush.msra.mxu1 %v142_v16  ;;  %v523_v14 = vld [vmem:[#allocation2 + $0xd70] sm:$0xff]  ;;  %v334_v16 = vld [vmem:[#allocation2 + $0x788] sm:$0xff] }
  0xbc   :  { %1309 = vmatpush.msrb.mxu2 %v427_v15  ;;  %1264 = vmatpush.msra.mxu3 %v238_v17  ;;  %v619_v15 = vld [vmem:[#allocation2 + $0x1070] sm:$0xff]  ;;  %v430_v17 = vld [vmem:[#allocation2 + $0xa88] sm:$0xff] }
  0xbd   :  { %1270 = vmatpush.msrb.mxu0 %v328_v18  ;;  %1289 = vmatpush.msrb.mxu1 %v379_v19  ;;  %v1970_v18 = vld [vmem:[%s2351_s0] sm:$0xff]  ;;  %v1971_v19 = vld [vmem:[%s2351_s0 + $0x10] sm:$0xff] }
  0xbe   :  { %1310 = vmatpush.msrb.mxu2 %v424_v20  ;;  %1329 = vmatpush.msrb.mxu3 %v475_v21  ;;  %v520_v20 = vld [vmem:[#allocation2 + $0xd58] sm:$0xff]  ;;  %v571_v21 = vld [vmem:[#allocation2 + $0xef0] sm:$0xff] }
  0xbf   :  { %1271 = vmatpush.msrb.mxu0 %v325_v22  ;;  %1290 = vmatpush.msrb.mxu1 %v376_v23  ;;  %v616_v22 = vld [vmem:[#allocation2 + $0x1058] sm:$0xff]  ;;  %v667_v23 = vld [vmem:[#allocation2 + $0x11f0] sm:$0xff] }
  0xc0   :  { %1311 = vmatpush.msrb.mxu2 %v421_v24  ;;  %1330 = vmatpush.msrb.mxu3 %v472_v25  ;;  %v1972_v24 = vld [vmem:[%s2351_s0 + $0x8] sm:$0xff]  ;;  %v1973_v25 = vld [vmem:[%s2351_s0 + $0x18] sm:$0xff] }
  0xc1   :  { %1272 = vmatpush.msrb.mxu0 %v322_v26  ;;  %1291 = vmatpush.msrb.mxu1 %v373_v27  ;;  %v517_v26 = vld [vmem:[#allocation2 + $0xd40] sm:$0xff]  ;;  %v568_v27 = vld [vmem:[#allocation2 + $0xed8] sm:$0xff] }
  0xc2   :  { %1312 = vmatpush.msrb.mxu2 %v418_v28  ;;  %1331 = vmatpush.msrb.mxu3 %v469_v29  ;;  %v613_v28 = vld [vmem:[#allocation2 + $0x1040] sm:$0xff]  ;;  %v664_v29 = vld [vmem:[#allocation2 + $0x11d8] sm:$0xff] }
  0xc3   :  { %1273 = vmatpush.msrb.mxu0 %v319_v30  ;;  %1292 = vmatpush.msrb.mxu1 %v370_v31  ;;  %v514_v30 = vld [vmem:[#allocation2 + $0xd28] sm:$0xff]  ;;  %v565_v31 = vld [vmem:[#allocation2 + $0xec0] sm:$0xff] }
  0xc4   :  { %1313 = vmatpush.msrb.mxu2 %v415_v32  ;;  %1332 = vmatpush.msrb.mxu3 %v466_v33  ;;  %v610_v32 = vld [vmem:[#allocation2 + $0x1028] sm:$0xff]  ;;  %v661_v33 = vld [vmem:[#allocation2 + $0x11c0] sm:$0xff] }
  0xc5   :  { %1274 = vmatpush.msrb.mxu0 %v316_v34  ;;  %1293 = vmatpush.msrb.mxu1 %v367_v35  ;;  %v511_v34 = vld [vmem:[#allocation2 + $0xd10] sm:$0xff]  ;;  %v562_v35 = vld [vmem:[#allocation2 + $0xea8] sm:$0xff] }
  0xc6   :  { %1314 = vmatpush.msrb.mxu2 %v412_v36  ;;  %1333 = vmatpush.msrb.mxu3 %v463_v37  ;;  %v607_v36 = vld [vmem:[#allocation2 + $0x1010] sm:$0xff]  ;;  %v658_v37 = vld [vmem:[#allocation2 + $0x11a8] sm:$0xff] }
  0xc7   :  { %1275 = vmatpush.msrb.mxu0 %v313_v38  ;;  %1294 = vmatpush.msrb.mxu1 %v364_v39  ;;  %v1974_v38 = vld [vmem:[%s2351_s0 + $0x30] sm:$0xff]  ;;  %v508_v39 = vld [vmem:[#allocation2 + $0xcf8] sm:$0xff] }
  0xc8   :  { %1315 = vmatpush.msrb.mxu2 %v409_v40  ;;  %1334 = vmatpush.msrb.mxu3 %v460_v41  ;;  %v861_v40 = vld [vmem:[#allocation4] sm:$0x7]  ;;  %v559_v41 = vld [vmem:[#allocation2 + $0xe90] sm:$0xff] }
  0xc9   :  { %1276 = vmatpush.msrb.mxu0 %v310_v42  ;;  %1295 = vmatpush.msrb.mxu1 %v361_v43  ;;  %v604_v42 = vld [vmem:[#allocation2 + $0xff8] sm:$0xff]  ;;  %v1975_v43 = vld [vmem:[%s2351_s0 + $0x20] sm:$0xff] }
  0xca   :  { %1316 = vmatpush.msrb.mxu2 %v406_v44  ;;  %1335 = vmatpush.msrb.mxu3 %v457_v45  ;;  %v655_v44 = vld [vmem:[#allocation2 + $0x1190] sm:$0xff]  ;;  %v1976_v45 = vld [vmem:[%s2351_s0 + $0x38] sm:$0xff] }
  0xcb   :  { %1277 = vmatpush.msrb.mxu0 %v307_v46  ;;  %1296 = vmatpush.msrb.mxu1 %v358_v47  ;;  %v505_v46 = vld [vmem:[#allocation2 + $0xce0] sm:$0xff]  ;;  %v556_v47 = vld [vmem:[#allocation2 + $0xe78] sm:$0xff] }
  0xcc   :  { %1317 = vmatpush.msrb.mxu2 %v403_v48  ;;  %1336 = vmatpush.msrb.mxu3 %v454_v49  ;;  %v863_v48 = vperm.slane %v861_v40, 0  ;;  %v601_v49 = vld [vmem:[#allocation2 + $0xfe0] sm:$0xff]  ;;  %v1979_v40 = vld [vmem:[%s2351_s0 + $0x50] sm:$0xff] }
  0xcd   :  { %1278 = vmatpush.msrb.mxu0 %v304_v50  ;;  %1297 = vmatpush.msrb.mxu1 %v355_v51  ;;  %v652_v50 = vld [vmem:[#allocation2 + $0x1178] sm:$0xff] }
  0xce   :  { %1318 = vmatpush.msrb.mxu2 %v400_v52  ;;  %1337 = vmatpush.msrb.mxu3 %v451_v53  ;;  %v1977_v52 = vld [vmem:[%s2351_s0 + $0x28] sm:$0xff] }
  0xcf   :  { %1279 = vmatpush.msrb.mxu0 %v301_v54  ;;  %1298 = vmatpush.msrb.mxu1 %v352_v55  ;;  %v502_v53 = vld [vmem:[#allocation2 + $0xcc8] sm:$0xff]  ;;  %v553_v54 = vld [vmem:[#allocation2 + $0xe60] sm:$0xff] }
  0xd0   :  { %1319 = vmatpush.msrb.mxu2 %v397_v56  ;;  %1338 = vmatpush.msrb.mxu3 %v448_v57  ;;  %v886_v51 = vpop.f32.mrf.mxu0  ;;  %v598_v55 = vld [vmem:[#allocation2 + $0xfc8] sm:$0xff]  ;;  %v649_v56 = vld [vmem:[#allocation2 + $0x1160] sm:$0xff]  ;;  %v499_v57 = vld [vmem:[#allocation2 + $0xcb0] sm:$0xff] }
  0xd1   :  { %1280 = vmatpush.msrb.mxu0 %v298_v58  ;;  %1299 = vmatpush.msrb.mxu1 %v349_v59  ;;  %v550_v58 = vld [vmem:[#allocation2 + $0xe48] sm:$0xff]  ;;  %v887_v59 = vadd.f32 %v886_v51, %v863_v48  ;;  %v1981_v48 = vld [vmem:[%s2351_s0 + $0x58] sm:$0xff]  ;;  %v805_v51 = vld [vmem:[#allocation2 + $0x1640] sm:$0xff] }
  0xd2   :  { %1320 = vmatpush.msrb.mxu2 %v394_v60  ;;  %1339 = vmatpush.msrb.mxu3 %v445_v61  ;;  %v595_v60 = vld [vmem:[#allocation2 + $0xfb0] sm:$0xff]  ;;  %v646_v61 = vld [vmem:[#allocation2 + $0x1148] sm:$0xff] }
  0xd3   :  { %1281 = vmatpush.msrb.mxu0 %v295_v62  ;;  %1300 = vmatpush.msrb.mxu1 %v346_v63  ;;  %v906_v62 = vpop.f32.mrf.mxu1  ;;  %v496_v63 = vld [vmem:[#allocation2 + $0xc98] sm:$0xff] }
  0xd4   :  { %1321 = vmatpush.msrb.mxu2 %v391_v0  ;;  %1340 = vmatpush.msrb.mxu3 %v442_v1  ;;  %v547_v0 = vld [vmem:[#allocation2 + $0xe30] sm:$0xff]  ;;  %v592_v1 = vld [vmem:[#allocation2 + $0xf98] sm:$0xff] }
  0xd5   :  { %1282 = vmatpush.msrb.mxu0 %v292_v2  ;;  %1301 = vmatpush.msrb.mxu1 %v343_v3  ;;  %v643_v2 = vld [vmem:[#allocation2 + $0x1130] sm:$0xff]  ;;  %v493_v3 = vld [vmem:[#allocation2 + $0xc80] sm:$0xff] }
  0xd6   :  { %1322 = vmatpush.msrb.mxu2 %v388_v4  ;;  %1341 = vmatpush.msrb.mxu3 %v439_v5  ;;  %v544_v4 = vld [vmem:[#allocation2 + $0xe18] sm:$0xff]  ;;  %v907_v5 = vadd.f32 %v906_v62, %v887_v59  ;;  %v703_v59 = vld [vmem:[#allocation2 + $0x1310] sm:$0xff]  ;;  %v850_v62 = vld [vmem:[#allocation2 + $0x17a8] sm:$0xff] }
  0xd7   :  { %1283 = vmatpush.msrb.mxu0 %v289_v6  ;;  %1302 = vmatpush.msrb.mxu1 %v340_v7  ;;  %v589_v6 = vld [vmem:[#allocation2 + $0xf80] sm:$0xff]  ;;  %v640_v7 = vld [vmem:[#allocation2 + $0x1118] sm:$0xff] }
  0xd8   :  { %1323 = vmatpush.msrb.mxu2 %v385_v8  ;;  %1342 = vmatpush.msrb.mxu3 %v436_v9  ;;  %v926_v8 = vpop.f32.mrf.mxu2  ;;  %v490_v9 = vld [vmem:[#allocation2 + $0xc68] sm:$0xff] }
  0xd9   :  { %1284 = vmatpush.msrb.mxu0 %v286_v10  ;;  %1303 = vmatpush.msrb.mxu1 %v337_v11  ;;  %v541_v10 = vld [vmem:[#allocation2 + $0xe00] sm:$0xff]  ;;  %v586_v11 = vld [vmem:[#allocation2 + $0xf68] sm:$0xff] }
  0xda   :  { %1324 = vmatpush.msrb.mxu2 %v382_v12  ;;  %1343 = vmatpush.msrb.mxu3 %v433_v13  ;;  %v637_v12 = vld [vmem:[#allocation2 + $0x1100] sm:$0xff]  ;;  %v487_v13 = vld [vmem:[#allocation2 + $0xc50] sm:$0xff] }
  0xdb   :  { %1205 = vmatmul.f32.vlgmr.msra.gmra.mxu0 %v1970_v18  ;;  %1245 = vmatmul.f32.vlgmr.msra.gmra.mxu2 %v1971_v19  ;;  %v946_v18 = vpop.f32.mrf.mxu3  ;;  %v484_v19 = vld [vmem:[#allocation2 + $0xc38] sm:$0xff] }
  0xdc   :  { %1349 = vmatpush.msra.mxu0 %v523_v14  ;;  %1389 = vmatpush.msra.mxu2 %v619_v15  ;;  %v538_v14 = vld [vmem:[#allocation2 + $0xde8] sm:$0xff]  ;;  %v927_v15 = vadd.f32 %v926_v8, %v907_v5  ;;  %v697_v5 = vld [vmem:[#allocation2 + $0x12e0] sm:$0xff] }
  0xdd   :  { %1304 = vmatpush.msrb.mxu1 %v334_v16  ;;  %1344 = vmatpush.msrb.mxu3 %v430_v17  ;;  %v583_v16 = vld [vmem:[#allocation2 + $0xf50] sm:$0xff]  ;;  %v634_v17 = vld [vmem:[#allocation2 + $0x10e8] sm:$0xff]  ;;  %v793_v8 = vld [vmem:[#allocation2 + $0x15e0] sm:$0xff] }
  0xde   :  { %1225 = vmatmul.f32.vlgmr.msra.gmra.mxu1 %v1972_v24  ;;  %1265 = vmatmul.f32.vlgmr.msra.gmra.mxu3 %v1973_v25  ;;  %v532_v24 = vld [vmem:[#allocation2 + $0xdb8] sm:$0xff]  ;;  %v947_v25 = vadd.f32 %v946_v18, %v927_v15 }
  0xdf   :  { %1350 = vmatpush.msra.mxu0 %v520_v20  ;;  %1369 = vmatpush.msra.mxu1 %v571_v21  ;;  %v535_v20 = vld [vmem:[#allocation2 + $0xdd0] sm:$0xff]  ;;  %v580_v21 = vld [vmem:[#allocation2 + $0xf38] sm:$0xff] }
  0xe0   :  { %1390 = vmatpush.msra.mxu2 %v616_v22  ;;  %1409 = vmatpush.msra.mxu3 %v667_v23  ;;  %v631_v22 = vld [vmem:[#allocation2 + $0x10d0] sm:$0xff]  ;;  %v481_v23 = vld [vmem:[#allocation2 + $0xc20] sm:$0xff] }
  0xe1   :  { %1351 = vmatpush.msra.mxu0 %v517_v26  ;;  %1370 = vmatpush.msra.mxu1 %v568_v27  ;;  %v577_v26 = vld [vmem:[#allocation2 + $0xf20] sm:$0xff]  ;;  %v628_v27 = vld [vmem:[#allocation2 + $0x10b8] sm:$0xff] }
  0xe2   :  { %1391 = vmatpush.msra.mxu2 %v613_v28  ;;  %1410 = vmatpush.msra.mxu3 %v664_v29  ;;  %v966_v28 = vpop.f32.mrf.mxu0  ;;  %v478_v29 = vld [vmem:[#allocation2 + $0xc08] sm:$0xff] }
  0xe3   :  { %1352 = vmatpush.msra.mxu0 %v514_v30  ;;  %1371 = vmatpush.msra.mxu1 %v565_v31  ;;  %v529_v30 = vld [vmem:[#allocation2 + $0xda0] sm:$0xff]  ;;  %v574_v31 = vld [vmem:[#allocation2 + $0xf08] sm:$0xff] }
  0xe4   :  { %1392 = vmatpush.msra.mxu2 %v610_v32  ;;  %1411 = vmatpush.msra.mxu3 %v661_v33  ;;  %v625_v32 = vld [vmem:[#allocation2 + $0x10a0] sm:$0xff]  ;;  %v967_v33 = vadd.f32 %v966_v28, %v947_v25  ;;  %v835_v25 = vld [vmem:[#allocation2 + $0x1730] sm:$0xff]  ;;  %v736_v28 = vld [vmem:[#allocation2 + $0x1418] sm:$0xff] }
  0xe5   :  { %1325 = vmatmul.f32.vlgmr.msrb.gmra.mxu2 %v1974_v38  ;;  %1353 = vmatpush.msra.mxu0 %v511_v34  ;;  %v715_v34 = vld [vmem:[#allocation2 + $0x1370] sm:$0xff]  ;;  %v622_v38 = vld [vmem:[#allocation2 + $0x1088] sm:$0xff] }
  0xe6   :  { %1372 = vmatpush.msra.mxu1 %v562_v35  ;;  %1393 = vmatpush.msra.mxu2 %v607_v36  ;;  %v811_v35 = vld [vmem:[#allocation2 + $0x1670] sm:$0xff]  ;;  %v986_v36 = vpop.f32.mrf.mxu1 }
  0xe7   :  { %1412 = vmatpush.msra.mxu3 %v658_v37  ;;  %1285 = vmatmul.f32.vlgmr.msrb.gmra.mxu0 %v1975_v43  ;;  %v526_v37 = vld [vmem:[#allocation2 + $0xd88] sm:$0xff]  ;;  %v987_v43 = vadd.f32 %v986_v36, %v967_v33  ;;  %v1829_v33 = vlaneseq  ;;  %v829_v36 = vld [vmem:[#allocation2 + $0x1700] sm:$0xff] }
  0xe8   :  { %1345 = vmatmul.f32.vlgmr.msrb.gmra.mxu3 %v1976_v45  ;;  %1354 = vmatpush.msra.mxu0 %v508_v39  ;;  %v1978_v39 = vld [vmem:[%s2351_s0 + $0x40] sm:$0xff]  ;;  %v859_v45 = vld [vmem:[#allocation2 + $0x17f0] sm:$0xff] }
  0xe9   :  { %1373 = vmatpush.msra.mxu1 %v559_v41  ;;  %1394 = vmatpush.msra.mxu2 %v604_v42  ;;  %v712_v41 = vld [vmem:[#allocation2 + $0x1358] sm:$0xff]  ;;  %v763_v42 = vld [vmem:[#allocation2 + $0x14f0] sm:$0xff] }
  0xea   :  { %1413 = vmatpush.msra.mxu3 %v655_v44  ;;  %1305 = vmatmul.f32.vlgmr.msrb.gmra.mxu1 %v1977_v52  ;;  %v808_v44 = vld [vmem:[#allocation2 + $0x1658] sm:$0xff] }
  0xeb   :  { %1355 = vmatpush.msra.mxu0 %v505_v46  ;;  %1374 = vmatpush.msra.mxu1 %v556_v47  ;;  %v1006_v46 = vpop.f32.mrf.mxu2  ;;  %v1980_v47 = vld [vmem:[%s2351_s0 + $0x48] sm:$0xff]  ;;  %v856_v52 = vld [vmem:[#allocation2 + $0x17d8] sm:$0xff] }
  0xec   :  { %1395 = vmatpush.msra.mxu2 %v601_v49  ;;  %1414 = vmatpush.msra.mxu3 %v652_v50  ;;  %v709_v49 = vld [vmem:[#allocation2 + $0x1340] sm:$0xff]  ;;  %v760_v50 = vld [vmem:[#allocation2 + $0x14d8] sm:$0xff] }
  0xed   :  { %1356 = vmatpush.msra.mxu0 %v502_v53  ;;  %1375 = vmatpush.msra.mxu1 %v553_v54  ;;  %v706_v53 = vld [vmem:[#allocation2 + $0x1328] sm:$0xff]  ;;  %v757_v54 = vld [vmem:[#allocation2 + $0x14c0] sm:$0xff] }
  0xee   :  { %1396 = vmatpush.msra.mxu2 %v598_v55  ;;  %1415 = vmatpush.msra.mxu3 %v649_v56  ;;  %v1007_v55 = vadd.f32 %v1006_v46, %v987_v43  ;;  %v802_v56 = vld [vmem:[#allocation2 + $0x1628] sm:$0xff]  ;;  %v676_v43 = vld [vmem:[#allocation2 + $0x1238] sm:$0xff] }
  0xef   :  { %1357 = vmatpush.msra.mxu0 %v499_v57  ;;  %1376 = vmatpush.msra.mxu1 %v550_v58  ;;  %v853_v57 = vld [vmem:[#allocation2 + $0x17c0] sm:$0xff]  ;;  %v1026_v58 = vpop.f32.mrf.mxu3  ;;  %v772_v46 = vld [vmem:[#allocation2 + $0x1538] sm:$0xff] }
  0xf0   :  { %1397 = vmatpush.msra.mxu2 %v595_v60  ;;  %1416 = vmatpush.msra.mxu3 %v646_v61  ;;  %v754_v60 = vld [vmem:[#allocation2 + $0x14a8] sm:$0xff]  ;;  %v799_v61 = vld [vmem:[#allocation2 + $0x1610] sm:$0xff] }
  0xf1   :  { %1358 = vmatpush.msra.mxu0 %v496_v63  ;;  %1377 = vmatpush.msra.mxu1 %v547_v0  ;;  %v700_v0 = vld [vmem:[#allocation2 + $0x12f8] sm:$0xff] }
  0xf2   :  { %1398 = vmatpush.msra.mxu2 %v592_v1  ;;  %1417 = vmatpush.msra.mxu3 %v643_v2  ;;  %v751_v1 = vld [vmem:[#allocation2 + $0x1490] sm:$0xff]  ;;  %v1027_v2 = vadd.f32 %v1026_v58, %v1007_v55  ;;  %v721_v55 = vld [vmem:[#allocation2 + $0x13a0] sm:$0xff] }
  0xf3   :  { %1359 = vmatpush.msra.mxu0 %v493_v3  ;;  %1378 = vmatpush.msra.mxu1 %v544_v4  ;;  %v796_v3 = vld [vmem:[#allocation2 + $0x15f8] sm:$0xff]  ;;  %v847_v4 = vld [vmem:[#allocation2 + $0x1790] sm:$0xff]  ;;  %v817_v58 = vld [vmem:[#allocation2 + $0x16a0] sm:$0xff] }
  0xf4   :  { %1399 = vmatpush.msra.mxu2 %v589_v6  ;;  %1418 = vmatpush.msra.mxu3 %v640_v7  ;;  %v1046_v63 = vpop.f32.mrf.mxu0  ;;  %v748_v6 = vld [vmem:[#allocation2 + $0x1478] sm:$0xff] }
  0xf5   :  { %1360 = vmatpush.msra.mxu0 %v490_v9  ;;  %1379 = vmatpush.msra.mxu1 %v541_v10  ;;  %v1047_v7 = vadd.f32 %v1046_v63, %v1027_v2  ;;  %v844_v9 = vld [vmem:[#allocation2 + $0x1778] sm:$0xff]  ;;  %v2111_v63 = vmov 0.0   ;;  %v814_v2 = vld [vmem:[#allocation2 + $0x1688] sm:$0xff] }
  0xf6   :  { %1400 = vmatpush.msra.mxu2 %v586_v11  ;;  %1419 = vmatpush.msra.mxu3 %v637_v12  ;;  %v694_v11 = vld [vmem:[#allocation2 + $0x12c8] sm:$0xff]  ;;  %v745_v12 = vld [vmem:[#allocation2 + $0x1460] sm:$0xff] }
  0xf7   :  { %1361 = vmatpush.msra.mxu0 %v487_v13  ;;  %1380 = vmatpush.msra.mxu1 %v538_v14  ;;  %v1066_v10 = vpop.f32.mrf.mxu1  ;;  %v790_v13 = vld [vmem:[#allocation2 + $0x15c8] sm:$0xff]  ;;  %v841_v14 = vld [vmem:[#allocation2 + $0x1760] sm:$0xff] }
  0xf8   :  { %1401 = vmatpush.msra.mxu2 %v583_v16  ;;  %1420 = vmatpush.msra.mxu3 %v634_v17  ;;  %v691_v16 = vld [vmem:[#allocation2 + $0x12b0] sm:$0xff]  ;;  %v742_v17 = vld [vmem:[#allocation2 + $0x1448] sm:$0xff]  ;;  %v1067_v18 = vadd.f32 %v1066_v10, %v1047_v7  ;;  %v188_v7 = vld [vmem:[#allocation2 + $0x2f8] sm:$0xff] }
  0xf9   :  { %1362 = vmatpush.msra.mxu0 %v484_v19  ;;  %1381 = vmatpush.msra.mxu1 %v535_v20  ;;  %v787_v19 = vld [vmem:[#allocation2 + $0x15b0] sm:$0xff]  ;;  %v838_v20 = vld [vmem:[#allocation2 + $0x1748] sm:$0xff]  ;;  %v284_v10 = vld [vmem:[#allocation2 + $0x5f8] sm:$0xff] }
  0xfa   :  { %1402 = vmatpush.msra.mxu2 %v580_v21  ;;  %1421 = vmatpush.msra.mxu3 %v631_v22  ;;  %v1086_v15 = vpop.f32.mrf.mxu2  ;;  %v688_v21 = vld [vmem:[#allocation2 + $0x1298] sm:$0xff]  ;;  %v739_v22 = vld [vmem:[#allocation2 + $0x1430] sm:$0xff] }
  0xfb   :  { %1363 = vmatpush.msra.mxu0 %v481_v23  ;;  %1382 = vmatpush.msra.mxu1 %v532_v24  ;;  %v1087_v23 = vadd.f32 %v1086_v15, %v1067_v18  ;;  %v784_v24 = vld [vmem:[#allocation2 + $0x1598] sm:$0xff]  ;;  %v131_v18 = vld [vmem:[#allocation2 + $0x130] sm:$0xff] }
  0xfc   :  { %1403 = vmatpush.msra.mxu2 %v577_v26  ;;  %1422 = vmatpush.msra.mxu3 %v628_v27  ;;  %v685_v27 = vld [vmem:[#allocation2 + $0x1280] sm:$0xff] }
  0xfd   :  { %1364 = vmatpush.msra.mxu0 %v478_v29  ;;  %1383 = vmatpush.msra.mxu1 %v529_v30  ;;  %v1106_v26 = vpop.f32.mrf.mxu3  ;;  %v781_v29 = vld [vmem:[#allocation2 + $0x1580] sm:$0xff]  ;;  %v832_v30 = vld [vmem:[#allocation2 + $0x1718] sm:$0xff] }
  0xfe   :  { %1404 = vmatpush.msra.mxu2 %v574_v31  ;;  %1423 = vmatpush.msra.mxu3 %v625_v32  ;;  %v682_v31 = vld [vmem:[#allocation2 + $0x1268] sm:$0xff]  ;;  %v733_v32 = vld [vmem:[#allocation2 + $0x1400] sm:$0xff] }
  0xff   :  { %1365 = vmatmul.f32.vlgmr.msra.gmra.mxu0 %v1978_v39  ;;  %1405 = vmatmul.f32.vlgmr.msra.gmra.mxu2 %v1979_v40  ;;  %v775_v40 = vld [vmem:[#allocation2 + $0x1550] sm:$0xff] }
 0x100   :  { %1429 = vmatpush.msrb.mxu0 %v715_v34  ;;  %1469 = vmatpush.msrb.mxu2 %v811_v35  ;;  %v1107_v34 = vadd.f32 %v1106_v26, %v1087_v23  ;;  %v778_v35 = vld [vmem:[#allocation2 + $0x1568] sm:$0xff]  ;;  %v128_v23 = vld [vmem:[#allocation2 + $0x118] sm:$0xff] }
 0x101   :  { %1384 = vmatpush.msra.mxu1 %v526_v37  ;;  %1424 = vmatpush.msra.mxu3 %v622_v38  ;;  %v679_v37 = vld [vmem:[#allocation2 + $0x1250] sm:$0xff]  ;;  %v730_v38 = vld [vmem:[#allocation2 + $0x13e8] sm:$0xff]  ;;  %v224_v26 = vld [vmem:[#allocation2 + $0x418] sm:$0xff] }
 0x102   :  { %1385 = vmatmul.f32.vlgmr.msra.gmra.mxu1 %v1980_v47  ;;  %1425 = vmatmul.f32.vlgmr.msra.gmra.mxu3 %v1981_v48  ;;  %v823_v47 = vld [vmem:[#allocation2 + $0x16d0] sm:$0xff] }
 0x103   :  { %1430 = vmatpush.msrb.mxu0 %v712_v41  ;;  %1449 = vmatpush.msrb.mxu1 %v763_v42  ;;  %v826_v41 = vld [vmem:[#allocation2 + $0x16e8] sm:$0xff] }
 0x104   :  { %1470 = vmatpush.msrb.mxu2 %v808_v44  ;;  %1489 = vmatpush.msrb.mxu3 %v859_v45  ;;  %v727_v44 = vld [vmem:[#allocation2 + $0x13d0] sm:$0xff]  ;;  %v1830_v45 = vshrl.u32 %v1829_v33, 7 }
 0x105   :  { %1431 = vmatpush.msrb.mxu0 %v709_v49  ;;  %1450 = vmatpush.msrb.mxu1 %v760_v50  ;;  %v673_v49 = vld [vmem:[#allocation2 + $0x1220] sm:$0xff]  ;;  %v724_v50 = vld [vmem:[#allocation2 + $0x13b8] sm:$0xff] }
 0x106   :  { %1471 = vmatpush.msrb.mxu2 %v805_v51  ;;  %1490 = vmatpush.msrb.mxu3 %v856_v52  ;;  %v769_v51 = vld [vmem:[#allocation2 + $0x1520] sm:$0xff]  ;;  %v820_v52 = vld [vmem:[#allocation2 + $0x16b8] sm:$0xff]  ;;  %vm1831_vm0 = vcmp.lt.s32.totalorder %v1830_v45, 2  ;;  %v167_v45 = vld [vmem:[#allocation2 + $0x250] sm:$0xff] }
 0x107   :  { %1432 = vmatpush.msrb.mxu0 %v706_v53  ;;  %1451 = vmatpush.msrb.mxu1 %v757_v54  ;;  %v670_v54 = vld [vmem:[#allocation2 + $0x1208] sm:$0xff] }
 0x108   :  { %1472 = vmatpush.msrb.mxu2 %v802_v56  ;;  %1491 = vmatpush.msrb.mxu3 %v853_v57  ;;  %v766_v57 = vld [vmem:[#allocation2 + $0x1508] sm:$0xff] }
 0x109   :  { %1433 = vmatpush.msrb.mxu0 %v703_v59  ;;  %1452 = vmatpush.msrb.mxu1 %v754_v60  ;;  %v140_v60 = vld [vmem:[#allocation2 + $0x178] sm:$0xff] }
 0x10a   :  { %1473 = vmatpush.msrb.mxu2 %v799_v61  ;;  %1492 = vmatpush.msrb.mxu3 %v850_v62  ;;  %v236_v61 = vld [vmem:[#allocation2 + $0x478] sm:$0xff] }
 0x10b   :  { %1434 = vmatpush.msrb.mxu0 %v700_v0  ;;  %1453 = vmatpush.msrb.mxu1 %v751_v1  ;;  %v2238_v0 = vsel %vm1831_vm0, 1.0, %v2111_v63  ;;  %v718_v1 = vld [vmem:[#allocation2 + $0x1388] sm:$0xff] }
 0x10c   :  { %1474 = vmatpush.msrb.mxu2 %v796_v3  ;;  %1493 = vmatpush.msrb.mxu3 %v847_v4  ;;  %v1982_v4 = vld [vmem:[%s2351_s0 + $0x60] sm:$0xff] }
 0x10d   :  { %1435 = vmatpush.msrb.mxu0 %v697_v5  ;;  %1454 = vmatpush.msrb.mxu1 %v748_v6  ;;  %v1983_v5 = vld [vmem:[%s2351_s0 + $0x70] sm:$0xff]  ;;  %v137_v6 = vld [vmem:[#allocation2 + $0x160] sm:$0xff] }
 0x10e   :  { %1475 = vmatpush.msrb.mxu2 %v793_v8  ;;  %1494 = vmatpush.msrb.mxu3 %v844_v9  ;;  %v233_v9 = vld [vmem:[#allocation2 + $0x460] sm:$0xff] }
 0x10f   :  { %1436 = vmatpush.msrb.mxu0 %v694_v11  ;;  %1455 = vmatpush.msrb.mxu1 %v745_v12  ;;  %v1984_v11 = vld [vmem:[%s2351_s0 + $0x68] sm:$0xff]  ;;  %v1985_v12 = vld [vmem:[%s2351_s0 + $0x78] sm:$0xff] }
 0x110   :  { %1476 = vmatpush.msrb.mxu2 %v790_v13  ;;  %1495 = vmatpush.msrb.mxu3 %v841_v14  ;;  %v134_v13 = vld [vmem:[#allocation2 + $0x148] sm:$0xff]  ;;  %v185_v14 = vld [vmem:[#allocation2 + $0x2e0] sm:$0xff] }
 0x111   :  { %1437 = vmatpush.msrb.mxu0 %v691_v16  ;;  %1456 = vmatpush.msrb.mxu1 %v742_v17  ;;  %v230_v16 = vld [vmem:[#allocation2 + $0x448] sm:$0xff]  ;;  %v281_v17 = vld [vmem:[#allocation2 + $0x5e0] sm:$0xff] }
 0x112   :  { %1477 = vmatpush.msrb.mxu2 %v787_v19  ;;  %1496 = vmatpush.msrb.mxu3 %v838_v20  ;;  %v182_v19 = vld [vmem:[#allocation2 + $0x2c8] sm:$0xff] }
 0x113   :  { %1438 = vmatpush.msrb.mxu0 %v688_v21  ;;  %1457 = vmatpush.msrb.mxu1 %v739_v22  ;;  %v227_v21 = vld [vmem:[#allocation2 + $0x430] sm:$0xff]  ;;  %v278_v22 = vld [vmem:[#allocation2 + $0x5c8] sm:$0xff] }
 0x114   :  { %1478 = vmatpush.msrb.mxu2 %v784_v24  ;;  %1497 = vmatpush.msrb.mxu3 %v835_v25  ;;  %v179_v24 = vld [vmem:[#allocation2 + $0x2b0] sm:$0xff] }
 0x115   :  { %1439 = vmatpush.msrb.mxu0 %v685_v27  ;;  %1458 = vmatpush.msrb.mxu1 %v736_v28  ;;  %v275_v27 = vld [vmem:[#allocation2 + $0x5b0] sm:$0xff] }
 0x116   :  { %1479 = vmatpush.msrb.mxu2 %v781_v29  ;;  %1498 = vmatpush.msrb.mxu3 %v832_v30  ;;  %v1126_v39 = vpop.f32.mrf.mxu0  ;;  %v125_v29 = vld [vmem:[#allocation2 + $0x100] sm:$0xff]  ;;  %v176_v30 = vld [vmem:[#allocation2 + $0x298] sm:$0xff] }
 0x117   :  { %1440 = vmatpush.msrb.mxu0 %v682_v31  ;;  %1459 = vmatpush.msrb.mxu1 %v733_v32  ;;  %v1127_v42 = vadd.f32 %v1126_v39, %v1107_v34  ;;  %v221_v31 = vld [vmem:[#allocation2 + $0x400] sm:$0xff]  ;;  %v272_v32 = vld [vmem:[#allocation2 + $0x598] sm:$0xff]  ;;  %v122_v34 = vld [vmem:[#allocation2 + $0xe8] sm:$0xff] }
 0x118   :  { %1480 = vmatpush.msrb.mxu2 %v778_v35  ;;  %1499 = vmatpush.msrb.mxu3 %v829_v36  ;;  %v173_v35 = vld [vmem:[#allocation2 + $0x280] sm:$0xff]  ;;  %v218_v36 = vld [vmem:[#allocation2 + $0x3e8] sm:$0xff]  ;;  %v119_v39 = vld [vmem:[#allocation2 + $0xd0] sm:$0xff] }
 0x119   :  { %1441 = vmatpush.msrb.mxu0 %v679_v37  ;;  %1460 = vmatpush.msrb.mxu1 %v730_v38  ;;  %v1146_v48 = vpop.f32.mrf.mxu1  ;;  %v269_v37 = vld [vmem:[#allocation2 + $0x580] sm:$0xff] }
 0x11a   :  { %1481 = vmatpush.msrb.mxu2 %v775_v40  ;;  %1500 = vmatpush.msrb.mxu3 %v826_v41  ;;  %v1147_v53 = vadd.f32 %v1146_v48, %v1127_v42  ;;  %v170_v40 = vld [vmem:[#allocation2 + $0x268] sm:$0xff]  ;;  %v215_v41 = vld [vmem:[#allocation2 + $0x3d0] sm:$0xff] }
 0x11b   :  { %1442 = vmatpush.msrb.mxu0 %v676_v43  ;;  %1461 = vmatpush.msrb.mxu1 %v727_v44  ;;  %v266_v42 = vld [vmem:[#allocation2 + $0x568] sm:$0xff]  ;;  %v116_v44 = vld [vmem:[#allocation2 + $0xb8] sm:$0xff] }
 0x11c   :  { %1482 = vmatpush.msrb.mxu2 %v772_v46  ;;  %1501 = vmatpush.msrb.mxu3 %v823_v47  ;;  %v1166_v56 = vpop.f32.mrf.mxu2  ;;  %v212_v46 = vld [vmem:[#allocation2 + $0x3b8] sm:$0xff]  ;;  %v263_v47 = vld [vmem:[#allocation2 + $0x550] sm:$0xff] }
 0x11d   :  { %1443 = vmatpush.msrb.mxu0 %v673_v49  ;;  %1462 = vmatpush.msrb.mxu1 %v724_v50  ;;  %v1167_v59 = vadd.f32 %v1166_v56, %v1147_v53  ;;  %v113_v49 = vld [vmem:[#allocation2 + $0xa0] sm:$0xff]  ;;  %v164_v50 = vld [vmem:[#allocation2 + $0x238] sm:$0xff]  ;;  %v206_v56 = vld [vmem:[#allocation2 + $0x388] sm:$0xff] }
 0x11e   :  { %1483 = vmatpush.msrb.mxu2 %v769_v51  ;;  %1502 = vmatpush.msrb.mxu3 %v820_v52  ;;  %v209_v51 = vld [vmem:[#allocation2 + $0x3a0] sm:$0xff]  ;;  %v260_v52 = vld [vmem:[#allocation2 + $0x538] sm:$0xff] }
 0x11f   :  { %1444 = vmatpush.msrb.mxu0 %v670_v54  ;;  %1463 = vmatpush.msrb.mxu1 %v721_v55  ;;  %v1186_v62 = vpop.f32.mrf.mxu3  ;;  %v110_v54 = vld [vmem:[#allocation2 + $0x88] sm:$0xff]  ;;  %v161_v55 = vld [vmem:[#allocation2 + $0x220] sm:$0xff] }
 0x120   :  { %1484 = vmatpush.msrb.mxu2 %v766_v57  ;;  %1503 = vmatpush.msrb.mxu3 %v817_v58  ;;  %v2240_v3 = vadd.f32 %v1186_v62, %v1167_v59  ;;  %v257_v57 = vld [vmem:[#allocation2 + $0x520] sm:$0xff]  ;;  %v107_v59 = vld [vmem:[#allocation2 + $0x70] sm:$0xff]  ;;  %v254_v62 = vld [vmem:[#allocation2 + $0x508] sm:$0xff] }
 0x121   :  { %1445 = vmatmul.f32.vlgmr.msrb.gmra.mxu0 %v1982_v4  ;;  %1485 = vmatmul.f32.vlgmr.msrb.gmra.mxu2 %v1983_v5  ;;  %v251_v4 = vld [vmem:[#allocation2 + $0x4f0] sm:$0xff] }
 0x122   :  { %1509 = vmatpush.msra.mxu0 %v140_v60  ;;  %1549 = vmatpush.msra.mxu2 %v236_v61  ;;  %v1834_v8 = vmul.f32 %v2238_v0, %v2240_v3  ;;  %v158_v60 = vld [vmem:[#allocation2 + $0x208] sm:$0xff]  ;;  %v203_v61 = vld [vmem:[#allocation2 + $0x370] sm:$0xff] }
 0x123   :  { %1464 = vmatpush.msrb.mxu1 %v718_v1  ;;  %1504 = vmatpush.msrb.mxu3 %v814_v2  ;;  %v104_v1 = vld [vmem:[#allocation2 + $0x58] sm:$0xff]  ;;  %v155_v2 = vld [vmem:[#allocation2 + $0x1f0] sm:$0xff] }
 0x124   :  { %1465 = vmatmul.f32.vlgmr.msrb.gmra.mxu1 %v1984_v11  ;;  %1505 = vmatmul.f32.vlgmr.msrb.gmra.mxu3 %v1985_v12  ;;  %v1837_v15 = vrot.slane %v1834_v8, 4  ;;  %v98_v11 = vld [vmem:[#allocation2 + $0x28] sm:$0xff]  ;;  %v149_v12 = vld [vmem:[#allocation2 + $0x1c0] sm:$0xff] }
 0x125   :  { %1510 = vmatpush.msra.mxu0 %v137_v6  ;;  %1529 = vmatpush.msra.mxu1 %v188_v7  ;;  %v101_v6 = vld [vmem:[#allocation2 + $0x40] sm:$0xff]  ;;  %v152_v7 = vld [vmem:[#allocation2 + $0x1d8] sm:$0xff] }
 0x126   :  { %1550 = vmatpush.msra.mxu2 %v233_v9  ;;  %1569 = vmatpush.msra.mxu3 %v284_v10  ;;  %v1838_v20 = vadd.f32 %v1837_v15, %v1834_v8  ;;  %v197_v8 = vld [vmem:[#allocation2 + $0x340] sm:$0xff]  ;;  %v248_v9 = vld [vmem:[#allocation2 + $0x4d8] sm:$0xff] }
 0x127   :  { %1511 = vmatpush.msra.mxu0 %v134_v13  ;;  %1530 = vmatpush.msra.mxu1 %v185_v14  ;;  %v194_v13 = vld [vmem:[#allocation2 + $0x328] sm:$0xff]  ;;  %v245_v14 = vld [vmem:[#allocation2 + $0x4c0] sm:$0xff] }
 0x128   :  { %1551 = vmatpush.msra.mxu2 %v230_v16  ;;  %1570 = vmatpush.msra.mxu3 %v281_v17  ;;  %v1839_v25 = vrot.slane %v1838_v20, 2  ;;  %v95_v16 = vld [vmem:[#allocation2 + $0x10] sm:$0xff]  ;;  %v146_v17 = vld [vmem:[#allocation2 + $0x1a8] sm:$0xff] }
 0x129   :  { %1512 = vmatpush.msra.mxu0 %v131_v18  ;;  %1531 = vmatpush.msra.mxu1 %v182_v19  ;;  %v191_v18 = vld [vmem:[#allocation2 + $0x310] sm:$0xff]  ;;  %v242_v19 = vld [vmem:[#allocation2 + $0x4a8] sm:$0xff] }
 0x12a   :  { %1552 = vmatpush.msra.mxu2 %v227_v21  ;;  %1571 = vmatpush.msra.mxu3 %v278_v22  ;;  %v1840_v28 = vadd.f32 %v1839_v25, %v1838_v20  ;;  %v332_v21 = vld [vmem:[#allocation2 + $0x778] sm:$0xff] }
 0x12b   :  { %1513 = vmatpush.msra.mxu0 %v128_v23  ;;  %1532 = vmatpush.msra.mxu1 %v179_v24  ;;  %v428_v22 = vld [vmem:[#allocation2 + $0xa78] sm:$0xff]  ;;  %v143_v23 = vld [vmem:[#allocation2 + $0x190] sm:$0xff] }
 0x12c   :  { %1553 = vmatpush.msra.mxu2 %v224_v26  ;;  %1572 = vmatpush.msra.mxu3 %v275_v27  ;;  %v1841_v33 = vrot.slane %v1840_v28, 1  ;;  %v239_v24 = vld [vmem:[#allocation2 + $0x490] sm:$0xff]  ;;  %v329_v26 = vld [vmem:[#allocation2 + $0x760] sm:$0xff]  ;;  %v380_v27 = vld [vmem:[#allocation2 + $0x8f8] sm:$0xff] }
 0x12d   :  { %1514 = vmatpush.msra.mxu0 %v125_v29  ;;  %1533 = vmatpush.msra.mxu1 %v176_v30  ;;  %v476_v29 = vld [vmem:[#allocation2 + $0xbf8] sm:$0xff] }
 0x12e   :  { %v1842_v38 = vadd.f32 %v1841_v33, %v1840_v28  ;;  %1554 = vmatpush.msra.mxu2 %v221_v31  ;;  %1573 = vmatpush.msra.mxu3 %v272_v32  ;;  %v425_v28 = vld [vmem:[#allocation2 + $0xa60] sm:$0xff]  ;;  %v326_v31 = vld [vmem:[#allocation2 + $0x748] sm:$0xff] }
 0x12f   :  { %1515 = vmatpush.msra.mxu0 %v122_v34  ;;  %1534 = vmatpush.msra.mxu1 %v173_v35  ;;  %v377_v32 = vld [vmem:[#allocation2 + $0x8e0] sm:$0xff]  ;;  %v422_v33 = vld [vmem:[#allocation2 + $0xa48] sm:$0xff] }
 0x130   :  { %v1855_v43 = vmul.f32 0.5, %v1842_v38  ;;  %1555 = vmatpush.msra.mxu2 %v218_v36  ;;  %1574 = vmatpush.msra.mxu3 %v269_v37  ;;  %v473_v34 = vld [vmem:[#allocation2 + $0xbe0] sm:$0xff]  ;;  %v323_v36 = vld [vmem:[#allocation2 + $0x730] sm:$0xff]  ;;  %v374_v37 = vld [vmem:[#allocation2 + $0x8c8] sm:$0xff] }
 0x131   :  { %1516 = vmatpush.msra.mxu0 %v119_v39  ;;  %1535 = vmatpush.msra.mxu1 %v170_v40  ;;  %v419_v38 = vld [vmem:[#allocation2 + $0xa30] sm:$0xff]  ;;  %v470_v39 = vld [vmem:[#allocation2 + $0xbc8] sm:$0xff]  ;;  %v320_v40 = vld [vmem:[#allocation2 + $0x718] sm:$0xff] }
 0x132   :  { %v2257_v48 = vsub.f32 %v2240_v3, %v1855_v43  ;;  %1556 = vmatpush.msra.mxu2 %v215_v41  ;;  %1575 = vmatpush.msra.mxu3 %v266_v42  ;;  %v200_v3 = vld [vmem:[#allocation2 + $0x358] sm:$0xff]  ;;  %v371_v41 = vld [vmem:[#allocation2 + $0x8b0] sm:$0xff] }
 0x133   :  { %1517 = vmatpush.msra.mxu0 %v116_v44  ;;  %1536 = vmatpush.msra.mxu1 %v167_v45  ;;  %v416_v42 = vld [vmem:[#allocation2 + $0xa18] sm:$0xff]  ;;  %v467_v43 = vld [vmem:[#allocation2 + $0xbb0] sm:$0xff]  ;;  %v317_v44 = vld [vmem:[#allocation2 + $0x700] sm:$0xff] }
 0x134   :  { %v1861_v53 = vmul.f32 %v2238_v0, %v2257_v48  ;;  %1557 = vmatpush.msra.mxu2 %v212_v46  ;;  %1576 = vmatpush.msra.mxu3 %v263_v47  ;;  %v368_v45 = vld [vmem:[#allocation2 + $0x898] sm:$0xff]  ;;  %v413_v46 = vld [vmem:[#allocation2 + $0xa00] sm:$0xff] }
 0x135   :  { %1518 = vmatpush.msra.mxu0 %v113_v49  ;;  %1537 = vmatpush.msra.mxu1 %v164_v50  ;;  %v464_v47 = vld [vmem:[#allocation2 + $0xb98] sm:$0xff]  ;;  %v314_v49 = vld [vmem:[#allocation2 + $0x6e8] sm:$0xff]  ;;  %v365_v50 = vld [vmem:[#allocation2 + $0x880] sm:$0xff] }
 0x136   :  { %v1864_v58 = vmul.f32 %v1861_v53, %v1861_v53  ;;  %1558 = vmatpush.msra.mxu2 %v209_v51  ;;  %1577 = vmatpush.msra.mxu3 %v260_v52  ;;  %v410_v51 = vld [vmem:[#allocation2 + $0x9e8] sm:$0xff]  ;;  %v461_v52 = vld [vmem:[#allocation2 + $0xb80] sm:$0xff] }
 0x137   :  { %1519 = vmatpush.msra.mxu0 %v110_v54  ;;  %1538 = vmatpush.msra.mxu1 %v161_v55  ;;  %v311_v54 = vld [vmem:[#allocation2 + $0x6d0] sm:$0xff]  ;;  %v362_v55 = vld [vmem:[#allocation2 + $0x868] sm:$0xff] }
 0x138   :  { %v1867_v63 = vrot.slane %v1864_v58, 4  ;;  %1559 = vmatpush.msra.mxu2 %v206_v56  ;;  %1578 = vmatpush.msra.mxu3 %v257_v57  ;;  %v407_v57 = vld [vmem:[#allocation2 + $0x9d0] sm:$0xff] }
 0x139   :  { %1520 = vmatpush.msra.mxu0 %v107_v59  ;;  %1539 = vmatpush.msra.mxu1 %v158_v60  ;;  %v308_v59 = vld [vmem:[#allocation2 + $0x6b8] sm:$0xff]  ;;  %v359_v60 = vld [vmem:[#allocation2 + $0x850] sm:$0xff] }
 0x13a   :  { %v1868_v5 = vadd.f32 %v1867_v63, %v1864_v58  ;;  %1560 = vmatpush.msra.mxu2 %v203_v61  ;;  %1579 = vmatpush.msra.mxu3 %v254_v62  ;;  %v458_v58 = vld [vmem:[#allocation2 + $0xb68] sm:$0xff]  ;;  %v2269_v62 = vld [vmem:[#allocation6] sm:$0x7]  ;;  %v404_v63 = vld [vmem:[#allocation2 + $0x9b8] sm:$0xff] }
 0x13b   :  { %1521 = vmatpush.msra.mxu0 %v104_v1  ;;  %1540 = vmatpush.msra.mxu1 %v155_v2  ;;  %v455_v1 = vld [vmem:[#allocation2 + $0xb50] sm:$0xff]  ;;  %v305_v2 = vld [vmem:[#allocation2 + $0x6a0] sm:$0xff] }
 0x13c   :  { %v1869_v10 = vrot.slane %v1868_v5, 2  ;;  %1561 = vmatpush.msra.mxu2 %v200_v3  ;;  %1580 = vmatpush.msra.mxu3 %v251_v4  ;;  %v356_v3 = vld [vmem:[#allocation2 + $0x838] sm:$0xff] }
 0x13d   :  { %1522 = vmatpush.msra.mxu0 %v101_v6  ;;  %1541 = vmatpush.msra.mxu1 %v152_v7  ;;  %v452_v6 = vld [vmem:[#allocation2 + $0xb38] sm:$0xff]  ;;  %v1923_v7 = vperm.slane %v2269_v62, 0 }
 0x13e   :  { %v1870_v15 = vadd.f32 %v1869_v10, %v1868_v5  ;;  %1562 = vmatpush.msra.mxu2 %v197_v8  ;;  %1581 = vmatpush.msra.mxu3 %v248_v9  ;;  %v401_v5 = vld [vmem:[#allocation2 + $0x9a0] sm:$0xff]  ;;  %v302_v8 = vld [vmem:[#allocation2 + $0x688] sm:$0xff] }
 0x13f   :  { %1523 = vmatpush.msra.mxu0 %v98_v11  ;;  %1542 = vmatpush.msra.mxu1 %v149_v12  ;;  %v353_v9 = vld [vmem:[#allocation2 + $0x820] sm:$0xff]  ;;  %v2273_v11 = vld [vmem:[#allocation7] sm:$0x7] }
 0x140   :  { %v1871_v20 = vrot.slane %v1870_v15, 1  ;;  %1563 = vmatpush.msra.mxu2 %v194_v13  ;;  %1582 = vmatpush.msra.mxu3 %v245_v14  ;;  %v398_v12 = vld [vmem:[#allocation2 + $0x988] sm:$0xff]  ;;  %v449_v13 = vld [vmem:[#allocation2 + $0xb20] sm:$0xff]  ;;  %v299_v14 = vld [vmem:[#allocation2 + $0x670] sm:$0xff] }
 0x141   :  { %1524 = vmatpush.msra.mxu0 %v95_v16  ;;  %1543 = vmatpush.msra.mxu1 %v146_v17  ;;  %v395_v17 = vld [vmem:[#allocation2 + $0x970] sm:$0xff] }
 0x142   :  { %v1872_v25 = vadd.f32 %v1871_v20, %v1870_v15  ;;  %1564 = vmatpush.msra.mxu2 %v191_v18  ;;  %1583 = vmatpush.msra.mxu3 %v242_v19  ;;  %v350_v15 = vld [vmem:[#allocation2 + $0x808] sm:$0xff]  ;;  %v1929_v19 = vmul.f32 %v1923_v7, %v2257_v48  ;;  %v1937_v20 = vperm.slane %v2273_v11, 0  ;;  %v389_v48 = vld [vmem:[#allocation2 + $0x940] sm:$0xff]  ;;  %v656_v7 = vld [vmem:[#allocation2 + $0x1198] sm:$0xff] }
 0x143   :  { %1589 = vmatpush.msrb.mxu0 %v332_v21  ;;  %1544 = vmatpush.msra.mxu1 %v143_v23  ;;  %v446_v18 = vld [vmem:[#allocation2 + $0xb08] sm:$0xff]  ;;  %v296_v21 = vld [vmem:[#allocation2 + $0x658] sm:$0xff] }
 0x144   :  { %1629 = vmatpush.msrb.mxu2 %v428_v22  ;;  %v1885_v30 = vmul.f32 0.5, %v1872_v25  ;;  %1584 = vmatpush.msra.mxu3 %v239_v24  ;;  %v347_v22 = vld [vmem:[#allocation2 + $0x7f0] sm:$0xff]  ;;  %v392_v24 = vld [vmem:[#allocation2 + $0x958] sm:$0xff] }
 0x145   :  { %1590 = vmatpush.msrb.mxu0 %v329_v26  ;;  %1609 = vmatpush.msrb.mxu1 %v380_v27  ;;  %v443_v25 = vld [vmem:[#allocation2 + $0xaf0] sm:$0xff]  ;;  %v293_v27 = vld [vmem:[#allocation2 + $0x640] sm:$0xff] }
 0x146   :  { %v2261_v35 = vadd.f32 1e-05, %v1885_v30  ;;  %1630 = vmatpush.msrb.mxu2 %v425_v28  ;;  %1649 = vmatpush.msrb.mxu3 %v476_v29  ;;  %v344_v28 = vld [vmem:[#allocation2 + $0x7d8] sm:$0xff] }
 0x147   :  { %1591 = vmatpush.msrb.mxu0 %v326_v31  ;;  %1610 = vmatpush.msrb.mxu1 %v377_v32  ;;  %v440_v29 = vld [vmem:[#allocation2 + $0xad8] sm:$0xff]  ;;  %v290_v31 = vld [vmem:[#allocation2 + $0x628] sm:$0xff]  ;;  %v341_v32 = vld [vmem:[#allocation2 + $0x7c0] sm:$0xff] }
 0x148   :  { %1964 = vrsqrt.f32 %v2261_v35  ;;  %1631 = vmatpush.msrb.mxu2 %v422_v33  ;;  %1650 = vmatpush.msrb.mxu3 %v473_v34  ;;  %vm1897_vm2 = vweird.f32 %v2261_v35  ;;  %v386_v33 = vld [vmem:[#allocation2 + $0x928] sm:$0xff]  ;;  %v437_v34 = vld [vmem:[#allocation2 + $0xac0] sm:$0xff] }
 0x149   :  { %1592 = vmatpush.msrb.mxu0 %v323_v36  ;;  %1611 = vmatpush.msrb.mxu1 %v374_v37  ;;  %v338_v36 = vld [vmem:[#allocation2 + $0x7a8] sm:$0xff]  ;;  %v383_v37 = vld [vmem:[#allocation2 + $0x910] sm:$0xff] }
 0x14a   :  { %1632 = vmatpush.msrb.mxu2 %v419_v38  ;;  %1651 = vmatpush.msrb.mxu3 %v470_v39  ;;  %v434_v38 = vld [vmem:[#allocation2 + $0xaa8] sm:$0xff]  ;;  %v524_v39 = vld [vmem:[#allocation2 + $0xd78] sm:$0xff] }
 0x14b   :  { %1593 = vmatpush.msrb.mxu0 %v320_v40  ;;  %1612 = vmatpush.msrb.mxu1 %v371_v41  ;;  %v620_v40 = vld [vmem:[#allocation2 + $0x1078] sm:$0xff]  ;;  %v335_v41 = vld [vmem:[#allocation2 + $0x790] sm:$0xff] }
 0x14c   :  { %1633 = vmatpush.msrb.mxu2 %v416_v42  ;;  %1652 = vmatpush.msrb.mxu3 %v467_v43  ;;  %v431_v42 = vld [vmem:[#allocation2 + $0xa90] sm:$0xff]  ;;  %v1986_v43 = vld [vmem:[%s2351_s0] sm:$0xff] }
 0x14d   :  { %1594 = vmatpush.msrb.mxu0 %v317_v44  ;;  %1613 = vmatpush.msrb.mxu1 %v368_v45  ;;  %v1987_v44 = vld [vmem:[%s2351_s0 + $0x10] sm:$0xff]  ;;  %v521_v45 = vld [vmem:[#allocation2 + $0xd60] sm:$0xff] }
 0x14e   :  { %v2264_v53 = vpop.eup %1964  ;;  %1634 = vmatpush.msrb.mxu2 %v413_v46  ;;  %1653 = vmatpush.msrb.mxu3 %v464_v47  ;;  %v572_v46 = vld [vmem:[#allocation2 + $0xef8] sm:$0xff]  ;;  %v617_v47 = vld [vmem:[#allocation2 + $0x1060] sm:$0xff] }
 0x14f   :  { %v1892_v56 = vmul.f32 %v2264_v53, %v2261_v35  ;;  %1595 = vmatpush.msrb.mxu0 %v314_v49  ;;  %1614 = vmatpush.msrb.mxu1 %v365_v50  ;;  %vm1898_vm1 = vweird.f32 %v2264_v53  ;;  %v287_v35 = vld [vmem:[#allocation2 + $0x610] sm:$0xff]  ;;  %v668_v49 = vld [vmem:[#allocation2 + $0x11f8] sm:$0xff]  ;;  %v1988_v50 = vld [vmem:[%s2351_s0 + $0x8] sm:$0xff] }
 0x150   :  { %1635 = vmatpush.msrb.mxu2 %v410_v51  ;;  %1654 = vmatpush.msrb.mxu3 %v461_v52  ;;  %vm1899_vm3 = vmor %vm1897_vm2, %vm1898_vm1  ;;  %v1989_v51 = vld [vmem:[%s2351_s0 + $0x18] sm:$0xff]  ;;  %v518_v52 = vld [vmem:[#allocation2 + $0xd48] sm:$0xff] }
 0x151   :  { %v1893_v61 = vmul.f32 %v2264_v53, %v1892_v56  ;;  %1596 = vmatpush.msrb.mxu0 %v311_v54  ;;  %1615 = vmatpush.msrb.mxu1 %v362_v55  ;;  %v614_v54 = vld [vmem:[#allocation2 + $0x1048] sm:$0xff]  ;;  %v665_v55 = vld [vmem:[#allocation2 + $0x11e0] sm:$0xff]  ;;  %v515_v56 = vld [vmem:[#allocation2 + $0xd30] sm:$0xff] }
 0x152   :  { %1636 = vmatpush.msrb.mxu2 %v407_v57  ;;  %1655 = vmatpush.msrb.mxu3 %v458_v58  ;;  %v566_v57 = vld [vmem:[#allocation2 + $0xec8] sm:$0xff]  ;;  %v611_v58 = vld [vmem:[#allocation2 + $0x1030] sm:$0xff] }
 0x153   :  { %v1894_v4 = vmul.f32 0.5, %v1893_v61  ;;  %1597 = vmatpush.msrb.mxu0 %v308_v59  ;;  %1616 = vmatpush.msrb.mxu1 %v359_v60  ;;  %v662_v59 = vld [vmem:[#allocation2 + $0x11c8] sm:$0xff]  ;;  %v512_v60 = vld [vmem:[#allocation2 + $0xd18] sm:$0xff]  ;;  %v563_v61 = vld [vmem:[#allocation2 + $0xeb0] sm:$0xff] }
 0x154   :  { %1637 = vmatpush.msrb.mxu2 %v404_v63  ;;  %1656 = vmatpush.msrb.mxu3 %v455_v1  ;;  %v608_v63 = vld [vmem:[#allocation2 + $0x1018] sm:$0xff]  ;;  %v659_v1 = vld [vmem:[#allocation2 + $0x11b0] sm:$0xff] }
 0x155   :  { %v1895_v10 = vsub.f32 1.5, %v1894_v4  ;;  %1598 = vmatpush.msrb.mxu0 %v305_v2  ;;  %1617 = vmatpush.msrb.mxu1 %v356_v3  ;;  %v1990_v2 = vld [vmem:[%s2351_s0 + $0x30] sm:$0xff]  ;;  %v509_v3 = vld [vmem:[#allocation2 + $0xd00] sm:$0xff]  ;;  %v560_v4 = vld [vmem:[#allocation2 + $0xe98] sm:$0xff] }
 0x156   :  { %1638 = vmatpush.msrb.mxu2 %v401_v5  ;;  %1657 = vmatpush.msrb.mxu3 %v452_v6  ;;  %v605_v5 = vld [vmem:[#allocation2 + $0x1000] sm:$0xff] }
 0x157   :  { %v1896_v16 = vmul.f32 %v2264_v53, %v1895_v10  ;;  %1599 = vmatpush.msrb.mxu0 %v302_v8  ;;  %1618 = vmatpush.msrb.mxu1 %v353_v9  ;;  %v1991_v6 = vld [vmem:[%s2351_s0 + $0x20] sm:$0xff]  ;;  %v1992_v8 = vld [vmem:[%s2351_s0 + $0x38] sm:$0xff]  ;;  %v506_v9 = vld [vmem:[#allocation2 + $0xce8] sm:$0xff] }
 0x158   :  { %1639 = vmatpush.msrb.mxu2 %v398_v12  ;;  %1658 = vmatpush.msrb.mxu3 %v449_v13  ;;  %v557_v10 = vld [vmem:[#allocation2 + $0xe80] sm:$0xff] }
 0x159   :  { %v1900_v23 = vsel %vm1899_vm3, %v2264_v53, %v1896_v16  ;;  %1600 = vmatpush.msrb.mxu0 %v299_v14  ;;  %1619 = vmatpush.msrb.mxu1 %v350_v15  ;;  %v569_v53 = vld [vmem:[#allocation2 + $0xee0] sm:$0xff]  ;;  %v602_v14 = vld [vmem:[#allocation2 + $0xfe8] sm:$0xff]  ;;  %v1206_v16 = vpop.f32.mrf.mxu0 }
 0x15a   :  { %v1932_v26 = vmul.f32 %v1929_v19, %v1900_v23  ;;  %1640 = vmatpush.msrb.mxu2 %v395_v17  ;;  %1659 = vmatpush.msrb.mxu3 %v446_v18  ;;  %v2306_v12 = vld [vmem:[#allocation4] sm:$0x7]  ;;  %v1994_v17 = vld [vmem:[%s2351_s0 + $0x28] sm:$0xff]  ;;  %v503_v18 = vld [vmem:[#allocation2 + $0xcd0] sm:$0xff] }
 0x15b   :  { %1601 = vmatpush.msrb.mxu0 %v296_v21  ;;  %1620 = vmatpush.msrb.mxu1 %v347_v22  ;;  %v864_v13 = vperm.slane %v2306_v12, 1  ;;  %v653_v15 = vld [vmem:[#allocation2 + $0x1180] sm:$0xff]  ;;  %v554_v19 = vld [vmem:[#allocation2 + $0xe68] sm:$0xff]  ;;  %v500_v22 = vld [vmem:[#allocation2 + $0xcb8] sm:$0xff] }
 0x15c   :  { %v1943_v30 = vadd.f32 %v1937_v20, %v1932_v26  ;;  %1641 = vmatpush.msrb.mxu2 %v392_v24  ;;  %1660 = vmatpush.msrb.mxu3 %v443_v25  ;;  %v599_v20 = vld [vmem:[#allocation2 + $0xfd0] sm:$0xff]  ;;  %v650_v21 = vld [vmem:[#allocation2 + $0x1168] sm:$0xff]  ;;  %v596_v25 = vld [vmem:[#allocation2 + $0xfb8] sm:$0xff] }
 0x15d   :  { %1602 = vmatpush.msrb.mxu0 %v293_v27  ;;  %1621 = vmatpush.msrb.mxu1 %v344_v28  ;;  %v551_v23 = vld [vmem:[#allocation2 + $0xe50] sm:$0xff]  ;;  %v1207_v24 = vadd.f32 %v1206_v16, %v864_v13  ;;  %v1226_v27 = vpop.f32.mrf.mxu1  ;;  %v497_v28 = vld [vmem:[#allocation2 + $0xca0] sm:$0xff]  ;;  %v1997_v16 = vld [vmem:[%s2351_s0 + $0x48] sm:$0xff] }
 0x15e   :  { %1946 = vst [vmem:[%s2356_s5] sm:$0xff] %v1943_v30  ;;  %1642 = vmatpush.msrb.mxu2 %v389_v48  ;;  %1661 = vmatpush.msrb.mxu3 %v440_v29  ;;  %v647_v26 = vld [vmem:[#allocation2 + $0x1150] sm:$0xff]  ;;  %v548_v48 = vld [vmem:[#allocation2 + $0xe38] sm:$0xff]  ;;  %v593_v29 = vld [vmem:[#allocation2 + $0xfa0] sm:$0xff] }
 0x15f   :  { %1603 = vmatpush.msrb.mxu0 %v290_v31  ;;  %1622 = vmatpush.msrb.mxu1 %v341_v32  ;;  %v644_v30 = vld [vmem:[#allocation2 + $0x1138] sm:$0xff]  ;;  %v494_v31 = vld [vmem:[#allocation2 + $0xc88] sm:$0xff]  ;;  %v545_v32 = vld [vmem:[#allocation2 + $0xe20] sm:$0xff] }
 0x160   :  { %1643 = vmatpush.msrb.mxu2 %v386_v33  ;;  %1662 = vmatpush.msrb.mxu3 %v437_v34  ;;  %v1227_v33 = vadd.f32 %v1226_v27, %v1207_v24  ;;  %v590_v34 = vld [vmem:[#allocation2 + $0xf88] sm:$0xff]  ;;  %v809_v13 = vld [vmem:[#allocation2 + $0x1660] sm:$0xff] }
 0x161   :  { %1604 = vmatpush.msrb.mxu0 %v287_v35  ;;  %1623 = vmatpush.msrb.mxu1 %v338_v36  ;;  %v641_v35 = vld [vmem:[#allocation2 + $0x1120] sm:$0xff]  ;;  %v1246_v36 = vpop.f32.mrf.mxu2 }
 0x162   :  { %1644 = vmatpush.msrb.mxu2 %v383_v37  ;;  %1663 = vmatpush.msrb.mxu3 %v434_v38  ;;  %v491_v37 = vld [vmem:[#allocation2 + $0xc70] sm:$0xff]  ;;  %v542_v38 = vld [vmem:[#allocation2 + $0xe08] sm:$0xff] }
 0x163   :  { %1525 = vmatmul.f32.vlgmr.msra.gmra.mxu0 %v1986_v43  ;;  %1565 = vmatmul.f32.vlgmr.msra.gmra.mxu2 %v1987_v44  ;;  %v1247_v43 = vadd.f32 %v1246_v36, %v1227_v33  ;;  %v584_v44 = vld [vmem:[#allocation2 + $0xf58] sm:$0xff] }
 0x164   :  { %1669 = vmatpush.msra.mxu0 %v524_v39  ;;  %1709 = vmatpush.msra.mxu2 %v620_v40  ;;  %v587_v39 = vld [vmem:[#allocation2 + $0xf70] sm:$0xff]  ;;  %v638_v40 = vld [vmem:[#allocation2 + $0x1108] sm:$0xff]  ;;  %v752_v33 = vld [vmem:[#allocation2 + $0x1498] sm:$0xff] }
 0x165   :  { %1624 = vmatpush.msrb.mxu1 %v335_v41  ;;  %1664 = vmatpush.msrb.mxu3 %v431_v42  ;;  %v488_v41 = vld [vmem:[#allocation2 + $0xc58] sm:$0xff]  ;;  %v539_v42 = vld [vmem:[#allocation2 + $0xdf0] sm:$0xff] }
 0x166   :  { %1545 = vmatmul.f32.vlgmr.msra.gmra.mxu1 %v1988_v50  ;;  %1585 = vmatmul.f32.vlgmr.msra.gmra.mxu3 %v1989_v51  ;;  %v581_v50 = vld [vmem:[#allocation2 + $0xf40] sm:$0xff]  ;;  %v632_v51 = vld [vmem:[#allocation2 + $0x10d8] sm:$0xff] }
 0x167   :  { %1670 = vmatpush.msra.mxu0 %v521_v45  ;;  %1689 = vmatpush.msra.mxu1 %v572_v46  ;;  %v635_v45 = vld [vmem:[#allocation2 + $0x10f0] sm:$0xff]  ;;  %v1266_v46 = vpop.f32.mrf.mxu3  ;;  %v848_v36 = vld [vmem:[#allocation2 + $0x1798] sm:$0xff] }
 0x168   :  { %1710 = vmatpush.msra.mxu2 %v617_v47  ;;  %1729 = vmatpush.msra.mxu3 %v668_v49  ;;  %v485_v47 = vld [vmem:[#allocation2 + $0xc40] sm:$0xff]  ;;  %v536_v49 = vld [vmem:[#allocation2 + $0xdd8] sm:$0xff] }
 0x169   :  { %1671 = vmatpush.msra.mxu0 %v518_v52  ;;  %1690 = vmatpush.msra.mxu1 %v569_v53  ;;  %v482_v52 = vld [vmem:[#allocation2 + $0xc28] sm:$0xff]  ;;  %v533_v53 = vld [vmem:[#allocation2 + $0xdc0] sm:$0xff] }
 0x16a   :  { %1711 = vmatpush.msra.mxu2 %v614_v54  ;;  %1730 = vmatpush.msra.mxu3 %v665_v55  ;;  %v1267_v54 = vadd.f32 %v1266_v46, %v1247_v43  ;;  %v578_v55 = vld [vmem:[#allocation2 + $0xf28] sm:$0xff]  ;;  %v695_v43 = vld [vmem:[#allocation2 + $0x12d0] sm:$0xff] }
 0x16b   :  { %1672 = vmatpush.msra.mxu0 %v515_v56  ;;  %1691 = vmatpush.msra.mxu1 %v566_v57  ;;  %v629_v56 = vld [vmem:[#allocation2 + $0x10c0] sm:$0xff]  ;;  %v1286_v57 = vpop.f32.mrf.mxu0  ;;  %v842_v46 = vld [vmem:[#allocation2 + $0x1768] sm:$0xff] }
 0x16c   :  { %1712 = vmatpush.msra.mxu2 %v611_v58  ;;  %1731 = vmatpush.msra.mxu3 %v662_v59  ;;  %v479_v58 = vld [vmem:[#allocation2 + $0xc10] sm:$0xff]  ;;  %v530_v59 = vld [vmem:[#allocation2 + $0xda8] sm:$0xff] }
 0x16d   :  { %1645 = vmatmul.f32.vlgmr.msrb.gmra.mxu2 %v1990_v2  ;;  %1673 = vmatpush.msra.mxu0 %v512_v60  ;;  %v575_v60 = vld [vmem:[#allocation2 + $0xf10] sm:$0xff]  ;;  %v812_v2 = vld [vmem:[#allocation2 + $0x1678] sm:$0xff] }
 0x16e   :  { %1692 = vmatpush.msra.mxu1 %v563_v61  ;;  %1713 = vmatpush.msra.mxu2 %v608_v63  ;;  %v626_v61 = vld [vmem:[#allocation2 + $0x10a8] sm:$0xff]  ;;  %v1287_v63 = vadd.f32 %v1286_v57, %v1267_v54  ;;  %v689_v54 = vld [vmem:[#allocation2 + $0x12a0] sm:$0xff] }
 0x16f   :  { %1732 = vmatpush.msra.mxu3 %v659_v1  ;;  %1605 = vmatmul.f32.vlgmr.msrb.gmra.mxu0 %v1991_v6  ;;  %v716_v1 = vld [vmem:[#allocation2 + $0x1378] sm:$0xff]  ;;  %v1995_v6 = vld [vmem:[%s2351_s0 + $0x40] sm:$0xff]  ;;  %v1346_v27 = vpop.f32.mrf.mxu3 }
 0x170   :  { %1665 = vmatmul.f32.vlgmr.msrb.gmra.mxu3 %v1992_v8  ;;  %1674 = vmatpush.msra.mxu0 %v509_v3  ;;  %v1306_v3 = vpop.f32.mrf.mxu1  ;;  %v713_v8 = vld [vmem:[#allocation2 + $0x1360] sm:$0xff] }
 0x171   :  { %1693 = vmatpush.msra.mxu1 %v560_v4  ;;  %1714 = vmatpush.msra.mxu2 %v605_v5  ;;  %v527_v4 = vld [vmem:[#allocation2 + $0xd90] sm:$0xff]  ;;  %v785_v57 = vld [vmem:[#allocation2 + $0x15a0] sm:$0xff] }
 0x172   :  { %1733 = vmatpush.msra.mxu3 %v656_v7  ;;  %1625 = vmatmul.f32.vlgmr.msrb.gmra.mxu1 %v1994_v17  ;;  %v623_v5 = vld [vmem:[#allocation2 + $0x1090] sm:$0xff]  ;;  %v1998_v17 = vld [vmem:[%s2351_s0 + $0x58] sm:$0xff] }
 0x173   :  { %1675 = vmatpush.msra.mxu0 %v506_v9  ;;  %1694 = vmatpush.msra.mxu1 %v557_v10  ;;  %v1996_v7 = vld [vmem:[%s2351_s0 + $0x50] sm:$0xff]  ;;  %v764_v9 = vld [vmem:[#allocation2 + $0x14f8] sm:$0xff]  ;;  %v1307_v10 = vadd.f32 %v1306_v3, %v1287_v63  ;;  %v782_v63 = vld [vmem:[#allocation2 + $0x1588] sm:$0xff] }
 0x174   :  { %1715 = vmatpush.msra.mxu2 %v602_v14  ;;  %1734 = vmatpush.msra.mxu3 %v653_v15  ;;  %v860_v14 = vld [vmem:[#allocation2 + $0x17f8] sm:$0xff]  ;;  %v1326_v15 = vpop.f32.mrf.mxu2  ;;  %v734_v3 = vld [vmem:[#allocation2 + $0x1408] sm:$0xff] }
 0x175   :  { %1676 = vmatpush.msra.mxu0 %v503_v18  ;;  %1695 = vmatpush.msra.mxu1 %v554_v19  ;;  %v710_v18 = vld [vmem:[#allocation2 + $0x1348] sm:$0xff]  ;;  %v761_v19 = vld [vmem:[#allocation2 + $0x14e0] sm:$0xff]  ;;  %v1327_v24 = vadd.f32 %v1326_v15, %v1307_v10  ;;  %v776_v10 = vld [vmem:[#allocation2 + $0x1558] sm:$0xff] }
 0x176   :  { %1716 = vmatpush.msra.mxu2 %v599_v20  ;;  %1735 = vmatpush.msra.mxu3 %v650_v21  ;;  %v806_v20 = vld [vmem:[#allocation2 + $0x1648] sm:$0xff]  ;;  %v857_v21 = vld [vmem:[#allocation2 + $0x17e0] sm:$0xff] }
 0x177   :  { %1677 = vmatpush.msra.mxu0 %v500_v22  ;;  %1696 = vmatpush.msra.mxu1 %v551_v23  ;;  %v707_v22 = vld [vmem:[#allocation2 + $0x1330] sm:$0xff]  ;;  %v758_v23 = vld [vmem:[#allocation2 + $0x14c8] sm:$0xff]  ;;  %v677_v15 = vld [vmem:[#allocation2 + $0x1240] sm:$0xff] }
 0x178   :  { %1717 = vmatpush.msra.mxu2 %v596_v25  ;;  %1736 = vmatpush.msra.mxu3 %v647_v26  ;;  %v803_v25 = vld [vmem:[#allocation2 + $0x1630] sm:$0xff]  ;;  %v854_v26 = vld [vmem:[#allocation2 + $0x17c8] sm:$0xff] }
 0x179   :  { %1678 = vmatpush.msra.mxu0 %v497_v28  ;;  %1697 = vmatpush.msra.mxu1 %v548_v48  ;;  %v704_v28 = vld [vmem:[#allocation2 + $0x1318] sm:$0xff]  ;;  %v755_v48 = vld [vmem:[#allocation2 + $0x14b0] sm:$0xff] }
 0x17a   :  { %1718 = vmatpush.msra.mxu2 %v593_v29  ;;  %1737 = vmatpush.msra.mxu3 %v644_v30  ;;  %v800_v29 = vld [vmem:[#allocation2 + $0x1618] sm:$0xff]  ;;  %v851_v30 = vld [vmem:[#allocation2 + $0x17b0] sm:$0xff] }
 0x17b   :  { %1679 = vmatpush.msra.mxu0 %v494_v31  ;;  %1698 = vmatpush.msra.mxu1 %v545_v32  ;;  %v701_v32 = vld [vmem:[#allocation2 + $0x1300] sm:$0xff] }
 0x17c   :  { %1719 = vmatpush.msra.mxu2 %v590_v34  ;;  %1738 = vmatpush.msra.mxu3 %v641_v35  ;;  %v1366_v31 = vpop.f32.mrf.mxu0  ;;  %v1347_v34 = vadd.f32 %v1346_v27, %v1327_v24  ;;  %v797_v35 = vld [vmem:[#allocation2 + $0x1600] sm:$0xff] }
 0x17d   :  { %1680 = vmatpush.msra.mxu0 %v491_v37  ;;  %1699 = vmatpush.msra.mxu1 %v542_v38  ;;  %v698_v37 = vld [vmem:[#allocation2 + $0x12e8] sm:$0xff]  ;;  %v749_v38 = vld [vmem:[#allocation2 + $0x1480] sm:$0xff] }
 0x17e   :  { %1720 = vmatpush.msra.mxu2 %v587_v39  ;;  %1739 = vmatpush.msra.mxu3 %v638_v40  ;;  %v1367_v39 = vadd.f32 %v1366_v31, %v1347_v34  ;;  %v794_v40 = vld [vmem:[#allocation2 + $0x15e8] sm:$0xff]  ;;  %v815_v31 = vld [vmem:[#allocation2 + $0x1690] sm:$0xff]  ;;  %v1999_v34 = vld [vmem:[%s2351_s0 + $0x60] sm:$0xff] }
 0x17f   :  { %1681 = vmatpush.msra.mxu0 %v488_v41  ;;  %1700 = vmatpush.msra.mxu1 %v539_v42  ;;  %v845_v41 = vld [vmem:[#allocation2 + $0x1780] sm:$0xff]  ;;  %v1386_v42 = vpop.f32.mrf.mxu1 }
 0x180   :  { %1721 = vmatpush.msra.mxu2 %v584_v44  ;;  %1740 = vmatpush.msra.mxu3 %v635_v45  ;;  %v746_v44 = vld [vmem:[#allocation2 + $0x1468] sm:$0xff]  ;;  %v791_v45 = vld [vmem:[#allocation2 + $0x15d0] sm:$0xff] }
 0x181   :  { %1682 = vmatpush.msra.mxu0 %v485_v47  ;;  %1701 = vmatpush.msra.mxu1 %v536_v49  ;;  %v692_v49 = vld [vmem:[#allocation2 + $0x12b8] sm:$0xff] }
 0x182   :  { %1722 = vmatpush.msra.mxu2 %v581_v50  ;;  %1741 = vmatpush.msra.mxu3 %v632_v51  ;;  %v1406_v47 = vpop.f32.mrf.mxu2  ;;  %v743_v50 = vld [vmem:[#allocation2 + $0x1450] sm:$0xff]  ;;  %v1387_v51 = vadd.f32 %v1386_v42, %v1367_v39 }
 0x183   :  { %1683 = vmatpush.msra.mxu0 %v482_v52  ;;  %1702 = vmatpush.msra.mxu1 %v533_v53  ;;  %v788_v52 = vld [vmem:[#allocation2 + $0x15b8] sm:$0xff]  ;;  %v839_v53 = vld [vmem:[#allocation2 + $0x1750] sm:$0xff] }
 0x184   :  { %1723 = vmatpush.msra.mxu2 %v578_v55  ;;  %1742 = vmatpush.msra.mxu3 %v629_v56  ;;  %v740_v55 = vld [vmem:[#allocation2 + $0x1438] sm:$0xff]  ;;  %v1407_v56 = vadd.f32 %v1406_v47, %v1387_v51 }
 0x185   :  { %1684 = vmatpush.msra.mxu0 %v479_v58  ;;  %1703 = vmatpush.msra.mxu1 %v530_v59  ;;  %v836_v58 = vld [vmem:[#allocation2 + $0x1738] sm:$0xff]  ;;  %v1426_v59 = vpop.f32.mrf.mxu3 }
 0x186   :  { %1724 = vmatpush.msra.mxu2 %v575_v60  ;;  %1743 = vmatpush.msra.mxu3 %v626_v61  ;;  %v686_v60 = vld [vmem:[#allocation2 + $0x1288] sm:$0xff]  ;;  %v737_v61 = vld [vmem:[#allocation2 + $0x1420] sm:$0xff] }
 0x187   :  { %1685 = vmatmul.f32.vlgmr.msra.gmra.mxu0 %v1995_v6  ;;  %1725 = vmatmul.f32.vlgmr.msra.gmra.mxu2 %v1996_v7  ;;  %v830_v6 = vld [vmem:[#allocation2 + $0x1708] sm:$0xff]  ;;  %v680_v7 = vld [vmem:[#allocation2 + $0x1258] sm:$0xff] }
 0x188   :  { %1749 = vmatpush.msrb.mxu0 %v716_v1  ;;  %1789 = vmatpush.msrb.mxu2 %v812_v2  ;;  %v833_v1 = vld [vmem:[#allocation2 + $0x1720] sm:$0xff]  ;;  %v683_v2 = vld [vmem:[#allocation2 + $0x1270] sm:$0xff] }
 0x189   :  { %1704 = vmatpush.msra.mxu1 %v527_v4  ;;  %1744 = vmatpush.msra.mxu3 %v623_v5  ;;  %v1427_v4 = vadd.f32 %v1426_v59, %v1407_v56  ;;  %v779_v5 = vld [vmem:[#allocation2 + $0x1570] sm:$0xff] }
 0x18a   :  { %1705 = vmatmul.f32.vlgmr.msra.gmra.mxu1 %v1997_v16  ;;  %1745 = vmatmul.f32.vlgmr.msra.gmra.mxu3 %v1998_v17  ;;  %v728_v16 = vld [vmem:[#allocation2 + $0x13d8] sm:$0xff]  ;;  %v773_v17 = vld [vmem:[#allocation2 + $0x1540] sm:$0xff] }
 0x18b   :  { %1750 = vmatpush.msrb.mxu0 %v713_v8  ;;  %1769 = vmatpush.msrb.mxu1 %v764_v9  ;;  %v731_v8 = vld [vmem:[#allocation2 + $0x13f0] sm:$0xff] }
 0x18c   :  { %1790 = vmatpush.msrb.mxu2 %v809_v13  ;;  %1809 = vmatpush.msrb.mxu3 %v860_v14  ;;  %v827_v13 = vld [vmem:[#allocation2 + $0x16f0] sm:$0xff] }
 0x18d   :  { %1751 = vmatpush.msrb.mxu0 %v710_v18  ;;  %1770 = vmatpush.msrb.mxu1 %v761_v19  ;;  %v824_v18 = vld [vmem:[#allocation2 + $0x16d8] sm:$0xff] }
 0x18e   :  { %1791 = vmatpush.msrb.mxu2 %v806_v20  ;;  %1810 = vmatpush.msrb.mxu3 %v857_v21  ;;  %v674_v20 = vld [vmem:[#allocation2 + $0x1228] sm:$0xff]  ;;  %v725_v21 = vld [vmem:[#allocation2 + $0x13c0] sm:$0xff] }
 0x18f   :  { %1752 = vmatpush.msrb.mxu0 %v707_v22  ;;  %1771 = vmatpush.msrb.mxu1 %v758_v23  ;;  %v770_v22 = vld [vmem:[#allocation2 + $0x1528] sm:$0xff]  ;;  %v821_v23 = vld [vmem:[#allocation2 + $0x16c0] sm:$0xff] }
 0x190   :  { %1792 = vmatpush.msrb.mxu2 %v803_v25  ;;  %1811 = vmatpush.msrb.mxu3 %v854_v26  ;;  %v671_v25 = vld [vmem:[#allocation2 + $0x1210] sm:$0xff]  ;;  %v722_v26 = vld [vmem:[#allocation2 + $0x13a8] sm:$0xff] }
 0x191   :  { %1753 = vmatpush.msrb.mxu0 %v704_v28  ;;  %1772 = vmatpush.msrb.mxu1 %v755_v48  ;;  %v767_v28 = vld [vmem:[#allocation2 + $0x1510] sm:$0xff]  ;;  %v818_v48 = vld [vmem:[#allocation2 + $0x16a8] sm:$0xff] }
 0x192   :  { %1793 = vmatpush.msrb.mxu2 %v800_v29  ;;  %1812 = vmatpush.msrb.mxu3 %v851_v30  ;;  %v719_v30 = vld [vmem:[#allocation2 + $0x1390] sm:$0xff] }
 0x193   :  { %1754 = vmatpush.msrb.mxu0 %v701_v32  ;;  %1773 = vmatpush.msrb.mxu1 %v752_v33 }
 0x194   :  { %1794 = vmatpush.msrb.mxu2 %v797_v35  ;;  %1813 = vmatpush.msrb.mxu3 %v848_v36  ;;  %v2000_v35 = vld [vmem:[%s2351_s0 + $0x70] sm:$0xff] }
 0x195   :  { %1755 = vmatpush.msrb.mxu0 %v698_v37  ;;  %1774 = vmatpush.msrb.mxu1 %v749_v38  ;;  %v2001_v37 = vld [vmem:[%s2351_s0 + $0x68] sm:$0xff]  ;;  %v2002_v38 = vld [vmem:[%s2351_s0 + $0x78] sm:$0xff] }
 0x196   :  { %1795 = vmatpush.msrb.mxu2 %v794_v40  ;;  %1814 = vmatpush.msrb.mxu3 %v845_v41 }
 0x197   :  { %1756 = vmatpush.msrb.mxu0 %v695_v43  ;;  %1775 = vmatpush.msrb.mxu1 %v746_v44 }
 0x198   :  { %1796 = vmatpush.msrb.mxu2 %v791_v45  ;;  %1815 = vmatpush.msrb.mxu3 %v842_v46 }
 0x199   :  { %1757 = vmatpush.msrb.mxu0 %v692_v49  ;;  %1776 = vmatpush.msrb.mxu1 %v743_v50 }
 0x19a   :  { %1797 = vmatpush.msrb.mxu2 %v788_v52  ;;  %1816 = vmatpush.msrb.mxu3 %v839_v53 }
 0x19b   :  { %1758 = vmatpush.msrb.mxu0 %v689_v54  ;;  %1777 = vmatpush.msrb.mxu1 %v740_v55 }
 0x19c   :  { %1798 = vmatpush.msrb.mxu2 %v785_v57  ;;  %1817 = vmatpush.msrb.mxu3 %v836_v58 }
 0x19d   :  { %1759 = vmatpush.msrb.mxu0 %v686_v60  ;;  %1778 = vmatpush.msrb.mxu1 %v737_v61 }
 0x19e   :  { %1799 = vmatpush.msrb.mxu2 %v782_v63  ;;  %1818 = vmatpush.msrb.mxu3 %v833_v1  ;;  %v1446_v9 = vpop.f32.mrf.mxu0  ;;  %v1924_v63 = vperm.slane %v2269_v62, 1 }
 0x19f   :  { %1760 = vmatpush.msrb.mxu0 %v683_v2  ;;  %1779 = vmatpush.msrb.mxu1 %v734_v3  ;;  %v1447_v14 = vadd.f32 %v1446_v9, %v1427_v4  ;;  %v1938_v4 = vperm.slane %v2273_v11, 1 }
 0x1a0   :  { %1800 = vmatpush.msrb.mxu2 %v779_v5  ;;  %1819 = vmatpush.msrb.mxu3 %v830_v6 }
 0x1a1   :  { %1761 = vmatpush.msrb.mxu0 %v680_v7  ;;  %1780 = vmatpush.msrb.mxu1 %v731_v8  ;;  %v1466_v19 = vpop.f32.mrf.mxu1  ;;  %v865_v8 = vperm.slane %v2306_v12, 2 }
 0x1a2   :  { %1801 = vmatpush.msrb.mxu2 %v776_v10  ;;  %1820 = vmatpush.msrb.mxu3 %v827_v13  ;;  %v1467_v24 = vadd.f32 %v1466_v19, %v1447_v14 }
 0x1a3   :  { %1762 = vmatpush.msrb.mxu0 %v677_v15  ;;  %1781 = vmatpush.msrb.mxu1 %v728_v16 }
 0x1a4   :  { %1802 = vmatpush.msrb.mxu2 %v773_v17  ;;  %1821 = vmatpush.msrb.mxu3 %v824_v18  ;;  %v1486_v27 = vpop.f32.mrf.mxu2 }
 0x1a5   :  { %1763 = vmatpush.msrb.mxu0 %v674_v20  ;;  %1782 = vmatpush.msrb.mxu1 %v725_v21  ;;  %v1487_v29 = vadd.f32 %v1486_v27, %v1467_v24 }
 0x1a6   :  { %1803 = vmatpush.msrb.mxu2 %v770_v22  ;;  %1822 = vmatpush.msrb.mxu3 %v821_v23 }
 0x1a7   :  { %1764 = vmatpush.msrb.mxu0 %v671_v25  ;;  %1783 = vmatpush.msrb.mxu1 %v722_v26  ;;  %v1506_v32 = vpop.f32.mrf.mxu3 }
 0x1a8   :  { %1804 = vmatpush.msrb.mxu2 %v767_v28  ;;  %1823 = vmatpush.msrb.mxu3 %v818_v48  ;;  %v1507_v33 = vadd.f32 %v1506_v32, %v1487_v29 }
 0x1a9   :  { %1765 = vmatmul.f32.vlgmr.msrb.gmra.mxu0 %v1999_v34  ;;  %1805 = vmatmul.f32.vlgmr.msrb.gmra.mxu2 %v2000_v35 }
 0x1aa   :  { %1784 = vmatpush.msrb.mxu1 %v719_v30  ;;  %1824 = vmatpush.msrb.mxu3 %v815_v31  ;;  %v1835_v36 = vmul.f32 %v2238_v0, %v1507_v33 }
 0x1ab   :  { %1785 = vmatmul.f32.vlgmr.msrb.gmra.mxu1 %v2001_v37  ;;  %1825 = vmatmul.f32.vlgmr.msrb.gmra.mxu3 %v2002_v38 }
 0x1ac   :  { %v1843_v39 = vrot.slane %v1835_v36, 4 }
 0x1ae   :  { %v1844_v40 = vadd.f32 %v1843_v39, %v1835_v36 }
 0x1b0   :  { %v1845_v41 = vrot.slane %v1844_v40, 2 }
 0x1b2   :  { %v1846_v42 = vadd.f32 %v1845_v41, %v1844_v40 }
 0x1b4   :  { %v1847_v43 = vrot.slane %v1846_v42, 1 }
 0x1b6   :  { %v1848_v44 = vadd.f32 %v1847_v43, %v1846_v42 }
 0x1b8   :  { %v1856_v45 = vmul.f32 0.5, %v1848_v44 }
 0x1ba   :  { %v1859_v46 = vsub.f32 %v1507_v33, %v1856_v45 }
 0x1bc   :  { %v1862_v47 = vmul.f32 %v2238_v0, %v1859_v46  ;;  %v1930_v3 = vmul.f32 %v1924_v63, %v1859_v46 }
 0x1be   :  { %v1865_v49 = vmul.f32 %v1862_v47, %v1862_v47 }
 0x1c0   :  { %v1873_v50 = vrot.slane %v1865_v49, 4 }
 0x1c2   :  { %v1874_v51 = vadd.f32 %v1873_v50, %v1865_v49 }
 0x1c4   :  { %v1875_v52 = vrot.slane %v1874_v51, 2 }
 0x1c6   :  { %v1876_v53 = vadd.f32 %v1875_v52, %v1874_v51 }
 0x1c8   :  { %v1877_v54 = vrot.slane %v1876_v53, 1 }
 0x1ca   :  { %v1878_v55 = vadd.f32 %v1877_v54, %v1876_v53 }
 0x1cc   :  { %v1886_v56 = vmul.f32 0.5, %v1878_v55 }
 0x1ce   :  { %v1889_v57 = vadd.f32 1e-05, %v1886_v56 }
 0x1d0   :  { %1966 = vrsqrt.f32 %v1889_v57  ;;  %vm1907_vm5 = vweird.f32 %v1889_v57 }
 0x1d6   :  { %v1967_v58 = vpop.eup %1966 }
 0x1d7   :  { %v1902_v59 = vmul.f32 %v1967_v58, %v1889_v57  ;;  %vm1908_vm4 = vweird.f32 %v1967_v58 }
 0x1d8   :  { %vm1909_vm6 = vmor %vm1907_vm5, %vm1908_vm4 }
 0x1d9   :  { %v1903_v60 = vmul.f32 %v1967_v58, %v1902_v59 }
 0x1db   :  { %v1904_v61 = vmul.f32 0.5, %v1903_v60 }
 0x1dd   :  { %v1905_v1 = vsub.f32 1.5, %v1904_v61 }
 0x1df   :  { %v1906_v2 = vmul.f32 %v1967_v58, %v1905_v1 }
 0x1e0   :  { %v1526_v9 = vpop.f32.mrf.mxu0 }
 0x1e1   :  { %v1910_v5 = vsel %vm1909_vm6, %v1967_v58, %v1906_v2  ;;  %v1527_v10 = vadd.f32 %v1526_v9, %v865_v8 }
 0x1e2   :  { %v1933_v6 = vmul.f32 %v1930_v3, %v1910_v5  ;;  %v1925_v3 = vperm.slane %v2269_v62, 2 }
 0x1e3   :  { %v1546_v13 = vpop.f32.mrf.mxu1 }
 0x1e4   :  { %v1944_v7 = vadd.f32 %v1938_v4, %v1933_v6  ;;  %v1547_v14 = vadd.f32 %v1546_v13, %v1527_v10  ;;  %v1939_v6 = vperm.slane %v2273_v11, 2 }
 0x1e6   :  { %1947 = vst [vmem:[%s2356_s5 + $0x8] sm:$0xff] %v1944_v7  ;;  %v1566_v15 = vpop.f32.mrf.mxu2 }
 0x1e7   :  { %v1567_v16 = vadd.f32 %v1566_v15, %v1547_v14 }
 0x1e9   :  { %v1586_v17 = vpop.f32.mrf.mxu3 }
 0x1ea   :  { %v1587_v18 = vadd.f32 %v1586_v17, %v1567_v16 }
 0x1ec   :  { %v1606_v19 = vpop.f32.mrf.mxu0 }
 0x1ed   :  { %v1607_v20 = vadd.f32 %v1606_v19, %v1587_v18 }
 0x1ef   :  { %v1626_v21 = vpop.f32.mrf.mxu1 }
 0x1f0   :  { %v1627_v22 = vadd.f32 %v1626_v21, %v1607_v20  ;;  %v1646_v23 = vpop.f32.mrf.mxu2 }
 0x1f2   :  { %v1647_v24 = vadd.f32 %v1646_v23, %v1627_v22 }
 0x1f3   :  { %v1666_v25 = vpop.f32.mrf.mxu3 }
 0x1f4   :  { %v1667_v27 = vadd.f32 %v1666_v25, %v1647_v24 }
 0x204   :  { %v1686_v26 = vpop.f32.mrf.mxu0 }
 0x205   :  { %v1687_v28 = vadd.f32 %v1686_v26, %v1667_v27 }
 0x207   :  { %v1706_v48 = vpop.f32.mrf.mxu1 }
 0x208   :  { %v1707_v29 = vadd.f32 %v1706_v48, %v1687_v28 }
 0x20a   :  { %v1726_v12 = vpop.f32.mrf.mxu2 }
 0x20b   :  { %v1727_v30 = vadd.f32 %v1726_v12, %v1707_v29 }
 0x20d   :  { %v1746_v31 = vpop.f32.mrf.mxu3 }
 0x20e   :  { %v1747_v32 = vadd.f32 %v1746_v31, %v1727_v30 }
 0x226   :  { %v1766_v33 = vpop.f32.mrf.mxu0 }
 0x227   :  { %v1767_v34 = vadd.f32 %v1766_v33, %v1747_v32 }
 0x228   :  { %v1786_v35 = vpop.f32.mrf.mxu1 }
 0x229   :  { %v1787_v36 = vadd.f32 %v1786_v35, %v1767_v34 }
 0x22c   :  { %v1806_v37 = vpop.f32.mrf.mxu2 }
 0x22d   :  { %v1807_v38 = vadd.f32 %v1806_v37, %v1787_v36 }
 0x22e   :  { %v1826_v39 = vpop.f32.mrf.mxu3 }
 0x22f   :  { %v1827_v40 = vadd.f32 %v1826_v39, %v1807_v38 }
 0x231   :  { %v1836_v41 = vmul.f32 %v2238_v0, %v1827_v40 }
 0x233   :  { %v1849_v42 = vrot.slane %v1836_v41, 4 }
 0x235   :  { %v1850_v43 = vadd.f32 %v1849_v42, %v1836_v41 }
 0x237   :  { %v1851_v44 = vrot.slane %v1850_v43, 2 }
 0x239   :  { %v1852_v45 = vadd.f32 %v1851_v44, %v1850_v43 }
 0x23b   :  { %v1853_v46 = vrot.slane %v1852_v45, 1 }
 0x23d   :  { %v1854_v47 = vadd.f32 %v1853_v46, %v1852_v45 }
 0x23f   :  { %v1857_v49 = vmul.f32 0.5, %v1854_v47 }
 0x241   :  { %v1860_v50 = vsub.f32 %v1827_v40, %v1857_v49 }
 0x243   :  { %v1863_v51 = vmul.f32 %v2238_v0, %v1860_v50  ;;  %v1931_v0 = vmul.f32 %v1925_v3, %v1860_v50 }
 0x245   :  { %v1866_v52 = vmul.f32 %v1863_v51, %v1863_v51 }
 0x247   :  { %v1879_v53 = vrot.slane %v1866_v52, 4 }
 0x249   :  { %v1880_v54 = vadd.f32 %v1879_v53, %v1866_v52 }
 0x24b   :  { %v1881_v55 = vrot.slane %v1880_v54, 2 }
 0x24d   :  { %v1882_v56 = vadd.f32 %v1881_v55, %v1880_v54 }
 0x24f   :  { %v1883_v57 = vrot.slane %v1882_v56, 1 }
 0x251   :  { %v1884_v58 = vadd.f32 %v1883_v57, %v1882_v56 }
 0x253   :  { %v1887_v59 = vmul.f32 0.5, %v1884_v58 }
 0x255   :  { %v1890_v60 = vadd.f32 1e-05, %v1887_v59 }
 0x257   :  { %1968 = vrsqrt.f32 %v1890_v60  ;;  %vm1917_vm8 = vweird.f32 %v1890_v60 }
 0x25d   :  { %v1969_v61 = vpop.eup %1968 }
 0x25e   :  { %v1912_v63 = vmul.f32 %v1969_v61, %v1890_v60  ;;  %vm1918_vm7 = vweird.f32 %v1969_v61 }
 0x25f   :  { %vm1919_vm9 = vmor %vm1917_vm8, %vm1918_vm7 }
 0x260   :  { %v1913_v1 = vmul.f32 %v1969_v61, %v1912_v63 }
 0x262   :  { %v1914_v2 = vmul.f32 0.5, %v1913_v1 }
 0x264   :  { %v1915_v4 = vsub.f32 1.5, %v1914_v2 }
 0x266   :  { %v1916_v5 = vmul.f32 %v1969_v61, %v1915_v4 }
 0x268   :  { %v1920_v7 = vsel %vm1919_vm9, %v1969_v61, %v1916_v5 }
 0x269   :  { %v1934_v8 = vmul.f32 %v1931_v0, %v1920_v7 }
 0x26b   :  { %v1945_v9 = vadd.f32 %v1939_v6, %v1934_v8 }
 0x26d   :  { %1948 = vst [vmem:[%s2356_s5 + $0x10] sm:$0xff] %v1945_v9 }
 0x26e   :  { %1953 = vsyncpa [#allocation3], 1 }
 0x26f   :  { %1954 = vsyncpa [#allocation5], 1 }
 0x270   :  { %1955 = vsyncpa [#allocation8], 1 }

</bundles_post_ra>
